<compile_context>
chip_gen: v7x
topology: tpu7x:2x2x1
jax: 0.10.0
libtpu: 0.0.40
codegen_flags: <defaults>
</compile_context>

<pallas_src>
import math

import jax
import jax.numpy as jnp
from jax.experimental import pallas as pl
from jax.experimental.pallas import tpu as pltpu

D = 75        # d_model (in_channels)
H = 25        # num_heads
HD = D // H   # head_dim = 3
F = 2048      # dim_feedforward
L = 8         # num_layers
EPS = 1e-5    # LayerNorm eps (PyTorch default)
QP = 128      # lane-aligned stride for the fused q/k/v projection output
QKV_W = 3 * QP


def transformer_kernel(x_ref, mask_ref,
                       wqkv_ref, bqkv_ref, wo_ref,
                       w1q_ref, s1_ref, b1_ref, w2q_ref,
                       small_ref, wfc_ref, bfc_ref,
                       out_ref, x_scr):
    layer = pl.program_id(0)

    # Load the input sequence into the persistent scratch on the first layer.
    @pl.when(layer == 0)
    def _():
        x_scr[...] = x_ref[...]

    x = x_scr[...]                      # (B, S, D) float32
    B, S, Dd = x.shape
    BS = B * S

    mask = mask_ref[...]                # (D, H) one-hot head mask, bf16, VMEM resident
    g1 = small_ref[0:1, :]              # (1, D) each
    be1 = small_ref[1:2, :]
    g2 = small_ref[2:3, :]
    be2 = small_ref[3:4, :]
    bo = small_ref[4:5, :]
    b2 = small_ref[5:6, :]
    s2 = small_ref[6:7, :]              # w2 per-output-channel dequant scale

    def layer_norm(h, g, b):
        mu = jnp.mean(h, axis=-1, keepdims=True)
        c = h - mu
        var = jnp.mean(c * c, axis=-1, keepdims=True)
        return c * jax.lax.rsqrt(var + EPS) * g + b

    # ---------------- self-attention block (pre-norm) ----------------
    # 1/sqrt(head_dim) is already folded into the q columns of wqkv/bqkv (host-side).
    h2d = layer_norm(x, g1, be1).reshape(BS, Dd)
    qkv = jnp.dot(h2d.astype(jnp.bfloat16), wqkv_ref[...],
                  preferred_element_type=jnp.float32) + bqkv_ref[...]      # (BS, 384)
    q = qkv[:, 0:Dd]                          # (BS, D)  lane-aligned slices
    k = qkv[:, QP:QP + Dd]
    v = qkv[:, 2 * QP:2 * QP + Dd]

    # All heads at once via the one-hot head mask (bf16 MXU passes, f32 accumulation).
    prod = q.reshape(B, S, 1, Dd) * k.reshape(B, 1, S, Dd)                 # (B,Sq,Sk,D) f32
    scores = jnp.dot(prod.reshape(B * S * S, Dd).astype(jnp.bfloat16), mask,
                     preferred_element_type=jnp.float32).reshape(B, S, S, H)
    scores = scores - jnp.max(scores, axis=2, keepdims=True)
    p = jnp.exp(scores)
    p = p * pl.reciprocal(jnp.sum(p, axis=2, keepdims=True), approx=True)  # softmax over k

    # Expand each head's probabilities back onto that head's lanes, then weight V.
    p_l = jax.lax.dot_general(p.reshape(B * S * S, H).astype(jnp.bfloat16), mask,
                              (((1,), (1,)), ((), ())),
                              preferred_element_type=jnp.float32).reshape(B, S, S, Dd)
    attn = jnp.sum(p_l * v.reshape(B, 1, S, Dd), axis=2)                   # (B,Sq,D)

    attn_out = jnp.dot(attn.reshape(BS, Dd).astype(jnp.bfloat16), wo_ref[...],
                       preferred_element_type=jnp.float32) + bo
    x = x + attn_out.reshape(B, S, Dd)

    # ---------------- feed-forward block (pre-norm) ----------------
    # w1/w2 arrive as int8; widen to bf16 on-core, apply the per-output-channel dequant
    # scale to the matmul output (exact), biases/elementwise math stay f32.
    h2d = layer_norm(x, g2, be2).reshape(BS, Dd)
    w1_bf = w1q_ref[...].astype(jnp.bfloat16)                              # (D, F)
    f1 = jnp.dot(h2d.astype(jnp.bfloat16), w1_bf,
                 preferred_element_type=jnp.float32) * s1_ref[...] + b1_ref[...]   # (BS, F)
    f1 = jnp.maximum(f1, 0.0).astype(jnp.bfloat16)
    w2_bf = w2q_ref[...].astype(jnp.bfloat16)                              # (D, F) lane-dense
    # TODO(synk): verify via bundle dump that this rhs-transposed contraction lowers to a
    # native trans_b MXU matmul (no hidden XLU transpose of the (75, 2048) tile).
    f2 = jax.lax.dot_general(f1, w2_bf, (((1,), (1,)), ((), ())),
                             preferred_element_type=jnp.float32) * s2 + b2  # (BS, D)
    x = x + f2.reshape(B, S, Dd)

    x_scr[...] = x                      # carry to next layer

    # ---------------- head: mean over seq -> fc -> sigmoid ----------------
    @pl.when(layer == pl.num_programs(0) - 1)
    def _():
        pooled = jnp.mean(x, axis=1)                                       # (B, D)
        logit = jnp.sum(pooled * wfc_ref[...], axis=-1, keepdims=True) + bfc_ref[...]
        out_ref[...] = jax.nn.sigmoid(logit).astype(out_ref.dtype)         # (B, 1)


def make_params(key):
    """Deterministic synthetic parameters.

    Returns (kernel_params, ref_params):
      * kernel_params: pre-packed for the kernel — linear weights stored (in, out);
        linear2.weight kept lane-dense as (d_model, ffn); q/k/v fused with a 128-lane stride
        and the 1/sqrt(head_dim) scale folded into the q columns; QKV/out-proj bf16; FFN
        weights int8 with per-output-channel f32 scales.
      * ref_params: plain f32 parameters of the SAME network (FFN weights dequantised from
        int8) for a pure-JAX reference forward.
    """
    ks = jax.random.split(key, 11)

    def w(k, shape, scale=0.05):
        return (scale * jax.random.normal(k, shape)).astype(jnp.float32)

    wq = w(ks[0], (L, D, D))
    wk = w(ks[1], (L, D, D))
    wv = w(ks[2], (L, D, D))
    wo = w(ks[3], (L, D, D))
    bq = w(ks[4], (L, 1, D), 0.01)
    bk = w(ks[5], (L, 1, D), 0.01)
    bv = w(ks[6], (L, 1, D), 0.01)
    bo = w(ks[7], (L, 1, D), 0.01)
    w1 = w(ks[8], (L, D, F))                        # linear1.weight^T  (in, out)
    w2t = w(ks[9], (L, D, F))                       # linear2.weight    (d_model, ffn)
    b1 = jnp.zeros((L, 1, F), jnp.float32)
    b2 = jnp.zeros((L, 1, D), jnp.float32)
    g1 = jnp.ones((L, 1, D), jnp.float32)
    be1 = jnp.zeros((L, 1, D), jnp.float32)
    g2 = jnp.ones((L, 1, D), jnp.float32)
    be2 = jnp.zeros((L, 1, D), jnp.float32)
    wfc = w(ks[10], (1, D))
    bfc = jnp.zeros((1, 1), jnp.float32)

    # Fold the 1/sqrt(head_dim) attention scale into the q projection.
    scale_q = 1.0 / math.sqrt(HD)

    # Fused, lane-aligned QKV projection: q -> lanes [0,75), k -> [128,203), v -> [256,331).
    wqkv = jnp.zeros((L, D, QKV_W), jnp.float32)
    wqkv = wqkv.at[:, :, 0:D].set(wq * scale_q)
    wqkv = wqkv.at[:, :, QP:QP + D].set(wk)
    wqkv = wqkv.at[:, :, 2 * QP:2 * QP + D].set(wv)
    bqkv = jnp.zeros((L, 1, QKV_W), jnp.float32)
    bqkv = bqkv.at[:, :, 0:D].set(bq * scale_q)
    bqkv = bqkv.at[:, :, QP:QP + D].set(bk)
    bqkv = bqkv.at[:, :, 2 * QP:2 * QP + D].set(bv)

    # int8 FFN weights with per-output-channel symmetric scales.
    def quant_int8(wt, axis):
        amax = jnp.max(jnp.abs(wt), axis=axis, keepdims=True)
        scale = jnp.maximum(amax, 1e-8) / 127.0
        q = jnp.clip(jnp.round(wt / scale), -127.0, 127.0).astype(jnp.int8)
        return q, scale

    w1_q, s1 = quant_int8(w1, axis=1)           # s1:     (L, 1, F)
    w2_q, s2_col = quant_int8(w2t, axis=2)      # s2_col: (L, D, 1)
    s2 = jnp.transpose(s2_col, (0, 2, 1))       # (L, 1, D)

    # Small per-layer (1, D) params packed into one stream: [g1, be1, g2, be2, bo, b2, s2].
    smalls = jnp.concatenate([g1, be1, g2, be2, bo, b2, s2], axis=1)       # (L, 7, D)

    # One-hot head mask (exactly representable in bf16): mask[d, h] = 1 iff lane d is head h.
    head_mask = (jnp.arange(D)[:, None] // HD == jnp.arange(H)[None, :]).astype(jnp.bfloat16)

    kernel_params = dict(
        wqkv=wqkv.astype(jnp.bfloat16), bqkv=bqkv,
        wo=wo.astype(jnp.bfloat16),
        w1q=w1_q, s1=s1, b1=b1, w2q=w2_q,
        smalls=smalls, mask=head_mask,
        wfc=wfc, bfc=bfc,
    )
    ref_params = dict(
        wq=wq, wk=wk, wv=wv, wo=wo, bq=bq, bk=bk, bv=bv, bo=bo,
        w1=w1_q.astype(jnp.float32) * s1,           # (L, D, F) dequantised
        w2=w2_q.astype(jnp.float32) * s2_col,       # (L, D, F) dequantised == linear2.weight
        b1=b1, b2=b2, g1=g1, be1=be1, g2=g2, be2=be2, wfc=wfc, bfc=bfc,
    )
    return kernel_params, ref_params


def ref_forward(x, rp):
    """Pure-JAX f32 reference of the same pre-norm TransformerEncoder forward."""
    B, S, _ = x.shape
    scale = 1.0 / math.sqrt(HD)

    def ln(h, g, b):
        mu = jnp.mean(h, axis=-1, keepdims=True)
        var = jnp.mean((h - mu) ** 2, axis=-1, keepdims=True)
        return (h - mu) / jnp.sqrt(var + EPS) * g + b

    for l in range(L):
        h = ln(x, rp['g1'][l], rp['be1'][l])
        q = (h @ rp['wq'][l] + rp['bq'][l]) * scale
        k = h @ rp['wk'][l] + rp['bk'][l]
        v = h @ rp['wv'][l] + rp['bv'][l]
        qh = q.reshape(B, S, H, HD)
        kh = k.reshape(B, S, H, HD)
        vh = v.reshape(B, S, H, HD)
        s = jnp.einsum('bqhd,bkhd->bhqk', qh, kh)
        p = jax.nn.softmax(s, axis=-1)
        a = jnp.einsum('bhqk,bkhd->bqhd', p, vh).reshape(B, S, D)
        x = x + a @ rp['wo'][l] + rp['bo'][l]
        h = ln(x, rp['g2'][l], rp['be2'][l])
        f = jax.nn.relu(h @ rp['w1'][l] + rp['b1'][l])
        x = x + jnp.einsum('bsf,df->bsd', f, rp['w2'][l]) + rp['b2'][l]
    pooled = x.mean(axis=1)
    logit = pooled @ rp['wfc'].T + rp['bfc']
    return jax.nn.sigmoid(logit)


def _maybe_buffered_spec(block_shape, index_map, nbuf):
    """BlockSpec with an nbuf-deep pipeline if pl.Buffered is available, else default (2)."""
    if nbuf is not None and hasattr(pl, "Buffered"):
        try:
            return pl.BlockSpec(block_shape, index_map, pipeline_mode=pl.Buffered(nbuf))
        except TypeError:
            pass
    return pl.BlockSpec(block_shape, index_map)


def transformer_forward(x, p, ffn_buffers=3):
    B, S, _ = x.shape
    wmap = lambda l: (l, 0, 0)

    grid_spec = pltpu.PrefetchScalarGridSpec(
        num_scalar_prefetch=0,
        grid=(L,),
        in_specs=[
            pl.BlockSpec((B, S, D), lambda l: (0, 0, 0)),            # x (fetched once)
            pl.BlockSpec((D, H), lambda l: (0, 0)),                  # head mask (resident)
            pl.BlockSpec((None, D, QKV_W), wmap),                    # fused wqkv (bf16)
            pl.BlockSpec((None, 1, QKV_W), wmap),                    # fused bqkv
            pl.BlockSpec((None, D, D), wmap),                        # wo (bf16)
            _maybe_buffered_spec((None, D, F), wmap, ffn_buffers),   # w1 (int8)
            pl.BlockSpec((None, 1, F), wmap),                        # w1 dequant scale
            pl.BlockSpec((None, 1, F), wmap),                        # b1
            _maybe_buffered_spec((None, D, F), wmap, ffn_buffers),   # w2 (int8, lane-dense)
            pl.BlockSpec((None, 7, D), wmap),                        # packed small params
            pl.BlockSpec((1, D), lambda l: (0, 0)),                  # wfc
            pl.BlockSpec((1, 1), lambda l: (0, 0)),                  # bfc
        ],
        out_specs=pl.BlockSpec((B, 1), lambda l: (0, 0)),
        scratch_shapes=[pltpu.VMEM((B, S, D), jnp.float32)],
    )

    return pl.pallas_call(
        transformer_kernel,
        out_shape=jax.ShapeDtypeStruct((B, 1), jnp.float32),
        grid_spec=grid_spec,
        # Layer axis carries state in the VMEM scratch -> must stay "arbitrary".
        compiler_params=pltpu.CompilerParams(dimension_semantics=("arbitrary",)),
    )(x, p['mask'],
      p['wqkv'], p['bqkv'], p['wo'],
      p['w1q'], p['s1'], p['b1'], p['w2q'],
      p['smalls'], p['wfc'], p['bfc'])


if __name__ == "__main__":
    key = jax.random.PRNGKey(0)
    kx, kp = jax.random.split(key)
    B, S = 2, 8
    x = jax.random.normal(kx, (B, S, D), dtype=jnp.float32)
    kernel_params, ref_params = make_params(kp)

    try:
        out = jax.block_until_ready(transformer_forward(x, kernel_params, ffn_buffers=3))
    except Exception:
        # pl.Buffered / pipeline_mode not supported on this jax build -> default 2-deep pipeline.
        out = jax.block_until_ready(transformer_forward(x, kernel_params, ffn_buffers=None))

    ref = ref_forward(x, ref_params)
    assert out.shape == (B, 1)
    assert bool(jnp.all(jnp.isfinite(out)))
    max_err = float(jnp.max(jnp.abs(out - jnp.asarray(ref, jnp.float32))))
    assert max_err < 5e-2, f"kernel vs reference mismatch: {max_err}"
    # TODO(synk): nn.Dropout layers inside TransformerEncoderLayer are identity here (eval-mode semantics).
    print("KERNEL_OK")
</pallas_src>

<mosaic_0001>
module attributes {stable_mosaic.version = 11 : i64} {
  func.func @transformer_kernel(%arg0: i32, %arg1: memref<2x8x75xf32, #tpu.memory_space<vmem>>, %arg2: memref<75x25xbf16, #tpu.memory_space<vmem>>, %arg3: memref<1x75x384xbf16, #tpu.memory_space<vmem>>, %arg4: memref<1x1x384xf32, #tpu.memory_space<vmem>>, %arg5: memref<1x75x75xbf16, #tpu.memory_space<vmem>>, %arg6: memref<1x75x2048xi8, #tpu.memory_space<vmem>>, %arg7: memref<1x1x2048xf32, #tpu.memory_space<vmem>>, %arg8: memref<1x1x2048xf32, #tpu.memory_space<vmem>>, %arg9: memref<1x75x2048xi8, #tpu.memory_space<vmem>>, %arg10: memref<1x7x75xf32, #tpu.memory_space<vmem>>, %arg11: memref<1x75xf32, #tpu.memory_space<vmem>>, %arg12: memref<1x1xf32, #tpu.memory_space<vmem>>, %arg13: memref<2x1xf32, #tpu.memory_space<vmem>>, %arg14: memref<2x8x75xf32, #tpu.memory_space<vmem>>) attributes {dimension_semantics = [#tpu.dimension_semantics<arbitrary>], iteration_bounds = array<i64: 8>, scalar_prefetch = 0 : i64, scratch_operands = 1 : i64, tpu.core_type = #tpu.core_type<tc>, window_params = [{pipeline_mode = #tpu.pipeline_mode<synchronous>, transform_indices = @transform_0, window_bounds = array<i64: 2, 8, 75>}, {pipeline_mode = #tpu.pipeline_mode<synchronous>, transform_indices = @transform_1, window_bounds = array<i64: 75, 25>}, {transform_indices = @transform_2, window_bounds = array<i64: 1, 75, 384>}, {transform_indices = @transform_3, window_bounds = array<i64: 1, 1, 384>}, {transform_indices = @transform_4, window_bounds = array<i64: 1, 75, 75>}, {transform_indices = @transform_5, window_bounds = array<i64: 1, 75, 2048>}, {transform_indices = @transform_6, window_bounds = array<i64: 1, 1, 2048>}, {transform_indices = @transform_7, window_bounds = array<i64: 1, 1, 2048>}, {transform_indices = @transform_8, window_bounds = array<i64: 1, 75, 2048>}, {transform_indices = @transform_9, window_bounds = array<i64: 1, 7, 75>}, {pipeline_mode = #tpu.pipeline_mode<synchronous>, transform_indices = @transform_10, window_bounds = array<i64: 1, 75>}, {pipeline_mode = #tpu.pipeline_mode<synchronous>, transform_indices = @transform_11, window_bounds = array<i64: 1, 1>}, {pipeline_mode = #tpu.pipeline_mode<synchronous>, transform_indices = @transform_12, window_bounds = array<i64: 2, 1>}]} {
    %c0_i32 = arith.constant 0 : i32
    %0 = arith.cmpi eq, %arg0, %c0_i32 : i32
    %1 = arith.extui %0 : i1 to i32
    %c0_i32_0 = arith.constant 0 : i32
    %2 = arith.cmpi ne, %1, %c0_i32_0 : i32
    scf.if %2 {
      %c0_64 = arith.constant 0 : index
      %c0_65 = arith.constant 0 : index
      %c0_66 = arith.constant 0 : index
      %142 = vector.load %arg1[%c0_64, %c0_65, %c0_66] : memref<2x8x75xf32, #tpu.memory_space<vmem>>, vector<2x8x75xf32>
      %c0_67 = arith.constant 0 : index
      %c0_68 = arith.constant 0 : index
      %c0_69 = arith.constant 0 : index
      %143 = vector.load %arg14[%c0_67, %c0_68, %c0_69] : memref<2x8x75xf32, #tpu.memory_space<vmem>>, vector<2x8x75xf32>
      tpu.vector_store %arg14[%c0_67, %c0_68, %c0_69], %142 {strides = array<i32>} : memref<2x8x75xf32, #tpu.memory_space<vmem>>, vector<2x8x75xf32>,
    } else {
    }
    %c0 = arith.constant 0 : index
    %c0_1 = arith.constant 0 : index
    %c0_2 = arith.constant 0 : index
    %3 = vector.load %arg14[%c0, %c0_1, %c0_2] : memref<2x8x75xf32, #tpu.memory_space<vmem>>, vector<2x8x75xf32>
    %c0_3 = arith.constant 0 : index
    %c0_4 = arith.constant 0 : index
    %4 = vector.load %arg2[%c0_3, %c0_4] : memref<75x25xbf16, #tpu.memory_space<vmem>>, vector<75x25xbf16>
    %c0_5 = arith.constant 0 : index
    %c0_6 = arith.constant 0 : index
    %c0_7 = arith.constant 0 : index
    %5 = vector.load %arg10[%c0_5, %c0_6, %c0_7] : memref<1x7x75xf32, #tpu.memory_space<vmem>>, vector<1x1x75xf32>
    %6 = vector.shape_cast %5 : vector<1x1x75xf32> to vector<1x75xf32>
    %c0_8 = arith.constant 0 : index
    %c1 = arith.constant 1 : index
    %c0_9 = arith.constant 0 : index
    %7 = vector.load %arg10[%c0_8, %c1, %c0_9] : memref<1x7x75xf32, #tpu.memory_space<vmem>>, vector<1x1x75xf32>
    %8 = vector.shape_cast %7 : vector<1x1x75xf32> to vector<1x75xf32>
    %c0_10 = arith.constant 0 : index
    %c2 = arith.constant 2 : index
    %c0_11 = arith.constant 0 : index
    %9 = vector.load %arg10[%c0_10, %c2, %c0_11] : memref<1x7x75xf32, #tpu.memory_space<vmem>>, vector<1x1x75xf32>
    %10 = vector.shape_cast %9 : vector<1x1x75xf32> to vector<1x75xf32>
    %c0_12 = arith.constant 0 : index
    %c3 = arith.constant 3 : index
    %c0_13 = arith.constant 0 : index
    %11 = vector.load %arg10[%c0_12, %c3, %c0_13] : memref<1x7x75xf32, #tpu.memory_space<vmem>>, vector<1x1x75xf32>
    %12 = vector.shape_cast %11 : vector<1x1x75xf32> to vector<1x75xf32>
    %c0_14 = arith.constant 0 : index
    %c4 = arith.constant 4 : index
    %c0_15 = arith.constant 0 : index
    %13 = vector.load %arg10[%c0_14, %c4, %c0_15] : memref<1x7x75xf32, #tpu.memory_space<vmem>>, vector<1x1x75xf32>
    %14 = vector.shape_cast %13 : vector<1x1x75xf32> to vector<1x75xf32>
    %c0_16 = arith.constant 0 : index
    %c5 = arith.constant 5 : index
    %c0_17 = arith.constant 0 : index
    %15 = vector.load %arg10[%c0_16, %c5, %c0_17] : memref<1x7x75xf32, #tpu.memory_space<vmem>>, vector<1x1x75xf32>
    %16 = vector.shape_cast %15 : vector<1x1x75xf32> to vector<1x75xf32>
    %c0_18 = arith.constant 0 : index
    %c6 = arith.constant 6 : index
    %c0_19 = arith.constant 0 : index
    %17 = vector.load %arg10[%c0_18, %c6, %c0_19] : memref<1x7x75xf32, #tpu.memory_space<vmem>>, vector<1x1x75xf32>
    %18 = vector.shape_cast %17 : vector<1x1x75xf32> to vector<1x75xf32>
    %cst = arith.constant dense<0.000000e+00> : vector<2x8xf32>
    %19 = vector.multi_reduction <add>, %3, %cst [2] : vector<2x8x75xf32> to vector<2x8xf32>
    %20 = vector.shape_cast %19 : vector<2x8xf32> to vector<2x8x1xf32>
    %cst_20 = arith.constant 7.500000e+01 : f32
    %21 = vector.broadcast %cst_20 : f32 to vector<2x8x1xf32>
    %22 = arith.divf %20, %21 : vector<2x8x1xf32>
    %23 = vector.broadcast %22 : vector<2x8x1xf32> to vector<2x8x75xf32>
    %24 = arith.subf %3, %23 : vector<2x8x75xf32>
    %25 = arith.mulf %24, %24 : vector<2x8x75xf32>
    %cst_21 = arith.constant dense<0.000000e+00> : vector<2x8xf32>
    %26 = vector.multi_reduction <add>, %25, %cst_21 [2] : vector<2x8x75xf32> to vector<2x8xf32>
    %27 = vector.shape_cast %26 : vector<2x8xf32> to vector<2x8x1xf32>
    %cst_22 = arith.constant 7.500000e+01 : f32
    %28 = vector.broadcast %cst_22 : f32 to vector<2x8x1xf32>
    %29 = arith.divf %27, %28 : vector<2x8x1xf32>
    %cst_23 = arith.constant 9.99999974E-6 : f32
    %30 = vector.broadcast %cst_23 : f32 to vector<2x8x1xf32>
    %31 = arith.addf %29, %30 : vector<2x8x1xf32>
    %32 = math.rsqrt %31 : vector<2x8x1xf32>
    %33 = vector.broadcast %32 : vector<2x8x1xf32> to vector<2x8x75xf32>
    %34 = arith.mulf %24, %33 : vector<2x8x75xf32>
    %35 = vector.shape_cast %6 : vector<1x75xf32> to vector<1x1x75xf32>
    %36 = vector.broadcast %35 : vector<1x1x75xf32> to vector<2x8x75xf32>
    %37 = arith.mulf %34, %36 : vector<2x8x75xf32>
    %38 = vector.shape_cast %8 : vector<1x75xf32> to vector<1x1x75xf32>
    %39 = vector.broadcast %38 : vector<1x1x75xf32> to vector<2x8x75xf32>
    %40 = arith.addf %37, %39 : vector<2x8x75xf32>
    %41 = vector.shape_cast %40 : vector<2x8x75xf32> to vector<16x75xf32>
    %42 = arith.truncf %41 : vector<16x75xf32> to vector<16x75xbf16>
    %c0_24 = arith.constant 0 : index
    %c0_25 = arith.constant 0 : index
    %c0_26 = arith.constant 0 : index
    %43 = vector.load %arg3[%c0_24, %c0_25, %c0_26] : memref<1x75x384xbf16, #tpu.memory_space<vmem>>, vector<1x75x384xbf16>
    %44 = vector.shape_cast %43 : vector<1x75x384xbf16> to vector<75x384xbf16>
    %cst_27 = arith.constant dense<0.000000e+00> : vector<16x384xf32>
    %45 = tpu.matmul %42, %44, %cst_27 {dimension_numbers = #tpu.dot_dimension_numbers<[1], [0], [0], [1], [0, 0, 1, 1], [], []>} : vector<16x75xbf16>, vector<75x384xbf16>, vector<16x384xf32> -> vector<16x384xf32>
    %c0_28 = arith.constant 0 : index
    %c0_29 = arith.constant 0 : index
    %c0_30 = arith.constant 0 : index
    %46 = vector.load %arg4[%c0_28, %c0_29, %c0_30] : memref<1x1x384xf32, #tpu.memory_space<vmem>>, vector<1x1x384xf32>
    %47 = vector.shape_cast %46 : vector<1x1x384xf32> to vector<1x384xf32>
    %48 = vector.broadcast %47 : vector<1x384xf32> to vector<16x384xf32>
    %49 = arith.addf %45, %48 : vector<16x384xf32>
    %50 = vector.extract_strided_slice %49 {offsets = [0, 0], sizes = [16, 75], strides = [1, 1]} : vector<16x384xf32> to vector<16x75xf32>
    %51 = vector.extract_strided_slice %49 {offsets = [0, 128], sizes = [16, 75], strides = [1, 1]} : vector<16x384xf32> to vector<16x75xf32>
    %52 = vector.extract_strided_slice %49 {offsets = [0, 256], sizes = [16, 75], strides = [1, 1]} : vector<16x384xf32> to vector<16x75xf32>
    %53 = vector.shape_cast %50 : vector<16x75xf32> to vector<2x8x1x75xf32>
    %54 = vector.shape_cast %51 : vector<16x75xf32> to vector<2x1x8x75xf32>
    %55 = vector.broadcast %53 : vector<2x8x1x75xf32> to vector<2x8x8x75xf32>
    %56 = vector.broadcast %54 : vector<2x1x8x75xf32> to vector<2x8x8x75xf32>
    %57 = arith.mulf %55, %56 : vector<2x8x8x75xf32>
    %58 = vector.shape_cast %57 : vector<2x8x8x75xf32> to vector<128x75xf32>
    %59 = arith.truncf %58 : vector<128x75xf32> to vector<128x75xbf16>
    %cst_31 = arith.constant dense<0.000000e+00> : vector<128x25xf32>
    %60 = tpu.matmul %59, %4, %cst_31 {dimension_numbers = #tpu.dot_dimension_numbers<[1], [0], [0], [1], [0, 0, 1, 1], [], []>} : vector<128x75xbf16>, vector<75x25xbf16>, vector<128x25xf32> -> vector<128x25xf32>
    %61 = vector.shape_cast %60 : vector<128x25xf32> to vector<2x8x8x25xf32>
    %cst_32 = arith.constant dense<0xFF800000> : vector<2x8x25xf32>
    %62 = vector.multi_reduction <maximumf>, %61, %cst_32 [2] : vector<2x8x8x25xf32> to vector<2x8x25xf32>
    %63 = vector.shape_cast %62 : vector<2x8x25xf32> to vector<2x8x1x25xf32>
    %64 = vector.broadcast %63 : vector<2x8x1x25xf32> to vector<2x8x8x25xf32>
    %65 = arith.subf %61, %64 : vector<2x8x8x25xf32>
    %66 = math.exp %65 : vector<2x8x8x25xf32>
    %cst_33 = arith.constant dense<0.000000e+00> : vector<2x8x25xf32>
    %67 = vector.multi_reduction <add>, %66, %cst_33 [2] : vector<2x8x8x25xf32> to vector<2x8x25xf32>
    %68 = vector.shape_cast %67 : vector<2x8x25xf32> to vector<2x8x1x25xf32>
    %69 = tpu.reciprocal %68 {approx = true} : vector<2x8x1x25xf32> -> vector<2x8x1x25xf32>
    %70 = vector.broadcast %69 : vector<2x8x1x25xf32> to vector<2x8x8x25xf32>
    %71 = arith.mulf %66, %70 : vector<2x8x8x25xf32>
    %72 = vector.shape_cast %71 : vector<2x8x8x25xf32> to vector<128x25xf32>
    %73 = arith.truncf %72 : vector<128x25xf32> to vector<128x25xbf16>
    %cst_34 = arith.constant dense<0.000000e+00> : vector<128x75xf32>
    %74 = tpu.matmul %73, %4, %cst_34 {dimension_numbers = #tpu.dot_dimension_numbers<[1], [1], [0], [0], [0, 0, 1, 0], [], []>} : vector<128x25xbf16>, vector<75x25xbf16>, vector<128x75xf32> -> vector<128x75xf32>
    %75 = vector.shape_cast %74 : vector<128x75xf32> to vector<2x8x8x75xf32>
    %76 = vector.shape_cast %52 : vector<16x75xf32> to vector<2x1x8x75xf32>
    %77 = vector.broadcast %76 : vector<2x1x8x75xf32> to vector<2x8x8x75xf32>
    %78 = arith.mulf %75, %77 : vector<2x8x8x75xf32>
    %cst_35 = arith.constant dense<0.000000e+00> : vector<2x8x75xf32>
    %79 = vector.multi_reduction <add>, %78, %cst_35 [2] : vector<2x8x8x75xf32> to vector<2x8x75xf32>
    %80 = vector.shape_cast %79 : vector<2x8x75xf32> to vector<16x75xf32>
    %81 = arith.truncf %80 : vector<16x75xf32> to vector<16x75xbf16>
    %c0_36 = arith.constant 0 : index
    %c0_37 = arith.constant 0 : index
    %c0_38 = arith.constant 0 : index
    %82 = vector.load %arg5[%c0_36, %c0_37, %c0_38] : memref<1x75x75xbf16, #tpu.memory_space<vmem>>, vector<1x75x75xbf16>
    %83 = vector.shape_cast %82 : vector<1x75x75xbf16> to vector<75x75xbf16>
    %cst_39 = arith.constant dense<0.000000e+00> : vector<16x75xf32>
    %84 = tpu.matmul %81, %83, %cst_39 {dimension_numbers = #tpu.dot_dimension_numbers<[1], [0], [0], [1], [0, 0, 1, 1], [], []>} : vector<16x75xbf16>, vector<75x75xbf16>, vector<16x75xf32> -> vector<16x75xf32>
    %85 = vector.broadcast %14 : vector<1x75xf32> to vector<16x75xf32>
    %86 = arith.addf %84, %85 : vector<16x75xf32>
    %87 = vector.shape_cast %86 : vector<16x75xf32> to vector<2x8x75xf32>
    %88 = arith.addf %3, %87 : vector<2x8x75xf32>
    %cst_40 = arith.constant dense<0.000000e+00> : vector<2x8xf32>
    %89 = vector.multi_reduction <add>, %88, %cst_40 [2] : vector<2x8x75xf32> to vector<2x8xf32>
    %90 = vector.shape_cast %89 : vector<2x8xf32> to vector<2x8x1xf32>
    %cst_41 = arith.constant 7.500000e+01 : f32
    %91 = vector.broadcast %cst_41 : f32 to vector<2x8x1xf32>
    %92 = arith.divf %90, %91 : vector<2x8x1xf32>
    %93 = vector.broadcast %92 : vector<2x8x1xf32> to vector<2x8x75xf32>
    %94 = arith.subf %88, %93 : vector<2x8x75xf32>
    %95 = arith.mulf %94, %94 : vector<2x8x75xf32>
    %cst_42 = arith.constant dense<0.000000e+00> : vector<2x8xf32>
    %96 = vector.multi_reduction <add>, %95, %cst_42 [2] : vector<2x8x75xf32> to vector<2x8xf32>
    %97 = vector.shape_cast %96 : vector<2x8xf32> to vector<2x8x1xf32>
    %cst_43 = arith.constant 7.500000e+01 : f32
    %98 = vector.broadcast %cst_43 : f32 to vector<2x8x1xf32>
    %99 = arith.divf %97, %98 : vector<2x8x1xf32>
    %cst_44 = arith.constant 9.99999974E-6 : f32
    %100 = vector.broadcast %cst_44 : f32 to vector<2x8x1xf32>
    %101 = arith.addf %99, %100 : vector<2x8x1xf32>
    %102 = math.rsqrt %101 : vector<2x8x1xf32>
    %103 = vector.broadcast %102 : vector<2x8x1xf32> to vector<2x8x75xf32>
    %104 = arith.mulf %94, %103 : vector<2x8x75xf32>
    %105 = vector.shape_cast %10 : vector<1x75xf32> to vector<1x1x75xf32>
    %106 = vector.broadcast %105 : vector<1x1x75xf32> to vector<2x8x75xf32>
    %107 = arith.mulf %104, %106 : vector<2x8x75xf32>
    %108 = vector.shape_cast %12 : vector<1x75xf32> to vector<1x1x75xf32>
    %109 = vector.broadcast %108 : vector<1x1x75xf32> to vector<2x8x75xf32>
    %110 = arith.addf %107, %109 : vector<2x8x75xf32>
    %111 = vector.shape_cast %110 : vector<2x8x75xf32> to vector<16x75xf32>
    %c0_45 = arith.constant 0 : index
    %c0_46 = arith.constant 0 : index
    %c0_47 = arith.constant 0 : index
    %112 = vector.load %arg6[%c0_45, %c0_46, %c0_47] : memref<1x75x2048xi8, #tpu.memory_space<vmem>>, vector<1x75x2048xi8>
    %113 = vector.shape_cast %112 : vector<1x75x2048xi8> to vector<75x2048xi8>
    %114 = arith.sitofp %113 : vector<75x2048xi8> to vector<75x2048xbf16>
    %115 = arith.truncf %111 : vector<16x75xf32> to vector<16x75xbf16>
    %cst_48 = arith.constant dense<0.000000e+00> : vector<16x2048xf32>
    %116 = tpu.matmul %115, %114, %cst_48 {dimension_numbers = #tpu.dot_dimension_numbers<[1], [0], [0], [1], [0, 0, 1, 1], [], []>} : vector<16x75xbf16>, vector<75x2048xbf16>, vector<16x2048xf32> -> vector<16x2048xf32>
    %c0_49 = arith.constant 0 : index
    %c0_50 = arith.constant 0 : index
    %c0_51 = arith.constant 0 : index
    %117 = vector.load %arg7[%c0_49, %c0_50, %c0_51] : memref<1x1x2048xf32, #tpu.memory_space<vmem>>, vector<1x1x2048xf32>
    %118 = vector.shape_cast %117 : vector<1x1x2048xf32> to vector<1x2048xf32>
    %119 = vector.broadcast %118 : vector<1x2048xf32> to vector<16x2048xf32>
    %120 = arith.mulf %116, %119 : vector<16x2048xf32>
    %c0_52 = arith.constant 0 : index
    %c0_53 = arith.constant 0 : index
    %c0_54 = arith.constant 0 : index
    %121 = vector.load %arg8[%c0_52, %c0_53, %c0_54] : memref<1x1x2048xf32, #tpu.memory_space<vmem>>, vector<1x1x2048xf32>
    %122 = vector.shape_cast %121 : vector<1x1x2048xf32> to vector<1x2048xf32>
    %123 = vector.broadcast %122 : vector<1x2048xf32> to vector<16x2048xf32>
    %124 = arith.addf %120, %123 : vector<16x2048xf32>
    %cst_55 = arith.constant 0.000000e+00 : f32
    %125 = vector.broadcast %cst_55 : f32 to vector<16x2048xf32>
    %126 = arith.maximumf %124, %125 : vector<16x2048xf32>
    %127 = arith.truncf %126 : vector<16x2048xf32> to vector<16x2048xbf16>
    %c0_56 = arith.constant 0 : index
    %c0_57 = arith.constant 0 : index
    %c0_58 = arith.constant 0 : index
    %128 = vector.load %arg9[%c0_56, %c0_57, %c0_58] : memref<1x75x2048xi8, #tpu.memory_space<vmem>>, vector<1x75x2048xi8>
    %129 = vector.shape_cast %128 : vector<1x75x2048xi8> to vector<75x2048xi8>
    %130 = arith.sitofp %129 : vector<75x2048xi8> to vector<75x2048xbf16>
    %cst_59 = arith.constant dense<0.000000e+00> : vector<16x75xf32>
    %131 = tpu.matmul %127, %130, %cst_59 {dimension_numbers = #tpu.dot_dimension_numbers<[1], [1], [0], [0], [0, 0, 1, 0], [], []>} : vector<16x2048xbf16>, vector<75x2048xbf16>, vector<16x75xf32> -> vector<16x75xf32>
    %132 = vector.broadcast %18 : vector<1x75xf32> to vector<16x75xf32>
    %133 = arith.mulf %131, %132 : vector<16x75xf32>
    %134 = vector.broadcast %16 : vector<1x75xf32> to vector<16x75xf32>
    %135 = arith.addf %133, %134 : vector<16x75xf32>
    %136 = vector.shape_cast %135 : vector<16x75xf32> to vector<2x8x75xf32>
    %137 = arith.addf %88, %136 : vector<2x8x75xf32>
    %c0_60 = arith.constant 0 : index
    %c0_61 = arith.constant 0 : index
    %c0_62 = arith.constant 0 : index
    %138 = vector.load %arg14[%c0_60, %c0_61, %c0_62] : memref<2x8x75xf32, #tpu.memory_space<vmem>>, vector<2x8x75xf32>
    tpu.vector_store %arg14[%c0_60, %c0_61, %c0_62], %137 {strides = array<i32>} : memref<2x8x75xf32, #tpu.memory_space<vmem>>, vector<2x8x75xf32>,
    %c7_i32 = arith.constant 7 : i32
    %139 = arith.cmpi eq, %arg0, %c7_i32 : i32
    %140 = arith.extui %139 : i1 to i32
    %c0_i32_63 = arith.constant 0 : i32
    %141 = arith.cmpi ne, %140, %c0_i32_63 : i32
    scf.if %141 {
      %cst_64 = arith.constant dense<0.000000e+00> : vector<2x75xf32>
      %142 = vector.multi_reduction <add>, %137, %cst_64 [1] : vector<2x8x75xf32> to vector<2x75xf32>
      %cst_65 = arith.constant 8.000000e+00 : f32
      %143 = vector.broadcast %cst_65 : f32 to vector<2x75xf32>
      %144 = arith.divf %142, %143 : vector<2x75xf32>
      %c0_66 = arith.constant 0 : index
      %c0_67 = arith.constant 0 : index
      %145 = vector.load %arg11[%c0_66, %c0_67] : memref<1x75xf32, #tpu.memory_space<vmem>>, vector<1x75xf32>
      %146 = vector.broadcast %145 : vector<1x75xf32> to vector<2x75xf32>
      %147 = arith.mulf %144, %146 : vector<2x75xf32>
      %cst_68 = arith.constant dense<0.000000e+00> : vector<2xf32>
      %148 = vector.multi_reduction <add>, %147, %cst_68 [1] : vector<2x75xf32> to vector<2xf32>
      %149 = vector.shape_cast %148 : vector<2xf32> to vector<2x1xf32>
      %c0_69 = arith.constant 0 : index
      %c0_70 = arith.constant 0 : index
      %150 = vector.load %arg12[%c0_69, %c0_70] : memref<1x1xf32, #tpu.memory_space<vmem>>, vector<1x1xf32>
      %151 = vector.broadcast %150 : vector<1x1xf32> to vector<2x1xf32>
      %152 = arith.addf %149, %151 : vector<2x1xf32>
      %153 = arith.negf %152 : vector<2x1xf32>
      %154 = math.exp %153 : vector<2x1xf32>
      %cst_71 = arith.constant 1.000000e+00 : f32
      %155 = vector.broadcast %cst_71 : f32 to vector<2x1xf32>
      %156 = arith.addf %155, %154 : vector<2x1xf32>
      %157 = arith.divf %155, %156 : vector<2x1xf32>
      %c0_72 = arith.constant 0 : index
      %c0_73 = arith.constant 0 : index
      %158 = vector.load %arg13[%c0_72, %c0_73] : memref<2x1xf32, #tpu.memory_space<vmem>>, vector<2x1xf32>
      tpu.vector_store %arg13[%c0_72, %c0_73], %157 {strides = array<i32>} : memref<2x1xf32, #tpu.memory_space<vmem>>, vector<2x1xf32>,
    } else {
    }
    return
  }
  func.func @transform_0(%arg0: i32) -> (i32, i32, i32) {
    %c0_i32 = arith.constant 0 : i32
    %c0_i32_0 = arith.constant 0 : i32
    %c0_i32_1 = arith.constant 0 : i32
    %c0_i32_2 = arith.constant 0 : i32
    return %c0_i32, %c0_i32_0, %c0_i32_1 : i32, i32, i32
  }
  func.func @transform_1(%arg0: i32) -> (i32, i32) {
    %c0_i32 = arith.constant 0 : i32
    %c0_i32_0 = arith.constant 0 : i32
    %c0_i32_1 = arith.constant 0 : i32
    return %c0_i32, %c0_i32_0 : i32, i32
  }
  func.func @transform_2(%arg0: i32) -> (i32, i32, i32) {
    %c0_i32 = arith.constant 0 : i32
    %c0_i32_0 = arith.constant 0 : i32
    %c0_i32_1 = arith.constant 0 : i32
    return %arg0, %c0_i32, %c0_i32_0 : i32, i32, i32
  }
  func.func @transform_3(%arg0: i32) -> (i32, i32, i32) {
    %c0_i32 = arith.constant 0 : i32
    %c0_i32_0 = arith.constant 0 : i32
    %c0_i32_1 = arith.constant 0 : i32
    return %arg0, %c0_i32, %c0_i32_0 : i32, i32, i32
  }
  func.func @transform_4(%arg0: i32) -> (i32, i32, i32) {
    %c0_i32 = arith.constant 0 : i32
    %c0_i32_0 = arith.constant 0 : i32
    %c0_i32_1 = arith.constant 0 : i32
    return %arg0, %c0_i32, %c0_i32_0 : i32, i32, i32
  }
  func.func @transform_5(%arg0: i32) -> (i32, i32, i32) {
    %c0_i32 = arith.constant 0 : i32
    %c0_i32_0 = arith.constant 0 : i32
    %c0_i32_1 = arith.constant 0 : i32
    return %arg0, %c0_i32, %c0_i32_0 : i32, i32, i32
  }
  func.func @transform_6(%arg0: i32) -> (i32, i32, i32) {
    %c0_i32 = arith.constant 0 : i32
    %c0_i32_0 = arith.constant 0 : i32
    %c0_i32_1 = arith.constant 0 : i32
    return %arg0, %c0_i32, %c0_i32_0 : i32, i32, i32
  }
  func.func @transform_7(%arg0: i32) -> (i32, i32, i32) {
    %c0_i32 = arith.constant 0 : i32
    %c0_i32_0 = arith.constant 0 : i32
    %c0_i32_1 = arith.constant 0 : i32
    return %arg0, %c0_i32, %c0_i32_0 : i32, i32, i32
  }
  func.func @transform_8(%arg0: i32) -> (i32, i32, i32) {
    %c0_i32 = arith.constant 0 : i32
    %c0_i32_0 = arith.constant 0 : i32
    %c0_i32_1 = arith.constant 0 : i32
    return %arg0, %c0_i32, %c0_i32_0 : i32, i32, i32
  }
  func.func @transform_9(%arg0: i32) -> (i32, i32, i32) {
    %c0_i32 = arith.constant 0 : i32
    %c0_i32_0 = arith.constant 0 : i32
    %c0_i32_1 = arith.constant 0 : i32
    return %arg0, %c0_i32, %c0_i32_0 : i32, i32, i32
  }
  func.func @transform_10(%arg0: i32) -> (i32, i32) {
    %c0_i32 = arith.constant 0 : i32
    %c0_i32_0 = arith.constant 0 : i32
    %c0_i32_1 = arith.constant 0 : i32
    return %c0_i32, %c0_i32_0 : i32, i32
  }
  func.func @transform_11(%arg0: i32) -> (i32, i32) {
    %c0_i32 = arith.constant 0 : i32
    %c0_i32_0 = arith.constant 0 : i32
    %c0_i32_1 = arith.constant 0 : i32
    return %c0_i32, %c0_i32_0 : i32, i32
  }
  func.func @transform_12(%arg0: i32) -> (i32, i32) {
    %c0_i32 = arith.constant 0 : i32
    %c0_i32_0 = arith.constant 0 : i32
    %c0_i32_1 = arith.constant 0 : i32
    return %c0_i32, %c0_i32_0 : i32, i32
  }
}

</mosaic_0001>

<bundles_post_ra>
// kernel: tpu_custom_call.1
= control target key start
LH: loop header
LB: loop body
LE: loop exit
PB: predicated region body
PF: predicated region fallthrough
CT: control target
= control target key end

     0   :  { %s4749_s23 = smov 0   ;;  %s5585_s0 = inlined_call_operand.vmem [shape: f32[2,8,75], index: 0, kind: input, shape index: {}]   ;;  %s5586_s1 = inlined_call_operand.vmem [shape: bf16[75,25], index: 1, kind: input, shape index: {}]   ;;  %s5587_s2 = inlined_call_operand.vmem [shape: bf16[8,75,384], index: 2, kind: input, shape index: {}]   ;;  %s5588_s3 = inlined_call_operand.vmem [shape: f32[8,1,384], index: 3, kind: input, shape index: {}]   ;;  %s5589_s4 = inlined_call_operand.vmem [shape: bf16[8,75,75], index: 4, kind: input, shape index: {}]   ;;  %s5590_s5 = inlined_call_operand.vmem [shape: s8[8,75,2048], index: 5, kind: input, shape index: {}]   ;;  %s5591_s6 = inlined_call_operand.vmem [shape: f32[8,1,2048], index: 6, kind: input, shape index: {}]   ;;  %s5592_s7 = inlined_call_operand.vmem [shape: f32[8,1,2048], index: 7, kind: input, shape index: {}]   ;;  %s5593_s8 = inlined_call_operand.vmem [shape: s8[8,75,2048], index: 8, kind: input, shape index: {}]   ;;  %s5594_s9 = inlined_call_operand.vmem [shape: f32[8,7,75], index: 9, kind: input, shape index: {}]   ;;  %s5595_s10 = inlined_call_operand.vmem [shape: f32[1,75], index: 10, kind: input, shape index: {}]   ;;  %s5596_s11 = inlined_call_operand.<no memory space> [shape: f32[1,1], index: 11, kind: input, shape index: {}]   ;;  %s5597_s12 = inlined_call_operand.vmem [shape: f32[2,1], index: 12, kind: output, shape index: {}]  }
   0x1   :  { %5599 = sst [smem:[#allocation5_spill]] %s5587_s2  ;;  %v17_v0 = vstv %s5596_s11 }
   0x2   :  { %5600 = sst [smem:[#allocation6_spill]] %s5588_s3  ;;  %18 = vst [vmem:[#allocation3] sm:$0x1] %v17_v0 }
   0x3   :  { %5601 = sst [smem:[#allocation7_spill]] %s5591_s6 }
   0x4 LB: > { %5602 = sst [smem:[#allocation4_spill]] %s4674_s23  ;;  %s4755_s24 = sadd.s32 4294967295, %s4674_s23   ;;  %s4674_s23 = sphi %s4749_s23, %s24_s23  }
   0x5   : > { %p4160_p0 = scmp.ge.s32.totalorder %s4674_s23, 1  ;;  %p425_p1 = scmp.lt.s32.totalorder %s4674_s23, 9 }
   0x7   : > { %p426_p2 = pnand %p4160_p0, %p425_p1 }
   0x8   : > { %p493_p3 = scmp.lt.s32.totalorder (!%p426_p2), %s4755_s24, 7  ;;  %s5603_s6 = sld [smem:[#allocation7_spill]] (!%p426_p2) }
   0x9   : > { %429 = sbr.rel (%p426_p2) target bundleno = 2474 (0x9aa), region = 68  ;;  %s5604_s2 = sld [smem:[#allocation5_spill]] (!%p426_p2) }
   0xa   : > { %s5605_s3 = sld [smem:[#allocation6_spill]] (!%p426_p2)  ;;  %p4168_p4 = scmp.ne.s32.totalorder (!%p426_p2), %s4755_s24, 0 }
  0x10   : > { %s494_s11 = scalar_select %p493_p3, %s4755_s24, 7 }
  0x11   : > { %v534_v1 = vld [vmem:[%s5585_s0] sm:$0xff] (!%p4168_p4)  ;;  %vm536_vm0 = vcmask (!%p4168_p4), 613376   ;;  %v535_v2 = vld [vmem:[%s5585_s0 + $0x8] sm:$0xff] (!%p4168_p4) }
  0x12   : > { %s4543_s25 = smul.u32 120, %s494_s11  ;;  %s4164_s26 = sshll.u32 %s494_s11, 4  ;;  %537 = vst.msk [vmem:[#allocation2] sm:$0xff] (!%p4168_p4), %vm536_vm0, %v534_v1  ;;  %538 = vst.msk [vmem:[#allocation2 + $0x8] sm:$0xff] (!%p4168_p4), %vm536_vm0, %v535_v2 }
  0x13   : > { %s4544_s27 = smul.u32 3, %s494_s11  ;;  %s4764_s30 = scalar_lea.vmem %s5603_s6, %s4164_s26 }
  0x14   : > { %s4769_s15 = scalar_lea.vmem %s5604_s2, %s4543_s25  ;;  %s4545_s16 = smul.u32 40, %s494_s11 }
  0x15   : > { %s4774_s19 = scalar_lea.vmem %s5605_s3, %s4544_s27  ;;  %s4546_s20 = smul.u32 320, %s494_s11 }
  0x16   : > { %s4779_s23 = scalar_lea.vmem %s5589_s4, %s4545_s16  ;;  %s4784_s6 = scalar_lea.vmem %s5592_s7, %s4164_s26 }
  0x17   : > { %s4789_s14 = scalar_lea.vmem %s5590_s5, %s4546_s20  ;;  %s4794_s27 = scalar_lea.vmem %s5593_s8, %s4546_s20 }
  0x18   : > { %s4167_s18 = sshll.u32 %s494_s11, 3  ;;  %533 = sbr.rel (%p4168_p4) target bundleno = 31 (0x1f), region = 72 }
  0x19   : > { %s4799_s16 = scalar_lea.vmem %s5594_s9, %s4167_s18 }
  0x1f PF: > { %v539_v3 = vld [vmem:[#allocation2] sm:$0xff]  ;;  %vm558_vm1 = vcmask 613376   ;;  %v540_v4 = vld [vmem:[#allocation2 + $0x8] sm:$0xff]  ;;  %v4676_v20 = vmov 0.0   ;;  %v4570_v25 = vld [vmem:[%s4769_s15 + $0x30] ss:$12 sps:$4 sm:$0xff]   ;;  %v621_v63 = vlaneseq }
  0x20   : > { %v559_v5 = vsel %vm558_vm1, %v539_v3, 0.0  ;;  %v562_v6 = vsel %vm558_vm1, %v540_v4, 0.0  ;;  %v4560_v17 = vld [vmem:[%s4769_s15 + $0x4] ss:$12 sps:$4 sm:$0xff]   ;;  %v4562_v18 = vld [vmem:[%s4769_s15] ss:$12 sps:$4 sm:$0xff]   ;;  %4432 = vmatprep.subr.bf16.mxu1 %v4676_v20 }
  0x21   : > { %560 = vadd.xlane.f32.xlu0 %v559_v5  ;;  %v4563_v19 = vld [vmem:[%s4769_s15 + $0x8] ss:$12 sps:$4 sm:$0xff]   ;;  %729 = vmatprep.subr.bf16.mxu0 %v4560_v17  ;;  %v4566_v22 = vld [vmem:[%s4769_s15 + $0x18] ss:$12 sps:$4 sm:$0xff]   ;;  %v4567_v23 = vld [vmem:[%s4769_s15 + $0x20] ss:$12 sps:$4 sm:$0xff]  }
  0x22   : > { %730 = vmatpush1.bf16.msra.mxu0 %v4562_v18  ;;  %4433 = vmatpush3.bf16.msra.mxu1 %v4563_v19  ;;  %v4564_v21 = vld [vmem:[%s4769_s15 + $0x1c] ss:$12 sps:$4 sm:$0xff]   ;;  %v4568_v24 = vld [vmem:[%s4769_s15 + $0x34] ss:$12 sps:$4 sm:$0xff]   ;;  %v4571_v26 = vld [vmem:[%s4769_s15 + $0x38] ss:$12 sps:$4 sm:$0xff]  }
  0x23   : > { %4434 = vmatprep.subr.bf16.mxu1 %v4676_v20  ;;  %731 = vmatprep.subr.bf16.mxu0 %v4564_v21  ;;  %v4572_v27 = vld [vmem:[%s4769_s15 + $0x4c] ss:$12 sps:$4 sm:$0xff]   ;;  %v4574_v28 = vld [vmem:[%s4769_s15 + $0x48] ss:$12 sps:$4 sm:$0xff]   ;;  %v4575_v29 = vld [vmem:[%s4769_s15 + $0x50] ss:$12 sps:$4 sm:$0xff]  }
  0x24   : > { %vm716_vm2 = vcmask 1044480   ;;  %v4576_v30 = vld [vmem:[%s4769_s15 + $0x64] ss:$12 sps:$4 sm:$0x3f]   ;;  %vm717_vm3 = vcmask 1045504   ;;  %v4677_v31 = vmov 65535  }
  0x25   : > { %563 = vadd.xlane.f32.xlu0 %v562_v6  ;;  %v718_v32 = vsel %vm716_vm2, 4294967295, %v4677_v31  ;;  %v4578_v34 = vld [vmem:[%s4769_s15 + $0x60] ss:$12 sps:$4 sm:$0x3f]   ;;  %v4678_v37 = vmov 0   ;;  %vm4679_vm4 = vmmov 0  }
  0x26   : > { %732 = vmatpush1.bf16.msra.mxu0 %v4566_v22  ;;  %4435 = vmatpush3.bf16.msra.mxu1 %v4567_v23  ;;  %v4837_v33 = vsel %vm717_vm3, %v718_v32, 0  ;;  %v4579_v36 = vld [vmem:[%s4769_s15 + $0x68] ss:$12 sps:$4 sm:$0x3f]   ;;  %v4851_v40 = vld [vmem:[%s5586_s1] sm:$0xff]   ;;  %v4878_v60 = vld [vmem:[%s5586_s1 + $0x18] sm:$0xff]  }
  0x27   : > { %4436 = vmatprep.subr.bf16.mxu1 %v4676_v20  ;;  %733 = vmatprep.subr.bf16.mxu0 %v4568_v24  ;;  %v724_v35 = vand.u32 %v4576_v30, %v4837_v33  ;;  %v721_v38 = vand.u32 %v4578_v34, %v4837_v33  ;;  %v727_v39 = vand.u32 %v4579_v36, %v4837_v33  ;;  %v4169_v49 = vld [vmem:[%s4799_s16] ss:$0 sm:$0xff]  ;;  %v4170_v53 = vld [vmem:[%s4799_s16 + $0x1] ss:$0 sm:$0xff]  ;;  %v4864_v58 = vld [vmem:[%s5586_s1 + $0x8] sm:$0xff]   ;;  %v4890_v0 = vshrl.u32 %v621_v63, 7 }
  0x28   : > { %761 = vmatprep.mubr.bf16.mxu0 %v4678_v37  ;;  %4442 = vmatprep.mubr.msk.bf16.mxu1 %vm4679_vm4, %v4676_v20  ;;  %v4871_v59 = vld [vmem:[%s5586_s1 + $0x10] sm:$0xff]   ;;  %v4884_v61 = vld [vmem:[%s5586_s1 + $0x20] sm:$0x3f]   ;;  %v4680_v1 = vmov 1966171168   ;;  %vm1170_vm5 = vcmask 203776  }
  0x29   : > { %v1071_v62 = vand.u32 %v4884_v61, %v4837_v33  ;;  %v817_v2 = vunpack.c.l.s4 %v4680_v1  ;;  %vm1808_vm6 = vcmask 1041409   ;;  %vm1810_vm7 = vcmask 1042434   ;;  %p4388_p5 = scmp.ne.s32.totalorder %s4755_s24, 7 }
  0x2a   : > { %734 = vmatpush1.bf16.msra.mxu0 %v4570_v25  ;;  %4437 = vmatpush3.bf16.msra.mxu1 %v4571_v26  ;;  %vm1812_vm8 = vcmask 1043459   ;;  %vm1814_vm9 = vcmask 1044484   ;;  %vm1816_vm10 = vcmask 1045509   ;;  %vm1818_vm11 = vcmask 1046534  }
  0x2b   : > { %4438 = vmatprep.subr.bf16.mxu1 %v4676_v20  ;;  %735 = vmatprep.subr.bf16.mxu0 %v4572_v27  ;;  %v818_v5 = vunpack.c.0.s8 %v817_v2  ;;  %vm1820_vm12 = vcmask 1047559   ;;  %vm4025_vm13 = vcmask (!%p4388_p5), 607232   ;;  %vm4043_vm14 = vcmask (!%p4388_p5), 1024  }
  0x2e   : > { %736 = vmatpush1.bf16.msra.mxu0 %v4574_v28  ;;  %4439 = vmatpush3.bf16.msra.mxu1 %v4575_v29 }
  0x2f   : > { %4440 = vmatprep.subr.bf16.mxu1 %v4676_v20  ;;  %737 = vmatprep.subr.bf16.mxu0 %v724_v35 }
  0x32   : > { %738 = vmatpush1.bf16.msra.mxu0 %v721_v38  ;;  %4441 = vmatpush3.bf16.msra.mxu1 %v727_v39 }
  0x33   : > { %4446 = vmatprep.subr.bf16.mxu0 %v4851_v40  ;;  %4538 = vmatprep.subr.msk.bf16.mxu1 %vm1170_vm5, %v4851_v40 }
  0xae   : > { %v561_v7 = vpop.xlane.xlu0 %560 }
  0xaf   : > { %v566_v8 = vmul.f32 0.013333334, %v561_v7  ;;  %v4901_v7 = vsub.s32 1, %v4890_v0 }
  0xb1   : > { %v4810_v9 = vsub.f32 %v539_v3, %v566_v8  ;;  %v4893_v3 = vsub.s32 0, %v4890_v0  ;;  %v821_v8 = vsub.s32 %v818_v5, %v4890_v0 }
  0xb2   : > { %v564_v10 = vpop.xlane.xlu0 %563 }
  0xb3   : > { %v567_v11 = vmul.f32 0.013333334, %v564_v10  ;;  %v570_v12 = vmul.f32 %v4810_v9, %v4810_v9 }
  0xb5   : > { %v4814_v13 = vsub.f32 %v540_v4, %v567_v11  ;;  %v572_v14 = vsel %vm558_vm1, %v570_v12, 0.0  ;;  %v4896_v4 = vld [vmem:[%s4774_s19] sm:$0x7] }
  0xb6   : > { %573 = vadd.xlane.f32.xlu1 %v572_v14  ;;  %v624_v6 = vrot.slane %v4896_v4, %v4893_v3  ;;  %v628_v14 = vrot.slane %v4896_v4, %v4901_v7 }
  0xb7   : > { %v571_v15 = vmul.f32 %v4814_v13, %v4814_v13 }
  0xb9   : > { %v575_v16 = vsel %vm558_vm1, %v571_v15, 0.0 }
  0xba   : > { %576 = vadd.xlane.f32.xlu1 %v575_v16 }
 0x143   : > { %v574_v41 = vpop.xlane.xlu1 %573 }
 0x144   : > { %v578_v42 = vmul.f32 0.013333334, %v574_v41 }
 0x146   : > { %v580_v43 = vadd.f32 1e-05, %v578_v42 }
 0x147   : > { %v577_v44 = vpop.xlane.xlu1 %576 }
 0x148   : > { %4590 = vrsqrt.f32 %v580_v43  ;;  %v579_v45 = vmul.f32 0.013333334, %v577_v44 }
 0x14a   : > { %v581_v46 = vadd.f32 1e-05, %v579_v45 }
 0x14c   : > { %4592 = vrsqrt.f32 %v581_v46 }
 0x152   : > { %v4591_v47 = vpop.eup %4590 }
 0x153   : > { %v584_v48 = vmul.f32 %v4591_v47, %v4810_v9 }
 0x155   : > { %v590_v52 = vmul.f32 %v4169_v49, %v584_v48 }
 0x156   : > { %v4593_v50 = vpop.eup %4592 }
 0x157   : > { %v585_v51 = vmul.f32 %v4593_v50, %v4814_v13  ;;  %v596_v55 = vadd.f32 %v4170_v53, %v590_v52 }
 0x159   : > { %v591_v54 = vmul.f32 %v4169_v49, %v585_v51 }
 0x15b   : > { %v597_v56 = vadd.f32 %v4170_v53, %v591_v54 }
 0x15d   : > { %v598_v57 = vpack.c.bf16 %v597_v56, %v596_v55 }
 0x15f   : > { %4186 = vmatmul.mubr.msk.bf16.vlgmr.msra.gmra.mrb[0].mxu0 %vm558_vm1, %v598_v57  ;;  %4443 = vmatmul.mubr.msk.bf16.vlgmr.msra.gmra.mrb[0].mxu1 %vm558_vm1, %v598_v57 }
 0x160   : > { %4447 = vmatpush3.bf16.msra.mxu0 %v4851_v40 }
 0x161   : > { %4448 = vmatprep.subr.bf16.mxu0 %v4864_v58 }
 0x164   : > { %4449 = vmatpush3.bf16.msra.mxu0 %v4864_v58 }
 0x165   : > { %4450 = vmatprep.subr.bf16.mxu0 %v4871_v59 }
 0x168   : > { %4451 = vmatpush3.bf16.msra.mxu0 %v4871_v59 }
 0x169   : > { %4452 = vmatprep.subr.bf16.mxu0 %v4878_v60 }
 0x16c   : > { %4453 = vmatpush3.bf16.msra.mxu0 %v4878_v60 }
 0x16d   : > { %4454 = vmatprep.subr.bf16.mxu0 %v1071_v62 }
 0x170   : > { %4455 = vmatpush3.bf16.msra.mxu0 %v1071_v62 }
 0x171   : > { %4498 = vmatprep.subr.bf16.mxu0 %v4676_v20 }
 0x232   : > { %v763_v9 = vpop.f32.mrb[0].mxu0  ;;  %v4904_v10 = vpop.f32.mrb[0].mxu1 }
 0x233   : > { %v764_v11 = vadd.f32 %v763_v9, %v624_v6  ;;  %v765_v12 = vpop.f32.mrb[1].mxu0  ;;  %v4444_v13 = vpop.f32.mrb[1].mxu1 }
 0x234   : > { %v767_v15 = vpop.f32.mrb[2].mxu0  ;;  %v4908_v16 = vpop.f32.mrb[2].mxu1  ;;  %v766_v27 = vadd.f32 %v765_v12, %v628_v14 }
 0x235   : > { %v815_v17 = vcombine.high %v764_v11, %v764_v11  ;;  %v822_v18 = vrot.slane %v764_v11, %v821_v8  ;;  %v768_v19 = vadd.f32 %v767_v15, %v624_v6  ;;  %v769_v21 = vpop.f32.mrb[3].mxu0  ;;  %v4445_v22 = vpop.f32.mrb[3].mxu1 }
 0x236   : > { %v770_v29 = vadd.f32 %v769_v21, %v628_v14 }
 0x237   : > { %v829_v23 = vrot.slane %v815_v17, %v821_v8  ;;  %v830_v24 = vcombine.high %v822_v18, %v822_v18  ;;  %v838_v25 = vrot.slane %v822_v18, %v821_v8  ;;  %v864_v26 = vcombine.high %v768_v19, %v768_v19 }
 0x238   : > { %v871_v28 = vrot.slane %v768_v19, %v821_v8 }
 0x239   : > { %v831_v30 = vcombine.high %v829_v23, %v829_v23  ;;  %v845_v31 = vrot.slane %v829_v23, %v821_v8  ;;  %v852_v32 = vrot.slane %v830_v24, %v821_v8  ;;  %v860_v34 = vcombine.high %v838_v25, %v838_v25 }
 0x23a   : > { %v916_v35 = vrot.slane %v838_v25, %v4893_v3  ;;  %v878_v36 = vrot.slane %v864_v26, %v821_v8  ;;  %v879_v38 = vcombine.high %v871_v28, %v871_v28  ;;  %v887_v39 = vrot.slane %v871_v28, %v821_v8 }
 0x23b   : > { %v859_v41 = vrot.slane %v831_v30, %v821_v8  ;;  %v861_v42 = vcombine.high %v845_v31, %v845_v31  ;;  %v862_v43 = vcombine.high %v852_v32, %v852_v32  ;;  %v920_v44 = vrot.slane %v852_v32, %v4893_v3 }
 0x23c   : > { %v924_v45 = vrot.slane %v860_v34, %v4893_v3  ;;  %v932_v46 = vrot.slane %v845_v31, %v4893_v3  ;;  %v880_v47 = vcombine.high %v878_v36, %v878_v36  ;;  %v894_v48 = vrot.slane %v878_v36, %v821_v8 }
 0x23d   : > { %v863_v49 = vcombine.high %v859_v41, %v859_v41  ;;  %v928_v50 = vrot.slane %v862_v43, %v4893_v3  ;;  %v936_v51 = vrot.slane %v859_v41, %v4893_v3  ;;  %v940_v52 = vrot.slane %v861_v42, %v4893_v3 }
 0x23e   : > { %v901_v53 = vrot.slane %v879_v38, %v821_v8  ;;  %v908_v54 = vrot.slane %v880_v47, %v821_v8  ;;  %v909_v55 = vcombine.high %v887_v39, %v887_v39  ;;  %v910_v56 = vcombine.high %v894_v48, %v894_v48 }
 0x23f   : > { %v948_v57 = vrot.slane %v887_v39, %v4893_v3  ;;  %v964_v62 = vrot.slane %v894_v48, %v4893_v3  ;;  %v993_v63 = vmul.f32 %v916_v35, %v766_v27  ;;  %v994_v1 = vmul.f32 %v920_v44, %v766_v27 }
 0x240   : > { %v911_v2 = vcombine.high %v901_v53, %v901_v53  ;;  %v912_v5 = vcombine.high %v908_v54, %v908_v54  ;;  %v952_v6 = vrot.slane %v901_v53, %v4893_v3  ;;  %v956_v9 = vrot.slane %v909_v55, %v4893_v3 }
 0x241   : > { %v968_v11 = vrot.slane %v908_v54, %v4893_v3  ;;  %v972_v12 = vrot.slane %v910_v56, %v4893_v3  ;;  %v1009_v13 = vpack.c.bf16 %v994_v1, %v993_v63  ;;  %v995_v8 = vmul.f32 %v924_v45, %v766_v27 }
 0x242   : > { %v960_v14 = vrot.slane %v911_v2, %v4893_v3  ;;  %v996_v15 = vmul.f32 %v928_v50, %v766_v27  ;;  %v997_v17 = vmul.f32 %v932_v46, %v766_v27  ;;  %v998_v18 = vmul.f32 %v936_v51, %v766_v27 }
 0x243   : > { %4456 = vmatprep.mubr.msk.bf16.mxu0 %vm558_vm1, %v1009_v13  ;;  %v944_v19 = vrot.slane %v863_v49, %v4893_v3  ;;  %v999_v21 = vmul.f32 %v940_v52, %v766_v27  ;;  %v1001_v22 = vmul.f32 %v948_v57, %v770_v29  ;;  %v1002_v23 = vmul.f32 %v952_v6, %v770_v29 }
 0x244   : > { %v1010_v24 = vpack.c.bf16 %v996_v15, %v995_v8  ;;  %v1011_v25 = vpack.c.bf16 %v998_v18, %v997_v17  ;;  %v1003_v26 = vmul.f32 %v956_v9, %v770_v29  ;;  %v1004_v28 = vmul.f32 %v960_v14, %v770_v29 }
 0x245   : > { %v1000_v30 = vmul.f32 %v944_v19, %v766_v27  ;;  %v1013_v31 = vpack.c.bf16 %v1002_v23, %v1001_v22  ;;  %v1005_v32 = vmul.f32 %v964_v62, %v770_v29  ;;  %v1006_v34 = vmul.f32 %v968_v11, %v770_v29 }
 0x246   : > { %4457 = vmatmul.mubr.msk.bf16.vlgmr.msra.gmra.mrb[4].mxu0 %vm558_vm1, %v1010_v24  ;;  %v1014_v35 = vpack.c.bf16 %v1004_v28, %v1003_v26  ;;  %v976_v36 = vrot.slane %v912_v5, %v4893_v3  ;;  %v1007_v38 = vmul.f32 %v972_v12, %v770_v29  ;;  %v1508_v27 = vsel %vm1170_vm5, %v4851_v40, 0 }
 0x247   : > { %4460 = vmatprep.mubr.msk.bf16.mxu0 %vm558_vm1, %v1011_v25  ;;  %v1012_v39 = vpack.c.bf16 %v1000_v30, %v999_v21  ;;  %v1015_v41 = vpack.c.bf16 %v1006_v34, %v1005_v32  ;;  %4473 = vmatpush3.bf16.xpose.msra.mxu1 %v1508_v27  ;;  %v1514_v44 = vsel %vm1170_vm5, %v4871_v59, 0  ;;  %v1517_v40 = vsel %vm1170_vm5, %v4878_v60, 0 }
 0x248   : > { %v1008_v42 = vmul.f32 %v976_v36, %v770_v29  ;;  %4539 = vmatprep.subr.msk.bf16.mxu1 %vm1170_vm5, %v4864_v58  ;;  %v1511_v29 = vsel %vm1170_vm5, %v4864_v58, 0  ;;  %v1519_v58 = vsel %vm1170_vm5, %v4884_v61, 0 }
 0x24a   : > { %v1016_v43 = vpack.c.bf16 %v1008_v42, %v1007_v38 }
 0x24e   : > { %4461 = vmatmul.mubr.msk.bf16.gmra.mrb[8].mxu0 %vm558_vm1, %v1012_v39 }
 0x24f   : > { %4464 = vmatprep.mubr.msk.bf16.mxu0 %vm558_vm1, %v1013_v31  ;;  %4475 = vmatpush3.bf16.xpose.msra.mxu1 %v1511_v29 }
 0x250   : > { %4540 = vmatprep.subr.msk.bf16.mxu1 %vm1170_vm5, %v4871_v59 }
 0x256   : > { %4465 = vmatmul.mubr.msk.bf16.gmra.mrb[12].mxu0 %vm558_vm1, %v1014_v35 }
 0x257   : > { %4468 = vmatprep.mubr.msk.bf16.mxu0 %vm558_vm1, %v1015_v41  ;;  %4477 = vmatpush3.bf16.xpose.msra.mxu1 %v1514_v44 }
 0x258   : > { %4541 = vmatprep.subr.msk.bf16.mxu1 %vm1170_vm5, %v4878_v60 }
 0x25e   : > { %4469 = vmatmul.mubr.msk.bf16.gmra.mrb[16].mxu0 %vm558_vm1, %v1016_v43 }
 0x25f   : > { %4508 = vmatprep.mubr.msk.bf16.mxu0 %vm4679_vm4, %v4676_v20  ;;  %4479 = vmatpush3.bf16.xpose.msra.mxu1 %v1517_v40 }
 0x260   : > { %4542 = vmatprep.subr.msk.bf16.mxu1 %vm1170_vm5, %v4884_v61 }
 0x267   : > { %4481 = vmatpush3.bf16.xpose.msra.mxu1 %v1519_v58 }
 0x319   : > { %v4458_v45 = vpop.f32.mrb[4].mxu0 }
 0x31a   : > { %v1185_v46 = vsel %vm1170_vm5, %v4458_v45, -inf  ;;  %v1107_v47 = vpop.f32.mrb[5].mxu0 }
 0x31b   : > { %v1186_v59 = vrot.slane %v1185_v46, 4  ;;  %v1171_v48 = vsel %vm1170_vm5, %v1107_v47, -inf  ;;  %v4459_v49 = vpop.f32.mrb[6].mxu0 }
 0x31c   : > { %v1172_v50 = vrot.slane %v1171_v48, 4  ;;  %v1192_v51 = vsel %vm1170_vm5, %v4459_v49, -inf  ;;  %v1110_v60 = vpop.f32.mrb[7].mxu0 }
 0x31d   : > { %v1187_v52 = vmax.f32 %v1185_v46, %v1186_v59  ;;  %v1193_v53 = vrot.slane %v1192_v51, 4  ;;  %v1178_v54 = vsel %vm1170_vm5, %v1110_v60, -inf }
 0x31e   : > { %v1173_v55 = vmax.f32 %v1171_v48, %v1172_v50  ;;  %v1179_v56 = vrot.slane %v1178_v54, 4 }
 0x31f   : > { %v1188_v61 = vrot.slane %v1187_v52, 2  ;;  %v1194_v57 = vmax.f32 %v1192_v51, %v1193_v53 }
 0x320   : > { %v1174_v62 = vrot.slane %v1173_v55, 2  ;;  %v1180_v63 = vmax.f32 %v1178_v54, %v1179_v56 }
 0x321   : > { %v1189_v1 = vmax.f32 %v1187_v52, %v1188_v61  ;;  %v1195_v2 = vrot.slane %v1194_v57, 2  ;;  %v4960_v5 = vpop.f32.mrb[8].mxu0 }
 0x322   : > { %v1175_v6 = vmax.f32 %v1173_v55, %v1174_v62  ;;  %v1181_v9 = vrot.slane %v1180_v63, 2  ;;  %v1213_v11 = vsel %vm1170_vm5, %v4960_v5, -inf  ;;  %v4964_v12 = vpop.f32.mrb[9].mxu0 }
 0x323   : > { %v1190_v13 = vrot.slane %v1189_v1, 1  ;;  %v1196_v8 = vmax.f32 %v1194_v57, %v1195_v2  ;;  %v1214_v14 = vrot.slane %v1213_v11, 4  ;;  %v1199_v15 = vsel %vm1170_vm5, %v4964_v12, -inf  ;;  %v4968_v17 = vpop.f32.mrb[10].mxu0 }
 0x324   : > { %v1176_v18 = vrot.slane %v1175_v6, 1  ;;  %v1182_v19 = vmax.f32 %v1180_v63, %v1181_v9  ;;  %v1200_v21 = vrot.slane %v1199_v15, 4  ;;  %v1220_v22 = vsel %vm1170_vm5, %v4968_v17, -inf  ;;  %v4972_v23 = vpop.f32.mrb[11].mxu0 }
 0x325   : > { %v1191_v24 = vmax.f32 %v1189_v1, %v1190_v13  ;;  %v1197_v25 = vrot.slane %v1196_v8, 1  ;;  %v1215_v26 = vmax.f32 %v1213_v11, %v1214_v14  ;;  %v1221_v28 = vrot.slane %v1220_v22, 4 }
 0x326   : > { %v1177_v30 = vmax.f32 %v1175_v6, %v1176_v18  ;;  %v1183_v31 = vrot.slane %v1182_v19, 1  ;;  %v1201_v32 = vmax.f32 %v1199_v15, %v1200_v21  ;;  %v1206_v34 = vsel %vm1170_vm5, %v4972_v23, -inf }
 0x327   : > { %v1285_v35 = vsub.f32 %v4458_v45, %v1191_v24  ;;  %v1198_v36 = vmax.f32 %v1196_v8, %v1197_v25  ;;  %v1216_v38 = vrot.slane %v1215_v26, 2  ;;  %v1222_v39 = vmax.f32 %v1220_v22, %v1221_v28 }
 0x328   : > { %v1283_v41 = vsub.f32 %v1107_v47, %v1177_v30  ;;  %v1184_v42 = vmax.f32 %v1182_v19, %v1183_v31  ;;  %v1202_v43 = vrot.slane %v1201_v32, 2  ;;  %v1207_v27 = vrot.slane %v1206_v34, 4 }
 0x329   : > { %v1303_v29 = vmul.f32 1.442695, %v1285_v35  ;;  %v1286_v44 = vsub.f32 %v4459_v49, %v1198_v36  ;;  %v1217_v40 = vmax.f32 %v1215_v26, %v1216_v38  ;;  %v1223_v58 = vrot.slane %v1222_v39, 2  ;;  %v4976_v46 = vpop.f32.mrb[12].mxu0 }
 0x32a   : > { %v1299_v59 = vmul.f32 1.442695, %v1283_v41  ;;  %v1284_v48 = vsub.f32 %v1110_v60, %v1184_v42  ;;  %v1203_v50 = vmax.f32 %v1201_v32, %v1202_v43  ;;  %v1208_v51 = vmax.f32 %v1206_v34, %v1207_v27  ;;  %v4978_v52 = vpop.f32.mrb[13].mxu0 }
 0x32b   : > { %4594 = vpow2.f32 %v1303_v29  ;;  %v1305_v45 = vmul.f32 1.442695, %v1286_v44  ;;  %v1218_v53 = vrot.slane %v1217_v40, 1  ;;  %v1224_v54 = vmax.f32 %v1222_v39, %v1223_v58  ;;  %v4980_v47 = vpop.f32.mrb[14].mxu0 }
 0x32c   : > { %4596 = vpow2.f32 %v1299_v59  ;;  %v1301_v55 = vmul.f32 1.442695, %v1284_v48  ;;  %v1204_v56 = vrot.slane %v1203_v50, 1  ;;  %v1209_v49 = vrot.slane %v1208_v51, 2  ;;  %v4982_v61 = vpop.f32.mrb[15].mxu0 }
 0x32d   : > { %4598 = vpow2.f32 %v1305_v45  ;;  %v1219_v57 = vmax.f32 %v1217_v40, %v1218_v53  ;;  %v1225_v62 = vrot.slane %v1224_v54, 1  ;;  %v1241_v60 = vsel %vm1170_vm5, %v4976_v46, -inf }
 0x32e   : > { %4600 = vpow2.f32 %v1301_v55  ;;  %v1205_v63 = vmax.f32 %v1203_v50, %v1204_v56  ;;  %v1210_v1 = vmax.f32 %v1208_v51, %v1209_v49  ;;  %v1242_v2 = vrot.slane %v1241_v60, 4 }
 0x32f   : > { %v1289_v6 = vsub.f32 %v4960_v5, %v1219_v57  ;;  %v1226_v9 = vmax.f32 %v1224_v54, %v1225_v62  ;;  %v1227_v11 = vsel %vm1170_vm5, %v4978_v52, -inf  ;;  %v1248_v13 = vsel %vm1170_vm5, %v4980_v47, -inf }
 0x330   : > { %v1287_v8 = vsub.f32 %v4964_v12, %v1205_v63  ;;  %v1211_v14 = vrot.slane %v1210_v1, 1  ;;  %v1243_v15 = vmax.f32 %v1241_v60, %v1242_v2  ;;  %v1228_v18 = vrot.slane %v1227_v11, 4 }
 0x331   : > { %v1311_v19 = vmul.f32 1.442695, %v1289_v6  ;;  %v1290_v21 = vsub.f32 %v4968_v17, %v1226_v9  ;;  %v1249_v22 = vrot.slane %v1248_v13, 4  ;;  %v1234_v24 = vsel %vm1170_vm5, %v4982_v61, -inf  ;;  %v4995_v5 = vpop.f32.mrb[16].mxu0 }
 0x332   : > { %v1307_v25 = vmul.f32 1.442695, %v1287_v8  ;;  %v1212_v26 = vmax.f32 %v1210_v1, %v1211_v14  ;;  %v1244_v28 = vrot.slane %v1243_v15, 2  ;;  %v1229_v30 = vmax.f32 %v1227_v11, %v1228_v18  ;;  %v4997_v31 = vpop.f32.mrb[17].mxu0 }
 0x333   : > { %4602 = vpow2.f32 %v1311_v19  ;;  %v1313_v12 = vmul.f32 1.442695, %v1290_v21  ;;  %v1250_v32 = vmax.f32 %v1248_v13, %v1249_v22  ;;  %v1235_v34 = vrot.slane %v1234_v24, 4  ;;  %v4999_v35 = vpop.f32.mrb[18].mxu0 }
 0x334   : > { %4604 = vpow2.f32 %v1307_v25  ;;  %v1288_v17 = vsub.f32 %v4972_v23, %v1212_v26  ;;  %v1245_v36 = vmax.f32 %v1243_v15, %v1244_v28  ;;  %v1230_v38 = vrot.slane %v1229_v30, 2  ;;  %v5002_v39 = vpop.f32.mrb[19].mxu0 }
 0x335   : > { %v5004_v41 = vpop.eup %4594  ;;  %4606 = vpow2.f32 %v1313_v12  ;;  %v1251_v42 = vrot.slane %v1250_v32, 2  ;;  %v1236_v43 = vmax.f32 %v1234_v24, %v1235_v34  ;;  %v5008_v27 = vsel %vm1170_vm5, %v4995_v5, -inf }
 0x336   : > { %v5010_v29 = vpop.eup %4596  ;;  %v1345_v44 = vsel %vm1170_vm5, %v5004_v41, 0.0  ;;  %v1309_v40 = vmul.f32 1.442695, %v1288_v17  ;;  %v1246_v23 = vrot.slane %v1245_v36, 1  ;;  %v1231_v58 = vmax.f32 %v1229_v30, %v1230_v38 }
 0x337   : > { %v5014_v59 = vpop.eup %4598  ;;  %v1346_v48 = vrot.slane %v1345_v44, 4  ;;  %v1331_v50 = vsel %vm1170_vm5, %v5010_v29, 0.0  ;;  %v1252_v51 = vmax.f32 %v1250_v32, %v1251_v42  ;;  %v1237_v45 = vrot.slane %v1236_v43, 2 }
 0x338   : > { %v5018_v53 = vpop.eup %4600  ;;  %v1332_v54 = vrot.slane %v1331_v50, 4  ;;  %v1352_v55 = vsel %vm1170_vm5, %v5014_v59, 0.0  ;;  %4608 = vpow2.f32 %v1309_v40  ;;  %v1247_v56 = vmax.f32 %v1245_v36, %v1246_v23 }
 0x339   : > { %v1347_v49 = vadd.f32 %v1346_v48, %v1345_v44  ;;  %v1353_v57 = vrot.slane %v1352_v55, 4  ;;  %v1338_v62 = vsel %vm1170_vm5, %v5018_v53, 0.0  ;;  %v1232_v60 = vrot.slane %v1231_v58, 1 }
 0x33a   : > { %v1333_v63 = vadd.f32 %v1332_v54, %v1331_v50  ;;  %v1339_v1 = vrot.slane %v1338_v62, 4  ;;  %v1293_v2 = vsub.f32 %v4976_v46, %v1247_v56  ;;  %v1253_v6 = vrot.slane %v1252_v51, 1 }
 0x33b   : > { %v1348_v9 = vrot.slane %v1347_v49, 2  ;;  %v1354_v11 = vadd.f32 %v1353_v57, %v1352_v55  ;;  %v1233_v13 = vmax.f32 %v1231_v58, %v1232_v60  ;;  %v1238_v8 = vmax.f32 %v1236_v43, %v1237_v45 }
 0x33c   : > { %v1334_v14 = vrot.slane %v1333_v63, 2  ;;  %v1340_v15 = vadd.f32 %v1339_v1, %v1338_v62  ;;  %v1319_v18 = vmul.f32 1.442695, %v1293_v2  ;;  %v1254_v19 = vmax.f32 %v1252_v51, %v1253_v6 }
 0x33d   : > { %v5025_v21 = vpop.eup %4602  ;;  %v1349_v22 = vadd.f32 %v1348_v9, %v1347_v49  ;;  %v1355_v24 = vrot.slane %v1354_v11, 2  ;;  %v1291_v25 = vsub.f32 %v4978_v52, %v1233_v13  ;;  %v1239_v26 = vrot.slane %v1238_v8, 1 }
 0x33e   : > { %v5028_v28 = vpop.eup %4604  ;;  %v1335_v30 = vadd.f32 %v1334_v14, %v1333_v63  ;;  %v1341_v46 = vrot.slane %v1340_v15, 2  ;;  %v1373_v12 = vsel %vm1170_vm5, %v5025_v21, 0.0  ;;  %4610 = vpow2.f32 %v1319_v18 }
 0x33f   : > { %v5032_v32 = vpop.eup %4606  ;;  %v1350_v34 = vrot.slane %v1349_v22, 1  ;;  %v1356_v17 = vadd.f32 %v1355_v24, %v1354_v11  ;;  %v1374_v36 = vrot.slane %v1373_v12, 4  ;;  %v1359_v38 = vsel %vm1170_vm5, %v5028_v28, 0.0 }
 0x340   : > { %v1336_v42 = vrot.slane %v1335_v30, 1  ;;  %v1342_v43 = vadd.f32 %v1341_v46, %v1340_v15  ;;  %v1360_v52 = vrot.slane %v1359_v38, 4  ;;  %v1380_v44 = vsel %vm1170_vm5, %v5032_v32, 0.0 }
 0x341   : > { %v1351_v40 = vadd.f32 %v1350_v34, %v1349_v22  ;;  %v1357_v23 = vrot.slane %v1356_v17, 1  ;;  %v1375_v58 = vadd.f32 %v1374_v36, %v1373_v12  ;;  %v1381_v48 = vrot.slane %v1380_v44, 4 }
 0x342   : > { %v5038_v50 = vpop.eup %4608  ;;  %v1337_v51 = vadd.f32 %v1336_v42, %v1335_v30  ;;  %v1343_v45 = vrot.slane %v1342_v43, 1  ;;  %v1361_v54 = vadd.f32 %v1360_v52, %v1359_v38  ;;  %v1315_v55 = vmul.f32 1.442695, %v1291_v25 }
 0x343   : > { %4612 = vrcp.f32 %v1351_v40  ;;  %v1358_v56 = vadd.f32 %v1357_v23, %v1356_v17  ;;  %v1376_v49 = vrot.slane %v1375_v58, 2  ;;  %v1382_v57 = vadd.f32 %v1381_v48, %v1380_v44 }
 0x344   : > { %4614 = vrcp.f32 %v1337_v51  ;;  %v1344_v62 = vadd.f32 %v1343_v45, %v1342_v43  ;;  %v1362_v60 = vrot.slane %v1361_v54, 2  ;;  %v1366_v63 = vsel %vm1170_vm5, %v5038_v50, 0.0 }
 0x345   : > { %4616 = vrcp.f32 %v1358_v56  ;;  %v1377_v1 = vadd.f32 %v1376_v49, %v1375_v58  ;;  %v1383_v2 = vrot.slane %v1382_v57, 2  ;;  %v1367_v6 = vrot.slane %v1366_v63, 4 }
 0x346   : > { %4618 = vrcp.f32 %v1344_v62  ;;  %v1363_v9 = vadd.f32 %v1362_v60, %v1361_v54  ;;  %v1294_v11 = vsub.f32 %v4980_v47, %v1254_v19  ;;  %v1240_v13 = vmax.f32 %v1238_v8, %v1239_v26 }
 0x347   : > { %v1378_v14 = vrot.slane %v1377_v1, 1  ;;  %v1384_v15 = vadd.f32 %v1383_v2, %v1382_v57  ;;  %v1368_v18 = vadd.f32 %v1367_v6, %v1366_v63  ;;  %4620 = vpow2.f32 %v1315_v55 }
 0x348   : > { %v5043_v22 = vpop.eup %4610  ;;  %v1364_v24 = vrot.slane %v1363_v9, 1  ;;  %v1321_v25 = vmul.f32 1.442695, %v1294_v11  ;;  %v1292_v30 = vsub.f32 %v4982_v61, %v1240_v13  ;;  %v1270_v46 = vrot.slane %v5008_v27, 4 }
 0x349   : > { %v1379_v12 = vadd.f32 %v1378_v14, %v1377_v1  ;;  %v1385_v34 = vrot.slane %v1384_v15, 1  ;;  %v1369_v17 = vrot.slane %v1368_v18, 2  ;;  %v1401_v36 = vsel %vm1170_vm5, %v5043_v22, 0.0 }
 0x34a   : > { %v1365_v47 = vadd.f32 %v1364_v24, %v1363_v9  ;;  %v1402_v8 = vrot.slane %v1401_v36, 4  ;;  %4622 = vpow2.f32 %v1321_v25  ;;  %v1317_v19 = vmul.f32 1.442695, %v1292_v30 }
 0x34b   : > { %4624 = vrcp.f32 %v1379_v12  ;;  %v1386_v26 = vadd.f32 %v1385_v34, %v1384_v15  ;;  %v1370_v38 = vadd.f32 %v1369_v17, %v1368_v18  ;;  %v1271_v42 = vmax.f32 %v5008_v27, %v1270_v46 }
 0x34c   : > { %4626 = vrcp.f32 %v1365_v47  ;;  %v1403_v43 = vadd.f32 %v1402_v8, %v1401_v36  ;;  %v1255_v61 = vsel %vm1170_vm5, %v4997_v31, -inf  ;;  %v1276_v52 = vsel %vm1170_vm5, %v4999_v35, -inf }
 0x34d   : > { %v4613_v44 = vpop.eup %4612  ;;  %4628 = vrcp.f32 %v1386_v26  ;;  %v1371_v40 = vrot.slane %v1370_v38, 1  ;;  %v1272_v23 = vrot.slane %v1271_v42, 2  ;;  %v1256_v58 = vrot.slane %v1255_v61, 4 }
 0x34e   : > { %v4615_v48 = vpop.eup %4614  ;;  %v1404_v51 = vrot.slane %v1403_v43, 2  ;;  %4630 = vpow2.f32 %v1317_v19  ;;  %v1277_v45 = vrot.slane %v1276_v52, 4  ;;  %v1262_v49 = vsel %vm1170_vm5, %v5002_v39, -inf }
 0x34f   : > { %v4617_v54 = vpop.eup %4616  ;;  %v1372_v55 = vadd.f32 %v1371_v40, %v1370_v38  ;;  %v1273_v27 = vmax.f32 %v1271_v42, %v1272_v23  ;;  %v1257_v56 = vmax.f32 %v1255_v61, %v1256_v58  ;;  %v1263_v1 = vrot.slane %v1262_v49, 4 }
 0x350   : > { %v4619_v57 = vpop.eup %4618  ;;  %v1462_v62 = vmul.f32 %v4617_v54, %v5014_v59  ;;  %v1405_v60 = vadd.f32 %v1404_v51, %v1403_v43  ;;  %v1278_v63 = vmax.f32 %v1276_v52, %v1277_v45  ;;  %v1461_v6 = vmul.f32 %v4613_v44, %v5004_v41 }
 0x351   : > { %v5057_v2 = vpop.eup %4620  ;;  %4632 = vrcp.f32 %v1372_v55  ;;  %v1274_v9 = vrot.slane %v1273_v27, 1  ;;  %v1258_v11 = vrot.slane %v1257_v56, 2  ;;  %v1264_v15 = vmax.f32 %v1262_v49, %v1263_v1 }
 0x352   : > { %v1387_v13 = vsel %vm1170_vm5, %v5057_v2, 0.0  ;;  %v1279_v14 = vrot.slane %v1278_v63, 2  ;;  %v1459_v18 = vmul.f32 %v4615_v48, %v5010_v29  ;;  %v1460_v30 = vmul.f32 %v4619_v57, %v5018_v53 }
 0x353   : > { %v1388_v24 = vrot.slane %v1387_v13, 4  ;;  %v1275_v25 = vmax.f32 %v1273_v27, %v1274_v9  ;;  %v1259_v59 = vmax.f32 %v1257_v56, %v1258_v11  ;;  %v1406_v12 = vrot.slane %v1405_v60, 1 }
 0x354   : > { %v5064_v46 = vpop.eup %4622  ;;  %v1280_v34 = vmax.f32 %v1278_v63, %v1279_v14  ;;  %v1265_v41 = vrot.slane %v1264_v15, 2  ;;  %v1476_v17 = vpack.c.bf16 %v1462_v62, %v1461_v6  ;;  %v1475_v40 = vpack.c.bf16 %v1460_v30, %v1459_v18 }
 0x355   : > { %v4625_v36 = vpop.eup %4624  ;;  %v1389_v47 = vadd.f32 %v1388_v24, %v1387_v13  ;;  %v1408_v8 = vsel %vm1170_vm5, %v5064_v46, 0.0  ;;  %v1297_v19 = vsub.f32 %v4995_v5, %v1275_v25  ;;  %v1260_v26 = vrot.slane %v1259_v59, 1 }
 0x356   : > { %v4627_v29 = vpop.eup %4626  ;;  %v1409_v38 = vrot.slane %v1408_v8, 4  ;;  %v1281_v42 = vrot.slane %v1280_v34, 1  ;;  %v1266_v43 = vmax.f32 %v1264_v15, %v1265_v41  ;;  %v1407_v58 = vadd.f32 %v1406_v12, %v1405_v60  ;;  %4482 = vmatprep.mubr.msk.bf16.mxu1 %vm1170_vm5, %v1475_v40 }
 0x357   : > { %v4629_v61 = vpop.eup %4628  ;;  %v1390_v53 = vrot.slane %v1389_v47, 2  ;;  %v1327_v52 = vmul.f32 1.442695, %v1297_v19  ;;  %v1261_v44 = vmax.f32 %v1259_v59, %v1260_v26  ;;  %4483 = vmatmul.mubr.msk.bf16.vlgmr.msra.gmra.mrb[4].mxu1 %vm1170_vm5, %v1476_v17  ;;  %v1465_v1 = vmul.f32 %v4625_v36, %v5025_v21 }
 0x358   : > { %v5069_v23 = vpop.eup %4630  ;;  %v1410_v48 = vadd.f32 %v1409_v38, %v1408_v8  ;;  %v1282_v51 = vmax.f32 %v1280_v34, %v1281_v42  ;;  %v1267_v45 = vrot.slane %v1266_v43, 1  ;;  %v1466_v6 = vmul.f32 %v4629_v61, %v5032_v32 }
 0x359   : > { %v1391_v54 = vadd.f32 %v1390_v53, %v1389_v47  ;;  %v1394_v5 = vsel %vm1170_vm5, %v5069_v23, 0.0  ;;  %4634 = vpow2.f32 %v1327_v52  ;;  %v1295_v55 = vsub.f32 %v4997_v31, %v1261_v44 }
 0x35a   : > { %v1411_v27 = vrot.slane %v1410_v48, 2  ;;  %v1395_v56 = vrot.slane %v1394_v5, 4  ;;  %v1298_v49 = vsub.f32 %v4999_v35, %v1282_v51  ;;  %v1268_v57 = vmax.f32 %v1266_v43, %v1267_v45 }
 0x35b   : > { %v4633_v62 = vpop.eup %4632  ;;  %v1392_v60 = vrot.slane %v1391_v54, 1  ;;  %v1323_v63 = vmul.f32 1.442695, %v1295_v55  ;;  %v1463_v14 = vmul.f32 %v4627_v29, %v5028_v28  ;;  %v1478_v15 = vpack.c.bf16 %v1466_v6, %v1465_v1 }
 0x35c   : > { %v1412_v9 = vadd.f32 %v1411_v27, %v1410_v48  ;;  %v1396_v11 = vadd.f32 %v1395_v56, %v1394_v5  ;;  %v1329_v13 = vmul.f32 1.442695, %v1298_v49  ;;  %v1296_v31 = vsub.f32 %v5002_v39, %v1268_v57 }
 0x35d   : > { %4636 = vpow2.f32 %v1323_v63  ;;  %v1464_v35 = vmul.f32 %v4633_v62, %v5038_v50  ;;  %v1393_v21 = vadd.f32 %v1392_v60, %v1391_v54 }
 0x35e   : > { %v1413_v18 = vrot.slane %v1412_v9, 1  ;;  %v1397_v24 = vrot.slane %v1396_v11, 2  ;;  %4638 = vpow2.f32 %v1329_v13  ;;  %v1325_v25 = vmul.f32 1.442695, %v1296_v31 }
 0x35f   : > { %4640 = vrcp.f32 %v1407_v58  ;;  %v1477_v59 = vpack.c.bf16 %v1464_v35, %v1463_v14 }
 0x360   : > { %v1414_v30 = vadd.f32 %v1413_v18, %v1412_v9  ;;  %v1398_v32 = vadd.f32 %v1397_v24, %v1396_v11  ;;  %4642 = vpow2.f32 %v1325_v25 }
 0x361   : > { %4486 = vmatprep.mubr.msk.bf16.mxu1 %vm1170_vm5, %v1477_v59 }
 0x362   : > { %4644 = vrcp.f32 %v1414_v30  ;;  %v1399_v39 = vrot.slane %v1398_v32, 1  ;;  %4487 = vmatmul.mubr.msk.bf16.gmra.mrb[8].mxu1 %vm1170_vm5, %v1478_v15 }
 0x363   : > { %v4635_v28 = vpop.eup %4634  ;;  %4646 = vrcp.f32 %v1393_v21 }
 0x364   : > { %v1400_v50 = vadd.f32 %v1399_v39, %v1398_v32  ;;  %v1429_v12 = vsel %vm1170_vm5, %v4635_v28, 0.0  ;;  %v4585_v32 = vld [vmem:[%s4779_s23] sm:$0xff]   ;;  %v4586_v39 = vld [vmem:[%s4779_s23 + $0x8] sm:$0xff]  }
 0x365   : > { %v1430_v34 = vrot.slane %v1429_v12, 4  ;;  %4499 = vmatpush3.bf16.msra.mxu0 %v4585_v32 }
 0x366   : > { %4648 = vrcp.f32 %v1400_v50  ;;  %4500 = vmatprep.subr.bf16.mxu0 %v4676_v20  ;;  %v4588_v50 = vld [vmem:[%s4779_s23 + $0x18] sm:$0xff]  }
 0x367   : > { %v4637_v41 = vpop.eup %4636  ;;  %v1431_v17 = vadd.f32 %v1430_v34, %v1429_v12  ;;  %v4589_v12 = vld [vmem:[%s4779_s23 + $0x20] sm:$0x3f]  }
 0x368   : > { %v4639_v36 = vpop.eup %4638  ;;  %v1415_v47 = vsel %vm1170_vm5, %v4637_v41, 0.0  ;;  %v1863_v34 = vand.u32 %v4589_v12, %v4837_v33 }
 0x369   : > { %v4641_v8 = vpop.eup %4640  ;;  %v1432_v19 = vrot.slane %v1431_v17, 2  ;;  %v1416_v26 = vrot.slane %v1415_v47, 4  ;;  %v1436_v29 = vsel %vm1170_vm5, %v4639_v36, 0.0  ;;  %4501 = vmatpush3.bf16.msra.mxu0 %v4586_v39 }
 0x36a   : > { %v4643_v38 = vpop.eup %4642  ;;  %v1437_v42 = vrot.slane %v1436_v29, 4  ;;  %v1469_v51 = vmul.f32 %v4641_v8, %v5043_v22  ;;  %4502 = vmatprep.subr.bf16.mxu0 %v4676_v20 }
 0x36b   : > { %v1433_v43 = vadd.f32 %v1432_v19, %v1431_v17  ;;  %v1417_v61 = vadd.f32 %v1416_v26, %v1415_v47  ;;  %v1422_v53 = vsel %vm1170_vm5, %v4643_v38, 0.0 }
 0x36c   : > { %v4645_v52 = vpop.eup %4644  ;;  %v1438_v44 = vadd.f32 %v1437_v42, %v1436_v29  ;;  %v1423_v40 = vrot.slane %v1422_v53, 4 }
 0x36d   : > { %v1434_v58 = vrot.slane %v1433_v43, 1  ;;  %v1418_v48 = vrot.slane %v1417_v61, 2  ;;  %v1470_v45 = vmul.f32 %v4645_v52, %v5064_v46  ;;  %v4647_v54 = vpop.eup %4646 }
 0x36e   : > { %v1439_v5 = vrot.slane %v1438_v44, 2  ;;  %v1424_v55 = vadd.f32 %v1423_v40, %v1422_v53  ;;  %v1467_v1 = vmul.f32 %v4647_v54, %v5057_v2 }
 0x36f   : > { %v1419_v27 = vadd.f32 %v1418_v48, %v1417_v61  ;;  %v1480_v56 = vpack.c.bf16 %v1470_v45, %v1469_v51  ;;  %v1435_v57 = vadd.f32 %v1434_v58, %v1433_v43 }
 0x370   : > { %v4649_v49 = vpop.eup %4648  ;;  %v1440_v62 = vadd.f32 %v1439_v5, %v1438_v44  ;;  %v1425_v60 = vrot.slane %v1424_v55, 2 }
 0x371   : > { %v1420_v63 = vrot.slane %v1419_v27, 1  ;;  %v1468_v6 = vmul.f32 %v4649_v49, %v5069_v23  ;;  %4650 = vrcp.f32 %v1435_v57 }
 0x372   : > { %v1441_v9 = vrot.slane %v1440_v62, 1  ;;  %v1426_v11 = vadd.f32 %v1425_v60, %v1424_v55 }
 0x373   : > { %v1421_v13 = vadd.f32 %v1420_v63, %v1419_v27  ;;  %v1479_v22 = vpack.c.bf16 %v1468_v6, %v1467_v1 }
 0x374   : > { %v1442_v46 = vadd.f32 %v1441_v9, %v1440_v62  ;;  %v1427_v31 = vrot.slane %v1426_v11, 1 }
 0x375   : > { %4652 = vrcp.f32 %v1421_v13  ;;  %4490 = vmatprep.mubr.msk.bf16.mxu1 %vm1170_vm5, %v1479_v22 }
 0x376   : > { %4654 = vrcp.f32 %v1442_v46  ;;  %v1428_v14 = vadd.f32 %v1427_v31, %v1426_v11  ;;  %4491 = vmatmul.mubr.msk.bf16.gmra.mrb[12].mxu1 %vm1170_vm5, %v1480_v56 }
 0x378   : > { %4656 = vrcp.f32 %v1428_v14 }
 0x37b   : > { %v4651_v35 = vpop.eup %4650 }
 0x37c   : > { %v1473_v15 = vmul.f32 %v4651_v35, %v4635_v28  ;;  %v4587_v28 = vld [vmem:[%s4779_s23 + $0x10] sm:$0xff]  }
 0x37d   : > { %4503 = vmatpush3.bf16.msra.mxu0 %v4587_v28 }
 0x37e   : > { %4504 = vmatprep.subr.bf16.mxu0 %v4676_v20 }
 0x37f   : > { %v4653_v2 = vpop.eup %4652 }
 0x380   : > { %v4655_v23 = vpop.eup %4654  ;;  %v1471_v25 = vmul.f32 %v4653_v2, %v4637_v41  ;;  %v5108_v41 = vsub.s32 2, %v4890_v0 }
 0x381   : > { %v1474_v18 = vmul.f32 %v4655_v23, %v4639_v36  ;;  %4505 = vmatpush3.bf16.msra.mxu0 %v4588_v50 }
 0x382   : > { %v4657_v24 = vpop.eup %4656  ;;  %4506 = vmatprep.subr.bf16.mxu0 %v4676_v20  ;;  %v5112_v17 = vrot.slane %v4896_v4, %v5108_v41 }
 0x383   : > { %v1472_v59 = vmul.f32 %v4657_v24, %v4643_v38  ;;  %v1482_v21 = vpack.c.bf16 %v1474_v18, %v1473_v15 }
 0x384   : > { %v807_v36 = vadd.f32 %v4904_v10, %v5112_v17 }
 0x385   : > { %v1481_v30 = vpack.c.bf16 %v1472_v59, %v1471_v25  ;;  %4507 = vmatpush3.bf16.msra.mxu0 %v1863_v34 }
 0x387   : > { %4494 = vmatprep.mubr.msk.bf16.mxu1 %vm1170_vm5, %v1481_v30 }
 0x388   : > { %4495 = vmatmul.mubr.msk.bf16.gmra.mrb[16].mxu1 %vm1170_vm5, %v1482_v21 }
 0x389   : > { %2577 = vmatprep.mubr.bf16.mxu1 %v4678_v37 }
 0x42a   : > { %v4484_v47 = vpop.f32.mrb[4].mxu1 }
 0x42b   : > { %v1620_v8 = vmul.f32 %v4484_v47, %v807_v36  ;;  %v1555_v19 = vpop.f32.mrb[5].mxu1 }
 0x42c   : > { %v1618_v26 = vmul.f32 %v1555_v19, %v807_v36  ;;  %v4485_v29 = vpop.f32.mrb[6].mxu1 }
 0x42d   : > { %v1648_v20 = vsel %vm558_vm1, %v1620_v8, 0.0  ;;  %v1621_v38 = vmul.f32 %v4485_v29, %v807_v36  ;;  %v1558_v42 = vpop.f32.mrb[7].mxu1 }
 0x42e   : > { %v1649_v43 = vrot.slane %v1648_v20, 4  ;;  %v1634_v61 = vsel %vm558_vm1, %v1618_v26, 0.0  ;;  %v1619_v53 = vmul.f32 %v1558_v42, %v807_v36 }
 0x42f   : > { %v1635_v52 = vrot.slane %v1634_v61, 4  ;;  %v1655_v4 = vsel %vm558_vm1, %v1621_v38, 0.0 }
 0x430   : > { %v1650_v44 = vadd.f32 %v1649_v43, %v1648_v20  ;;  %v1656_v40 = vrot.slane %v1655_v4, 4  ;;  %v1641_v10 = vsel %vm558_vm1, %v1619_v53, 0.0 }
 0x431   : > { %v1636_v58 = vadd.f32 %v1635_v52, %v1634_v61  ;;  %v1642_v48 = vrot.slane %v1641_v10, 4 }
 0x432   : > { %v1651_v51 = vrot.slane %v1650_v44, 2  ;;  %v1657_v45 = vadd.f32 %v1656_v40, %v1655_v4 }
 0x433   : > { %v1637_v5 = vrot.slane %v1636_v58, 2  ;;  %v1643_v55 = vadd.f32 %v1642_v48, %v1641_v10 }
 0x434   : > { %v1652_v49 = vadd.f32 %v1651_v51, %v1650_v44  ;;  %v1658_v57 = vrot.slane %v1657_v45, 2 }
 0x435   : > { %v4488_v54 = vpop.f32.mrb[8].mxu1  ;;  %v1638_v63 = vadd.f32 %v1637_v5, %v1636_v58  ;;  %v1644_v1 = vrot.slane %v1643_v55, 2 }
 0x436   : > { %v1624_v27 = vmul.f32 %v4488_v54, %v807_v36  ;;  %v1571_v56 = vpop.f32.mrb[9].mxu1  ;;  %v1653_v13 = vrot.slane %v1652_v49, 1  ;;  %v1659_v22 = vadd.f32 %v1658_v57, %v1657_v45 }
 0x437   : > { %v1622_v62 = vmul.f32 %v1571_v56, %v807_v36  ;;  %v4489_v60 = vpop.f32.mrb[10].mxu1  ;;  %v1639_v14 = vrot.slane %v1638_v63, 1  ;;  %v1645_v35 = vadd.f32 %v1644_v1, %v1643_v55 }
 0x438   : > { %v1676_v6 = vsel %vm558_vm1, %v1624_v27, 0.0  ;;  %v1625_v9 = vmul.f32 %v4489_v60, %v807_v36  ;;  %v1574_v11 = vpop.f32.mrb[11].mxu1  ;;  %v1654_v15 = vadd.f32 %v1653_v13, %v1652_v49  ;;  %v1660_v18 = vrot.slane %v1659_v22, 1 }
 0x439   : > { %v1677_v46 = vrot.slane %v1676_v6, 4  ;;  %v1662_v31 = vsel %vm558_vm1, %v1622_v62, 0.0  ;;  %v1640_v59 = vadd.f32 %v1639_v14, %v1638_v63  ;;  %v1646_v21 = vrot.slane %v1645_v35, 1 }
 0x43a   : > { %v1663_v2 = vrot.slane %v1662_v31, 4  ;;  %v1683_v23 = vsel %vm558_vm1, %v1625_v9, 0.0  ;;  %v1623_v32 = vmul.f32 %v1574_v11, %v807_v36  ;;  %v1661_v39 = vadd.f32 %v1660_v18, %v1659_v22 }
 0x43b   : > { %v1678_v24 = vadd.f32 %v1677_v46, %v1676_v6  ;;  %v1684_v25 = vrot.slane %v1683_v23, 4  ;;  %v1746_v12 = vpack.c.bf16 %v1640_v59, %v1640_v59  ;;  %v1647_v34 = vadd.f32 %v1646_v21, %v1645_v35 }
 0x43c   : > { %v1664_v30 = vadd.f32 %v1663_v2, %v1662_v31  ;;  %v1669_v8 = vsel %vm558_vm1, %v1623_v32, 0.0  ;;  %v1748_v19 = vpack.c.bf16 %v1654_v15, %v1654_v15  ;;  %v1749_v26 = vpack.c.bf16 %v1661_v39, %v1661_v39 }
 0x43d   : > { %v1679_v28 = vrot.slane %v1678_v24, 2  ;;  %v1685_v50 = vadd.f32 %v1684_v25, %v1683_v23  ;;  %v1747_v38 = vpack.c.bf16 %v1647_v34, %v1647_v34  ;;  %v1670_v43 = vrot.slane %v1669_v8, 4 }
 0x43e   : > { %v1665_v47 = vrot.slane %v1664_v30, 2  ;;  %v1792_v53 = vunpack.c.l.b16 %v1746_v12  ;;  %v1794_v44 = vunpack.c.l.b16 %v1748_v19  ;;  %v1795_v40 = vunpack.c.l.b16 %v1749_v26 }
 0x43f   : > { %v1680_v29 = vadd.f32 %v1679_v28, %v1678_v24  ;;  %v1686_v20 = vrot.slane %v1685_v50, 2  ;;  %v1793_v36 = vunpack.c.l.b16 %v1747_v38  ;;  %v1671_v4 = vadd.f32 %v1670_v43, %v1669_v8 }
 0x440   : > { %v1666_v42 = vadd.f32 %v1665_v47, %v1664_v30  ;;  %v5129_v49 = vadd.f32 %v4908_v16, %v5112_v17 }
 0x441   : > { %v1687_v61 = vadd.f32 %v1686_v20, %v1685_v50  ;;  %v1681_v10 = vrot.slane %v1680_v29, 1  ;;  %v1809_v58 = vsel %vm1808_vm6, %v1793_v36, %v1792_v53  ;;  %v1672_v45 = vrot.slane %v1671_v4, 2 }
 0x442   : > { %v1667_v52 = vrot.slane %v1666_v42, 1  ;;  %v1811_v54 = vsel %vm1810_vm7, %v1794_v44, %v1809_v58 }
 0x443   : > { %v1688_v51 = vrot.slane %v1687_v61, 1  ;;  %v1813_v55 = vsel %vm1812_vm8, %v1795_v40, %v1811_v54  ;;  %v1673_v27 = vadd.f32 %v1672_v45, %v1671_v4  ;;  %v1682_v56 = vadd.f32 %v1681_v10, %v1680_v29 }
 0x444   : > { %v1668_v48 = vadd.f32 %v1667_v52, %v1666_v42 }
 0x445   : > { %v1689_v62 = vadd.f32 %v1688_v51, %v1687_v61  ;;  %v1674_v60 = vrot.slane %v1673_v27, 1  ;;  %v1752_v13 = vpack.c.bf16 %v1682_v56, %v1682_v56 }
 0x446   : > { %v1750_v5 = vpack.c.bf16 %v1668_v48, %v1668_v48 }
 0x447   : > { %v1675_v6 = vadd.f32 %v1674_v60, %v1673_v27  ;;  %v1753_v31 = vpack.c.bf16 %v1689_v62, %v1689_v62  ;;  %v1798_v59 = vunpack.c.l.b16 %v1752_v13 }
 0x448   : > { %v1796_v57 = vunpack.c.l.b16 %v1750_v5 }
 0x449   : > { %v4492_v63 = vpop.f32.mrb[12].mxu1  ;;  %v1751_v14 = vpack.c.bf16 %v1675_v6, %v1675_v6  ;;  %v1799_v39 = vunpack.c.l.b16 %v1753_v31 }
 0x44a   : > { %v1815_v1 = vsel %vm1814_vm9, %v1796_v57, %v1813_v55  ;;  %v1628_v9 = vmul.f32 %v4492_v63, %v5129_v49  ;;  %v1587_v11 = vpop.f32.mrb[13].mxu1 }
 0x44b   : > { %v1626_v22 = vmul.f32 %v1587_v11, %v5129_v49  ;;  %v4493_v46 = vpop.f32.mrb[14].mxu1  ;;  %v1797_v18 = vunpack.c.l.b16 %v1751_v14 }
 0x44c   : > { %v1704_v16 = vsel %vm558_vm1, %v1628_v9, 0.0  ;;  %v1629_v17 = vmul.f32 %v4493_v46, %v5129_v49  ;;  %v1590_v35 = vpop.f32.mrb[15].mxu1 }
 0x44d   : > { %v1705_v2 = vrot.slane %v1704_v16, 4  ;;  %v1690_v23 = vsel %vm558_vm1, %v1626_v22, 0.0  ;;  %v1627_v15 = vmul.f32 %v1590_v35, %v5129_v49  ;;  %v1817_v28 = vsel %vm1816_vm10, %v1797_v18, %v1815_v1 }
 0x44e   : > { %v1691_v24 = vrot.slane %v1690_v23, 4  ;;  %v1711_v25 = vsel %vm558_vm1, %v1629_v17, 0.0  ;;  %v1819_v34 = vsel %vm1818_vm11, %v1798_v59, %v1817_v28 }
 0x44f   : > { %v1706_v21 = vadd.f32 %v1705_v2, %v1704_v16  ;;  %v1712_v30 = vrot.slane %v1711_v25, 4  ;;  %v1697_v32 = vsel %vm558_vm1, %v1627_v15, 0.0  ;;  %v5143_v19 = vsel %vm1820_vm12, %v1799_v39, %v1819_v34 }
 0x450   : > { %v1692_v50 = vadd.f32 %v1691_v24, %v1690_v23  ;;  %v1698_v12 = vrot.slane %v1697_v32, 4 }
 0x451   : > { %v1707_v47 = vrot.slane %v1706_v21, 2  ;;  %v1713_v8 = vadd.f32 %v1712_v30, %v1711_v25 }
 0x452   : > { %v1693_v26 = vrot.slane %v1692_v50, 2  ;;  %v1699_v29 = vadd.f32 %v1698_v12, %v1697_v32 }
 0x453   : > { %v1708_v20 = vadd.f32 %v1707_v47, %v1706_v21  ;;  %v1714_v38 = vrot.slane %v1713_v8, 2 }
 0x454   : > { %v1694_v42 = vadd.f32 %v1693_v26, %v1692_v50  ;;  %v1700_v43 = vrot.slane %v1699_v29, 2 }
 0x455   : > { %v1709_v61 = vrot.slane %v1708_v20, 1  ;;  %v1715_v53 = vadd.f32 %v1714_v38, %v1713_v8 }
 0x456   : > { %v1695_v36 = vrot.slane %v1694_v42, 1  ;;  %v1701_v52 = vadd.f32 %v1700_v43, %v1699_v29 }
 0x457   : > { %v1710_v4 = vadd.f32 %v1709_v61, %v1708_v20  ;;  %v1716_v44 = vrot.slane %v1715_v53, 1 }
 0x458   : > { %v1696_v40 = vadd.f32 %v1695_v36, %v1694_v42  ;;  %v1702_v10 = vrot.slane %v1701_v52, 1 }
 0x459   : > { %v1717_v58 = vadd.f32 %v1716_v44, %v1715_v53  ;;  %v1756_v45 = vpack.c.bf16 %v1710_v4, %v1710_v4 }
 0x45a   : > { %v1754_v48 = vpack.c.bf16 %v1696_v40, %v1696_v40  ;;  %v1703_v51 = vadd.f32 %v1702_v10, %v1701_v52 }
 0x45b   : > { %v4496_v54 = vpop.f32.mrb[16].mxu1  ;;  %v1757_v5 = vpack.c.bf16 %v1717_v58, %v1717_v58  ;;  %v1802_v11 = vunpack.c.l.b16 %v1756_v45 }
 0x45c   : > { %v1755_v55 = vpack.c.bf16 %v1703_v51, %v1703_v51  ;;  %v1632_v27 = vmul.f32 %v4496_v54, %v5129_v49  ;;  %v1603_v56 = vpop.f32.mrb[17].mxu1  ;;  %v1800_v60 = vunpack.c.l.b16 %v1754_v48 }
 0x45d   : > { %v1630_v57 = vmul.f32 %v1603_v56, %v5129_v49  ;;  %v4497_v62 = vpop.f32.mrb[18].mxu1  ;;  %v1803_v31 = vunpack.c.l.b16 %v1757_v5  ;;  %v4209_v5 = vld [vmem:[%s4799_s16 + $0x4] ss:$0 sm:$0xff] }
 0x45e   : > { %v1801_v63 = vunpack.c.l.b16 %v1755_v55  ;;  %v1732_v1 = vsel %vm558_vm1, %v1632_v27, 0.0  ;;  %v1633_v6 = vmul.f32 %v4497_v62, %v5129_v49  ;;  %v1606_v9 = vpop.f32.mrb[19].mxu1  ;;  %v4662_v62 = vld [vmem:[#allocation2] sm:$0xff] }
 0x45f   : > { %v1733_v13 = vrot.slane %v1732_v1, 4  ;;  %v1718_v22 = vsel %vm558_vm1, %v1630_v57, 0.0  ;;  %v1631_v46 = vmul.f32 %v1606_v9, %v5129_v49 }
 0x460   : > { %v1822_v14 = vsel %vm1808_vm6, %v1801_v63, %v1800_v60  ;;  %v1719_v16 = vrot.slane %v1718_v22, 4  ;;  %v1739_v17 = vsel %vm558_vm1, %v1633_v6, 0.0  ;;  %v4663_v6 = vld [vmem:[#allocation2 + $0x8] sm:$0xff] }
 0x461   : > { %v1823_v35 = vsel %vm1810_vm7, %v1802_v11, %v1822_v14  ;;  %v1734_v2 = vadd.f32 %v1733_v13, %v1732_v1  ;;  %v1740_v23 = vrot.slane %v1739_v17, 4  ;;  %v1725_v15 = vsel %vm558_vm1, %v1631_v46, 0.0 }
 0x462   : > { %v1720_v18 = vadd.f32 %v1719_v16, %v1718_v22  ;;  %v1824_v24 = vsel %vm1812_vm8, %v1803_v31, %v1823_v35  ;;  %v1726_v25 = vrot.slane %v1725_v15, 4 }
 0x463   : > { %v1735_v59 = vrot.slane %v1734_v2, 2  ;;  %v1741_v21 = vadd.f32 %v1740_v23, %v1739_v17 }
 0x464   : > { %v1721_v30 = vrot.slane %v1720_v18, 2  ;;  %v1727_v49 = vadd.f32 %v1726_v25, %v1725_v15  ;;  %v1946_v15 = vld [vmem:[%s4789_s14] sm:$0xff] }
 0x465   : > { %v1736_v32 = vadd.f32 %v1735_v59, %v1734_v2  ;;  %v1742_v39 = vrot.slane %v1741_v21, 2  ;;  %v1987_v59 = vunpack.c.h.s8.bf16 %v1946_v15 }
 0x466   : > { %v1722_v28 = vadd.f32 %v1721_v30, %v1720_v18  ;;  %v1728_v50 = vrot.slane %v1727_v49, 2  ;;  %v1950_v18 = vld [vmem:[%s4789_s14 + $0x20] sm:$0xff] }
 0x467   : > { %v1737_v12 = vrot.slane %v1736_v32, 1  ;;  %v1743_v34 = vadd.f32 %v1742_v39, %v1741_v21  ;;  %v1994_v25 = vunpack.c.l.s8.bf16 %v1950_v18  ;;  %v1995_v21 = vunpack.c.h.s8.bf16 %v1950_v18  ;;  %v1951_v18 = vld [vmem:[%s4789_s14 + $0x28] sm:$0xff] }
 0x468   : > { %v1723_v47 = vrot.slane %v1722_v28, 1  ;;  %v1729_v8 = vadd.f32 %v1728_v50, %v1727_v49  ;;  %v1958_v50 = vld [vmem:[%s4789_s14 + $0x60] sm:$0xff] }
 0x469   : > { %v1738_v26 = vadd.f32 %v1737_v12, %v1736_v32  ;;  %v1744_v29 = vrot.slane %v1743_v34, 1  ;;  %v4221_v49 = vcombine.high %v1987_v59, %v1995_v21  ;;  %v4220_v39 = vcombine.low %v1987_v59, %v1995_v21 }
 0x46a   : > { %v1724_v20 = vadd.f32 %v1723_v47, %v1722_v28  ;;  %v1730_v38 = vrot.slane %v1729_v8, 1  ;;  %v1954_v28 = vld [vmem:[%s4789_s14 + $0x40] sm:$0xff]  ;;  %v1997_v21 = vunpack.c.h.s8.bf16 %v1951_v18 }
 0x46b   : > { %v1745_v42 = vadd.f32 %v1744_v29, %v1743_v34  ;;  %v1760_v53 = vpack.c.bf16 %v1738_v26, %v1738_v26  ;;  %2545 = vmatprep.subr.bf16.mxu1 %v4221_v49  ;;  %v2002_v12 = vunpack.c.l.s8.bf16 %v1954_v28  ;;  %v2010_v34 = vunpack.c.l.s8.bf16 %v1958_v50 }
 0x46c   : > { %v1758_v43 = vpack.c.bf16 %v1724_v20, %v1724_v20  ;;  %v1731_v61 = vadd.f32 %v1730_v38, %v1729_v8  ;;  %v2003_v47 = vunpack.c.h.s8.bf16 %v1954_v28  ;;  %v2011_v8 = vunpack.c.h.s8.bf16 %v1958_v50  ;;  %2546 = vmatpush1.bf16.msra.mxu1 %v4220_v39 }
 0x46d   : > { %v1761_v52 = vpack.c.bf16 %v1745_v42, %v1745_v42  ;;  %v1806_v10 = vunpack.c.l.b16 %v1760_v53  ;;  %v4235_v26 = vcombine.high %v2002_v12, %v2010_v34  ;;  %v4234_v20 = vcombine.low %v2002_v12, %v2010_v34  ;;  %v1962_v42 = vld [vmem:[%s4789_s14 + $0x80] sm:$0xff] }
 0x46e   : > { %v1804_v36 = vunpack.c.l.b16 %v1758_v43  ;;  %v1759_v4 = vpack.c.bf16 %v1731_v61, %v1731_v61  ;;  %v4237_v29 = vcombine.high %v2003_v47, %v2011_v8  ;;  %v4236_v38 = vcombine.low %v2003_v47, %v2011_v8  ;;  %v1966_v43 = vld [vmem:[%s4789_s14 + $0xa0] sm:$0xff] }
 0x46f   : > { %v1807_v58 = vunpack.c.l.b16 %v1761_v52  ;;  %v2018_v61 = vunpack.c.l.s8.bf16 %v1962_v42  ;;  %v2026_v53 = vunpack.c.l.s8.bf16 %v1966_v43  ;;  %v2027_v52 = vunpack.c.h.s8.bf16 %v1966_v43  ;;  %v1959_v43 = vld [vmem:[%s4789_s14 + $0x68] sm:$0xff] }
 0x470   : > { %v1825_v44 = vsel %vm1814_vm9, %v1804_v36, %v1824_v24  ;;  %v1805_v40 = vunpack.c.l.b16 %v1759_v4  ;;  %v1986_v24 = vunpack.c.l.s8.bf16 %v1946_v15  ;;  %2547 = vmatprep.subr.bf16.mxu1 %v4237_v29  ;;  %v2019_v36 = vunpack.c.h.s8.bf16 %v1962_v42  ;;  %v1947_v15 = vld [vmem:[%s4789_s14 + $0x8] sm:$0xff]  ;;  %v4216_v29 = vld [vmem:[%s4799_s16 + $0x2] ss:$0 sm:$0xff] }
 0x471   : > { %2548 = vmatpush1.bf16.msra.mxu1 %v4236_v38  ;;  %v4251_v4 = vcombine.high %v2018_v61, %v2026_v53  ;;  %v1989_v59 = vunpack.c.h.s8.bf16 %v1947_v15  ;;  %v1955_v38 = vld [vmem:[%s4789_s14 + $0x48] sm:$0xff] }
 0x472   : > { %v1826_v48 = vsel %vm1816_vm10, %v1805_v40, %v1825_v44  ;;  %v4219_v30 = vcombine.high %v1986_v24, %v1994_v25  ;;  %v4218_v32 = vcombine.low %v1986_v24, %v1994_v25  ;;  %v4253_v44 = vcombine.high %v2019_v36, %v2027_v52 }
 0x473   : > { %v1827_v51 = vsel %vm1818_vm11, %v1806_v10, %v1826_v48  ;;  %v4250_v40 = vcombine.low %v2018_v61, %v2026_v53  ;;  %v4252_v10 = vcombine.low %v2019_v36, %v2027_v52  ;;  %v1974_v48 = vld [vmem:[%s4789_s14 + $0xe0] sm:$0xff]  ;;  %v1988_v24 = vunpack.c.l.s8.bf16 %v1947_v15  ;;  %v1963_v36 = vld [vmem:[%s4789_s14 + $0x88] sm:$0xff] }
 0x474   : > { %v1828_v45 = vsel %vm1820_vm12, %v1807_v58, %v1827_v51  ;;  %2502 = vmatprep.subr.bf16.mxu0 %v4219_v30  ;;  %v1970_v58 = vld [vmem:[%s4789_s14 + $0xc0] sm:$0xff]  ;;  %2549 = vmatprep.subr.bf16.mxu1 %v4253_v44  ;;  %v1996_v25 = vunpack.c.l.s8.bf16 %v1951_v18  ;;  %v4225_v49 = vcombine.high %v1989_v59, %v1997_v21  ;;  %v4224_v39 = vcombine.low %v1989_v59, %v1997_v21  ;;  %v1967_v52 = vld [vmem:[%s4789_s14 + $0xa8] sm:$0xff] }
 0x475   : > { %v1829_v54 = vpack.c.b16 %v1828_v45, %v5143_v19  ;;  %v2034_v51 = vunpack.c.l.s8.bf16 %v1970_v58  ;;  %v2042_v45 = vunpack.c.l.s8.bf16 %v1974_v48  ;;  %2550 = vmatpush1.bf16.msra.mxu1 %v4252_v10  ;;  %v2004_v44 = vunpack.c.l.s8.bf16 %v1955_v38 }
 0x476   : > { %v4223_v30 = vcombine.high %v1988_v24, %v1996_v25  ;;  %v2012_v10 = vunpack.c.l.s8.bf16 %v1959_v43 }
 0x477   : > { %4509 = vmatmul.mubr.msk.bf16.vlgmr.msra.gmra.mrb[20].mxu0 %vm558_vm1, %v1829_v54  ;;  %v2035_v54 = vunpack.c.h.s8.bf16 %v1970_v58  ;;  %v2005_v58 = vunpack.c.h.s8.bf16 %v1955_v38  ;;  %v1956_v38 = vld [vmem:[%s4789_s14 + $0x50] sm:$0xff] }
 0x478   : > { %2534 = vmatprep.mubr.bf16.mxu0 %v4678_v37  ;;  %2503 = vmatpush1.bf16.msra.mxu0 %v4218_v32  ;;  %v4222_v32 = vcombine.low %v1988_v24, %v1996_v25 }
 0x479   : > { %2504 = vmatprep.subr.bf16.mxu0 %v4235_v26 }
 0x47c   : > { %2505 = vmatpush1.bf16.msra.mxu0 %v4234_v20 }
 0x47d   : > { %2506 = vmatprep.subr.bf16.mxu0 %v4251_v4  ;;  %v4217_v4 = vld [vmem:[%s4799_s16 + $0x3] ss:$0 sm:$0xff] }
 0x480   : > { %2507 = vmatpush1.bf16.msra.mxu0 %v4250_v40 }
 0x54a   : > { %v1899_v55 = vpop.f32.mrb[20].mxu0 }
 0x54b   : > { %v1900_v27 = vadd.f32 %v4209_v5, %v1899_v55  ;;  %v4510_v56 = vpop.f32.mrb[21].mxu0  ;;  %v1978_v55 = vld [vmem:[%s4789_s14 + $0x100] sm:$0xff] }
 0x54c   : > { %v1902_v57 = vpop.f32.mrb[22].mxu0  ;;  %v4267_v56 = vcombine.high %v2034_v51, %v2042_v45 }
 0x54d   : > { %v5164_v60 = vadd.f32 %v4662_v62, %v1900_v27  ;;  %v1903_v63 = vadd.f32 %v4209_v5, %v1902_v57  ;;  %v4511_v1 = vpop.f32.mrb[23].mxu0  ;;  %v2043_v5 = vunpack.c.h.s8.bf16 %v1974_v48  ;;  %v1982_v27 = vld [vmem:[%s4789_s14 + $0x120] sm:$0x55]  ;;  %v2050_v62 = vunpack.c.l.s8.bf16 %v1978_v55 }
 0x54e   : > { %v4266_v1 = vcombine.low %v2034_v51, %v2042_v45  ;;  %2508 = vmatprep.subr.bf16.mxu0 %v4267_v56  ;;  %v2013_v48 = vunpack.c.h.s8.bf16 %v1959_v43  ;;  %v2020_v51 = vunpack.c.l.s8.bf16 %v1963_v36 }
 0x54f   : > { %v5166_v9 = vadd.f32 %v4663_v6, %v1903_v63  ;;  %v1908_v19 = vsel %vm558_vm1, %v5164_v60, 0.0  ;;  %v4269_v57 = vcombine.high %v2035_v54, %v2043_v5  ;;  %v2058_v63 = vunpack.c.l.s8.bf16 %v1982_v27 }
 0x550   : > { %1909 = vadd.xlane.f32.xlu0 %v1908_v19  ;;  %v4268_v6 = vcombine.low %v2035_v54, %v2043_v5  ;;  %v2051_v19 = vunpack.c.h.s8.bf16 %v1978_v55  ;;  %2509 = vmatpush1.bf16.msra.mxu0 %v4266_v1  ;;  %v2021_v5 = vunpack.c.h.s8.bf16 %v1963_v36  ;;  %v2029_v55 = vunpack.c.h.s8.bf16 %v1967_v52  ;;  %v1979_v1 = vld [vmem:[%s4789_s14 + $0x108] sm:$0xff] }
 0x551   : > { %v1911_v11 = vsel %vm558_vm1, %v5166_v9, 0.0  ;;  %2551 = vmatprep.subr.bf16.mxu1 %v4269_v57  ;;  %v4241_v56 = vcombine.high %v2005_v58, %v2013_v48  ;;  %v1971_v57 = vld [vmem:[%s4789_s14 + $0xc8] sm:$0xff] }
 0x552   : > { %1912 = vadd.xlane.f32.xlu1 %v1911_v11  ;;  %v2059_v11 = vunpack.c.h.s8.bf16 %v1982_v27  ;;  %2552 = vmatpush1.bf16.msra.mxu1 %v4268_v6  ;;  %v1983_v6 = vld [vmem:[%s4789_s14 + $0x128] sm:$0x55]  ;;  %v4256_v24 = vcombine.low %v2021_v5, %v2029_v55 }
 0x553   : > { %v2061_v15 = vunpack.c.h.s8.bf16 %v1983_v6 }
 0x5dd   : > { %v1910_v13 = vpop.xlane.xlu0 %1909 }
 0x5de   : > { %v1914_v22 = vmul.f32 0.013333334, %v1910_v13  ;;  %v4283_v13 = vcombine.high %v2050_v62, %v2058_v63 }
 0x5df   : > { %v1913_v46 = vpop.xlane.xlu1 %1912 }
 0x5e0   : > { %v5173_v31 = vsub.f32 %v5164_v60, %v1914_v22  ;;  %v1915_v14 = vmul.f32 0.013333334, %v1913_v46  ;;  %v4285_v22 = vcombine.high %v2051_v19, %v2059_v11  ;;  %v4282_v46 = vcombine.low %v2050_v62, %v2058_v63  ;;  %v1975_v62 = vld [vmem:[%s4789_s14 + $0xe8] sm:$0xff] }
 0x5e1   : > { %v4238_v63 = vcombine.low %v2004_v44, %v2012_v10 }
 0x5e2   : > { %v5176_v16 = vsub.f32 %v5166_v9, %v1915_v14  ;;  %v1918_v17 = vmul.f32 %v5173_v31, %v5173_v31  ;;  %v4284_v14 = vcombine.low %v2051_v19, %v2059_v11  ;;  %v4240_v19 = vcombine.low %v2005_v58, %v2013_v48 }
 0x5e4   : > { %v1920_v35 = vsel %vm558_vm1, %v1918_v17, 0.0  ;;  %v1919_v2 = vmul.f32 %v5176_v16, %v5176_v16  ;;  %v2458_v17 = vand.u32 %v4283_v13, %v4837_v33  ;;  %v4257_v13 = vcombine.high %v2021_v5, %v2029_v55 }
 0x5e5   : > { %1921 = vadd.xlane.f32.xlu0 %v1920_v35  ;;  %v2464_v35 = vand.u32 %v4285_v22, %v4837_v33  ;;  %v2036_v22 = vunpack.c.l.s8.bf16 %v1971_v57 }
 0x5e6   : > { %v1923_v23 = vsel %vm558_vm1, %v1919_v2, 0.0  ;;  %v2455_v2 = vand.u32 %v4282_v46, %v4837_v33  ;;  %2510 = vmatprep.subr.bf16.mxu0 %v2458_v17  ;;  %v2044_v46 = vunpack.c.l.s8.bf16 %v1975_v62  ;;  %v2045_v17 = vunpack.c.h.s8.bf16 %v1975_v62 }
 0x5e7   : > { %1924 = vadd.xlane.f32.xlu1 %v1923_v23  ;;  %v2461_v23 = vand.u32 %v4284_v14, %v4837_v33  ;;  %2553 = vmatprep.subr.bf16.mxu1 %v2464_v35  ;;  %v2037_v14 = vunpack.c.h.s8.bf16 %v1971_v57  ;;  %v2052_v35 = vunpack.c.l.s8.bf16 %v1979_v1  ;;  %v1976_v57 = vld [vmem:[%s4789_s14 + $0xf0] sm:$0xff] }
 0x5e8   : > { %2511 = vmatpush1.bf16.msra.mxu0 %v2455_v2  ;;  %v2060_v2 = vunpack.c.l.s8.bf16 %v1983_v6  ;;  %v4271_v25 = vcombine.high %v2036_v22, %v2044_v46 }
 0x5e9   : > { %2554 = vmatpush1.bf16.msra.mxu1 %v2461_v23  ;;  %2588 = vmatprep.subr.bf16.mxu0 %v4223_v30  ;;  %v2053_v23 = vunpack.c.h.s8.bf16 %v1979_v1  ;;  %v4273_v59 = vcombine.high %v2037_v14, %v2045_v17  ;;  %v1984_v1 = vld [vmem:[%s4789_s14 + $0x130] sm:$0x55] }
 0x5ea   : > { %2631 = vmatprep.subr.bf16.mxu1 %v4225_v49  ;;  %v4287_v21 = vcombine.high %v2052_v35, %v2060_v2  ;;  %v1948_v49 = vld [vmem:[%s4789_s14 + $0x10] sm:$0xff] }
 0x5eb   : > { %v4289_v30 = vcombine.high %v2053_v23, %v2061_v15 }
 0x672   : > { %v1922_v28 = vpop.xlane.xlu0 %1921 }
 0x673   : > { %v1926_v50 = vmul.f32 0.013333334, %v1922_v28  ;;  %v4272_v28 = vcombine.low %v2037_v14, %v2045_v17  ;;  %v2047_v14 = vunpack.c.h.s8.bf16 %v1976_v57 }
 0x674   : > { %v1925_v12 = vpop.xlane.xlu1 %1924 }
 0x675   : > { %v1928_v34 = vadd.f32 1e-05, %v1926_v50  ;;  %v1927_v47 = vmul.f32 0.013333334, %v1925_v12  ;;  %v4286_v50 = vcombine.low %v2052_v35, %v2060_v2  ;;  %v4288_v12 = vcombine.low %v2053_v23, %v2061_v15 }
 0x676   : > { %v2062_v35 = vunpack.c.l.s8.bf16 %v1984_v1  ;;  %v2063_v23 = vunpack.c.h.s8.bf16 %v1984_v1 }
 0x677   : > { %4658 = vrsqrt.f32 %v1928_v34  ;;  %v1929_v8 = vadd.f32 1e-05, %v1927_v47  ;;  %v1990_v34 = vunpack.c.l.s8.bf16 %v1948_v49  ;;  %v2467_v43 = vand.u32 %v4286_v50, %v4837_v33 }
 0x679   : > { %4660 = vrsqrt.f32 %v1929_v8  ;;  %v1991_v8 = vunpack.c.h.s8.bf16 %v1948_v49  ;;  %v1953_v49 = vld [vmem:[%s4789_s14 + $0x38] sm:$0xff] }
 0x681   : > { %v4659_v26 = vpop.eup %4658 }
 0x682   : > { %v1932_v20 = vmul.f32 %v4659_v26, %v5173_v31  ;;  %v2028_v31 = vunpack.c.l.s8.bf16 %v1967_v52  ;;  %v1964_v52 = vld [vmem:[%s4789_s14 + $0x90] sm:$0xff] }
 0x683   : > { %v4661_v42 = vpop.eup %4660  ;;  %v2022_v48 = vunpack.c.l.s8.bf16 %v1964_v52 }
 0x684   : > { %v1938_v61 = vmul.f32 %v4216_v29, %v1932_v20  ;;  %v1933_v53 = vmul.f32 %v4661_v42, %v5176_v16  ;;  %v4239_v16 = vcombine.high %v2004_v44, %v2012_v10  ;;  %v4255_v11 = vcombine.high %v2020_v51, %v2028_v31  ;;  %v1960_v42 = vld [vmem:[%s4789_s14 + $0x70] sm:$0xff] }
 0x685   : > { %v4254_v18 = vcombine.low %v2020_v51, %v2028_v31  ;;  %v2476_v20 = vand.u32 %v4289_v30, %v4837_v33  ;;  %v2006_v44 = vunpack.c.l.s8.bf16 %v1956_v38  ;;  %v2007_v10 = vunpack.c.h.s8.bf16 %v1956_v38  ;;  %v1949_v30 = vld [vmem:[%s4789_s14 + $0x18] sm:$0xff] }
 0x686   : > { %v1939_v40 = vmul.f32 %v4216_v29, %v1933_v53  ;;  %v1944_v45 = vadd.f32 %v4217_v4, %v1938_v61  ;;  %v2470_v29 = vand.u32 %v4287_v21, %v4837_v33  ;;  %v2473_v61 = vand.u32 %v4288_v12, %v4837_v33  ;;  %v1961_v38 = vld [vmem:[%s4789_s14 + $0x78] sm:$0xff] }
 0x687   : > { %v2015_v58 = vunpack.c.h.s8.bf16 %v1960_v42  ;;  %v2023_v31 = vunpack.c.h.s8.bf16 %v1964_v52  ;;  %v1992_v12 = vunpack.c.l.s8.bf16 %v1949_v30  ;;  %v1969_v52 = vld [vmem:[%s4789_s14 + $0xb8] sm:$0xff] }
 0x688   : > { %v1945_v54 = vadd.f32 %v4217_v4, %v1939_v40  ;;  %v1968_v4 = vld [vmem:[%s4789_s14 + $0xb0] sm:$0xff]  ;;  %v2014_v40 = vunpack.c.l.s8.bf16 %v1960_v42 }
 0x689   : > { %v2030_v51 = vunpack.c.l.s8.bf16 %v1968_v4  ;;  %v4244_v6 = vcombine.low %v2007_v10, %v2015_v58 }
 0x68a   : > { %v5208_v27 = vpack.c.bf16 %v1945_v54, %v1944_v45  ;;  %v2031_v45 = vunpack.c.h.s8.bf16 %v1968_v4  ;;  %v4243_v55 = vcombine.high %v2006_v44, %v2014_v40  ;;  %v4242_v62 = vcombine.low %v2006_v44, %v2014_v40 }
 0x68b   : > { %v4258_v15 = vcombine.low %v2022_v48, %v2030_v51  ;;  %v2016_v44 = vunpack.c.l.s8.bf16 %v1961_v38 }
 0x68c   : > { %4298 = vmatmul.mubr.msk.bf16.vlgmr.msra.gmra.mrb[24].mxu0 %vm558_vm1, %v5208_v27  ;;  %4299 = vmatmul.mubr.msk.bf16.vlgmr.msra.gmra.mrb[20].mxu1 %vm558_vm1, %v5208_v27 }
 0x68d   : > { %2589 = vmatpush1.bf16.msra.mxu0 %v4222_v32  ;;  %2632 = vmatpush1.bf16.msra.mxu1 %v4224_v39  ;;  %v1952_v32 = vld [vmem:[%s4789_s14 + $0x30] sm:$0xff]  ;;  %v4270_v39 = vcombine.low %v2036_v22, %v2044_v46  ;;  %v2046_v22 = vunpack.c.l.s8.bf16 %v1976_v57 }
 0x68e   : > { %2590 = vmatprep.subr.bf16.mxu0 %v4239_v16  ;;  %2633 = vmatprep.subr.bf16.mxu1 %v4241_v56  ;;  %v1998_v47 = vunpack.c.l.s8.bf16 %v1952_v32  ;;  %v1999_v26 = vunpack.c.h.s8.bf16 %v1952_v32  ;;  %v4245_v16 = vcombine.high %v2007_v10, %v2015_v58  ;;  %v1972_v56 = vld [vmem:[%s4789_s14 + $0xd0] sm:$0xff]  ;;  %v2017_v10 = vunpack.c.h.s8.bf16 %v1961_v38 }
 0x68f   : > { %2620 = vmatprep.mubr.bf16.mxu0 %v4678_v37  ;;  %2663 = vmatprep.mubr.bf16.mxu1 %v4678_v37  ;;  %v2039_v46 = vunpack.c.h.s8.bf16 %v1972_v56 }
 0x690   : > { %v4227_v53 = vcombine.high %v1990_v34, %v1998_v47  ;;  %v4229_v36 = vcombine.high %v1991_v8, %v1999_v26  ;;  %v4226_v54 = vcombine.low %v1990_v34, %v1998_v47  ;;  %v4228_v5 = vcombine.low %v1991_v8, %v1999_v26 }
 0x691   : > { %2591 = vmatpush1.bf16.msra.mxu0 %v4238_v63  ;;  %2634 = vmatpush1.bf16.msra.mxu1 %v4240_v19  ;;  %v1980_v63 = vld [vmem:[%s4789_s14 + $0x110] sm:$0xff]  ;;  %v4259_v19 = vcombine.high %v2022_v48, %v2030_v51  ;;  %v2000_v34 = vunpack.c.l.s8.bf16 %v1953_v49  ;;  %v1993_v47 = vunpack.c.h.s8.bf16 %v1949_v30  ;;  %v2001_v8 = vunpack.c.h.s8.bf16 %v1953_v49  ;;  %v5264_v30 = vld [vmem:[%s4794_s27 + $0x20] sm:$0xff] }
 0x692   : > { %2592 = vmatprep.subr.bf16.mxu0 %v4255_v11  ;;  %2635 = vmatprep.subr.bf16.mxu1 %v4257_v13  ;;  %v4261_v11 = vcombine.high %v2023_v31, %v2031_v45  ;;  %v2038_v13 = vunpack.c.l.s8.bf16 %v1972_v56  ;;  %v2054_v17 = vunpack.c.l.s8.bf16 %v1980_v63  ;;  %v2055_v2 = vunpack.c.h.s8.bf16 %v1980_v63  ;;  %v1977_v56 = vld [vmem:[%s4789_s14 + $0xf8] sm:$0xff] }
 0x693   : > { %v2032_v48 = vunpack.c.l.s8.bf16 %v1969_v52  ;;  %v1985_v63 = vld [vmem:[%s4789_s14 + $0x138] sm:$0x55] }
 0x694   : > { %v4293_v21 = vcombine.high %v2055_v2, %v2063_v23  ;;  %v4274_v32 = vcombine.low %v2038_v13, %v2046_v22  ;;  %v4292_v50 = vcombine.low %v2055_v2, %v2063_v23  ;;  %v2065_v2 = vunpack.c.h.s8.bf16 %v1985_v63 }
 0x695   : > { %2593 = vmatpush1.bf16.msra.mxu0 %v4254_v18  ;;  %2636 = vmatpush1.bf16.msra.mxu1 %v4256_v24  ;;  %v4260_v18 = vcombine.low %v2023_v31, %v2031_v45  ;;  %v4275_v24 = vcombine.high %v2038_v13, %v2046_v22  ;;  %v2033_v31 = vunpack.c.h.s8.bf16 %v1969_v52  ;;  %v4230_v45 = vcombine.low %v1992_v12, %v2000_v34 }
 0x696   : > { %2594 = vmatprep.subr.bf16.mxu0 %v4271_v25  ;;  %2637 = vmatprep.subr.bf16.mxu1 %v4273_v59  ;;  %v4277_v25 = vcombine.high %v2039_v46, %v2047_v14  ;;  %v4291_v59 = vcombine.high %v2054_v17, %v2062_v35  ;;  %v2048_v13 = vunpack.c.l.s8.bf16 %v1977_v56 }
 0x698   : > { %v2482_v26 = vand.u32 %v4291_v59, %v4837_v33 }
 0x699   : > { %2595 = vmatpush1.bf16.msra.mxu0 %v4270_v39  ;;  %2638 = vmatpush1.bf16.msra.mxu1 %v4272_v28  ;;  %v4276_v39 = vcombine.low %v2039_v46, %v2047_v14  ;;  %v4290_v28 = vcombine.low %v2054_v17, %v2062_v35  ;;  %v2049_v46 = vunpack.c.h.s8.bf16 %v1977_v56  ;;  %v2064_v17 = vunpack.c.l.s8.bf16 %v1985_v63  ;;  %v3128_v56 = vld [vmem:[%s4794_s27 + $0x10] sm:$0xff] }
 0x69a   : > { %2596 = vmatprep.subr.bf16.mxu0 %v2470_v29  ;;  %2639 = vmatprep.subr.bf16.mxu1 %v2476_v20  ;;  %v2488_v29 = vand.u32 %v4293_v21, %v4837_v33  ;;  %v1957_v20 = vld [vmem:[%s4789_s14 + $0x58] sm:$0xff]  ;;  %v5261_v21 = vld [vmem:[%s4794_s27] sm:$0xff] }
 0x69b   : > { %v2479_v42 = vand.u32 %v4290_v28, %v4837_v33  ;;  %v2008_v4 = vunpack.c.l.s8.bf16 %v1957_v20  ;;  %v2009_v40 = vunpack.c.h.s8.bf16 %v1957_v20  ;;  %v5276_v20 = vld [vmem:[%s4794_s27 + $0x60] sm:$0xff] }
 0x69d   : > { %2597 = vmatpush1.bf16.msra.mxu0 %v2467_v43  ;;  %2640 = vmatpush1.bf16.msra.mxu1 %v2473_v61  ;;  %v2485_v43 = vand.u32 %v4292_v50, %v4837_v33  ;;  %v4231_v61 = vcombine.high %v1992_v12, %v2000_v34  ;;  %v4246_v57 = vcombine.low %v2008_v4, %v2016_v44  ;;  %v3166_v12 = vunpack.c.l.s8.bf16 %v5261_v21 }
 0x69e   : > { %2674 = vmatprep.subr.bf16.mxu0 %v4227_v53  ;;  %2717 = vmatprep.subr.bf16.mxu1 %v4229_v36  ;;  %v4233_v53 = vcombine.high %v1993_v47, %v2001_v8  ;;  %v1965_v36 = vld [vmem:[%s4789_s14 + $0x98] sm:$0xff]  ;;  %v4248_v1 = vcombine.low %v2009_v40, %v2017_v10  ;;  %v3174_v34 = vunpack.c.l.s8.bf16 %v5264_v30 }
 0x69f   : > { %v2024_v58 = vunpack.c.l.s8.bf16 %v1965_v36  ;;  %v2025_v51 = vunpack.c.h.s8.bf16 %v1965_v36 }
 0x6a0   : > { %4300 = vmatmul.mubr.msk.bf16.vlgmr.msra.gmra.mrb[28].mxu0 %vm558_vm1, %v5208_v27  ;;  %4301 = vmatmul.mubr.msk.bf16.vlgmr.msra.gmra.mrb[24].mxu1 %vm558_vm1, %v5208_v27 }
 0x6a1   : > { %2675 = vmatpush1.bf16.msra.mxu0 %v4226_v54  ;;  %2718 = vmatpush1.bf16.msra.mxu1 %v4228_v5  ;;  %v4232_v54 = vcombine.low %v1993_v47, %v2001_v8  ;;  %v4247_v5 = vcombine.high %v2008_v4, %v2016_v44  ;;  %v4262_v23 = vcombine.low %v2024_v58, %v2032_v48 }
 0x6a2   : > { %2676 = vmatprep.subr.bf16.mxu0 %v4243_v55  ;;  %2719 = vmatprep.subr.bf16.mxu1 %v4245_v16  ;;  %v4249_v55 = vcombine.high %v2009_v40, %v2017_v10  ;;  %v1973_v16 = vld [vmem:[%s4789_s14 + $0xd8] sm:$0xff]  ;;  %v5293_v40 = vld [vmem:[%s4794_s27 + $0xc0] sm:$0xff] }
 0x6a3   : > { %2706 = vmatprep.mubr.bf16.mxu0 %v4678_v37  ;;  %2749 = vmatprep.mubr.bf16.mxu1 %v4678_v37  ;;  %v2041_v22 = vunpack.c.h.s8.bf16 %v1973_v16  ;;  %v5296_v10 = vld [vmem:[%s4794_s27 + $0xe0] sm:$0xff] }
 0x6a5   : > { %2677 = vmatpush1.bf16.msra.mxu0 %v4242_v62  ;;  %2720 = vmatpush1.bf16.msra.mxu1 %v4244_v6  ;;  %v1981_v62 = vld [vmem:[%s4789_s14 + $0x118] sm:$0xff]  ;;  %v4263_v6 = vcombine.high %v2024_v58, %v2032_v48  ;;  %v3222_v58 = vunpack.c.l.s8.bf16 %v5296_v10 }
 0x6a6   : > { %2678 = vmatprep.subr.bf16.mxu0 %v4259_v19  ;;  %2721 = vmatprep.subr.bf16.mxu1 %v4261_v11  ;;  %v4265_v19 = vcombine.high %v2025_v51, %v2033_v31  ;;  %v2040_v11 = vunpack.c.l.s8.bf16 %v1973_v16  ;;  %v2056_v14 = vunpack.c.l.s8.bf16 %v1981_v62  ;;  %v2057_v35 = vunpack.c.h.s8.bf16 %v1981_v62 }
 0x6a7   : > { %v3170_v62 = vunpack.c.l.s8.bf16 %v3128_v56 }
 0x6a8   : > { %v4297_v59 = vcombine.high %v2057_v35, %v2065_v2  ;;  %v4278_v49 = vcombine.low %v2040_v11, %v2048_v13 }
 0x6a9   : > { %2679 = vmatpush1.bf16.msra.mxu0 %v4258_v15  ;;  %2722 = vmatpush1.bf16.msra.mxu1 %v4260_v18  ;;  %v4264_v15 = vcombine.low %v2025_v51, %v2033_v31  ;;  %v4279_v18 = vcombine.high %v2040_v11, %v2048_v13  ;;  %v3158_v31 = vld [vmem:[%s4794_s27 + $0x100] sm:$0xff] }
 0x6aa   : > { %2680 = vmatprep.subr.bf16.mxu0 %v4275_v24  ;;  %2723 = vmatprep.subr.bf16.mxu1 %v4277_v25  ;;  %v4281_v24 = vcombine.high %v2041_v22, %v2049_v46  ;;  %v4295_v25 = vcombine.high %v2056_v14, %v2064_v17  ;;  %v2500_v50 = vand.u32 %v4297_v59, %v4837_v33 }
 0x6ac   : > { %v2494_v28 = vand.u32 %v4295_v25, %v4837_v33 }
 0x6ad   : > { %2681 = vmatpush1.bf16.msra.mxu0 %v4274_v32  ;;  %2724 = vmatpush1.bf16.msra.mxu1 %v4276_v39  ;;  %v4280_v32 = vcombine.low %v2041_v22, %v2049_v46  ;;  %v4296_v39 = vcombine.low %v2057_v35, %v2065_v2 }
 0x6ae   : > { %2682 = vmatprep.subr.bf16.mxu0 %v2482_v26  ;;  %2725 = vmatprep.subr.bf16.mxu1 %v2488_v29  ;;  %v4307_v26 = vcombine.high %v3166_v12, %v3174_v34  ;;  %v5273_v29 = vld [vmem:[%s4794_s27 + $0x40] sm:$0xff] }
 0x6af   : > { %v2497_v8 = vand.u32 %v4296_v39, %v4837_v33  ;;  %v3182_v38 = vunpack.c.l.s8.bf16 %v5273_v29 }
 0x6b1   : > { %2683 = vmatpush1.bf16.msra.mxu0 %v2479_v42  ;;  %2726 = vmatpush1.bf16.msra.mxu1 %v2485_v43  ;;  %v3190_v42 = vunpack.c.l.s8.bf16 %v5276_v20 }
 0x6b2   : > { %2760 = vmatprep.subr.bf16.mxu0 %v4231_v61  ;;  %2803 = vmatprep.subr.bf16.mxu1 %v4233_v53  ;;  %v5285_v61 = vld [vmem:[%s4794_s27 + $0x80] sm:$0xff] }
 0x6b3   : > { %v4323_v43 = vcombine.high %v3182_v38, %v3190_v42  ;;  %v5288_v53 = vld [vmem:[%s4794_s27 + $0xa0] sm:$0xff]  ;;  %v3198_v36 = vunpack.c.l.s8.bf16 %v5285_v61  ;;  %v4322_v4 = vcombine.low %v3182_v38, %v3190_v42 }
 0x6b4   : > { %4302 = vmatmul.mubr.msk.bf16.vlgmr.msra.gmra.mrb[32].mxu0 %vm558_vm1, %v5208_v27  ;;  %4303 = vmatmul.mubr.msk.bf16.vlgmr.msra.gmra.mrb[28].mxu1 %vm558_vm1, %v5208_v27  ;;  %v3206_v52 = vunpack.c.l.s8.bf16 %v5288_v53 }
 0x6b5   : > { %2761 = vmatpush1.bf16.msra.mxu0 %v4230_v45  ;;  %2804 = vmatpush1.bf16.msra.mxu1 %v4232_v54  ;;  %v3162_v45 = vld [vmem:[%s4794_s27 + $0x120] sm:$0x55]  ;;  %v3230_v54 = vunpack.c.l.s8.bf16 %v3158_v31 }
 0x6b6   : > { %2762 = vmatprep.subr.bf16.mxu0 %v4247_v5  ;;  %2805 = vmatprep.subr.bf16.mxu1 %v4249_v55  ;;  %v4339_v44 = vcombine.high %v3198_v36, %v3206_v52  ;;  %v4338_v48 = vcombine.low %v3198_v36, %v3206_v52  ;;  %v3238_v5 = vunpack.c.l.s8.bf16 %v3162_v45  ;;  %v3239_v38 = vunpack.c.h.s8.bf16 %v3162_v45 }
 0x6b7   : > { %2792 = vmatprep.mubr.bf16.mxu0 %v4678_v37  ;;  %2835 = vmatprep.mubr.bf16.mxu1 %v4678_v37  ;;  %v4294_v37 = vcombine.low %v2056_v14, %v2064_v17  ;;  %v3136_v14 = vld [vmem:[%s4794_s27 + $0x50] sm:$0xff]  ;;  %v3171_v52 = vunpack.c.h.s8.bf16 %v3128_v56 }
 0x6b8   : > { %v4371_v16 = vcombine.high %v3230_v54, %v3238_v5  ;;  %v4370_v11 = vcombine.low %v3230_v54, %v3238_v5  ;;  %v3140_v17 = vld [vmem:[%s4794_s27 + $0x70] sm:$0xff]  ;;  %v3186_v35 = vunpack.c.l.s8.bf16 %v3136_v14 }
 0x6b9   : > { %2763 = vmatpush1.bf16.msra.mxu0 %v4246_v57  ;;  %2806 = vmatpush1.bf16.msra.mxu1 %v4248_v1  ;;  %v2491_v47 = vand.u32 %v4294_v37, %v4837_v33  ;;  %v4306_v33 = vcombine.low %v3166_v12, %v3174_v34  ;;  %v3132_v57 = vld [vmem:[%s4794_s27 + $0x30] sm:$0xff]  ;;  %v3167_v1 = vunpack.c.h.s8.bf16 %v5261_v21  ;;  %v3194_v2 = vunpack.c.l.s8.bf16 %v3140_v17 }
 0x6ba   : > { %2764 = vmatprep.subr.bf16.mxu0 %v4263_v6  ;;  %2807 = vmatprep.subr.bf16.mxu1 %v4265_v19  ;;  %v3178_v63 = vunpack.c.l.s8.bf16 %v3132_v57  ;;  %v3175_v6 = vunpack.c.h.s8.bf16 %v5264_v30  ;;  %v3160_v12 = vld [vmem:[%s4794_s27 + $0x110] sm:$0xff] }
 0x6bb   : > { %v3164_v34 = vld [vmem:[%s4794_s27 + $0x130] sm:$0x55] }
 0x6bc   : > { %v4315_v19 = vcombine.high %v3170_v62, %v3178_v63  ;;  %v4314_v13 = vcombine.low %v3170_v62, %v3178_v63  ;;  %v4309_v22 = vcombine.high %v3167_v1, %v3175_v6  ;;  %v5306_v46 = vcombine.low %v3167_v1, %v3175_v6 }
 0x6bd   : > { %2765 = vmatpush1.bf16.msra.mxu0 %v4262_v23  ;;  %2808 = vmatpush1.bf16.msra.mxu1 %v4264_v15  ;;  %v4331_v23 = vcombine.high %v3186_v35, %v3194_v2  ;;  %v4330_v15 = vcombine.low %v3186_v35, %v3194_v2  ;;  %v3235_v63 = vunpack.c.h.s8.bf16 %v3160_v12  ;;  %v3243_v1 = vunpack.c.h.s8.bf16 %v3164_v34 }
 0x6be   : > { %2766 = vmatprep.subr.bf16.mxu0 %v4279_v18  ;;  %2809 = vmatprep.subr.bf16.mxu1 %v4281_v24  ;;  %v3144_v18 = vld [vmem:[%s4794_s27 + $0x90] sm:$0xff] }
 0x6bf   : > { %v3148_v24 = vld [vmem:[%s4794_s27 + $0xb0] sm:$0xff]  ;;  %v3202_v25 = vunpack.c.l.s8.bf16 %v3144_v18  ;;  %v3203_v45 = vunpack.c.h.s8.bf16 %v3144_v18  ;;  %v5334_v6 = vcombine.high %v3235_v63, %v3243_v1 }
 0x6c0   : > { %v3210_v59 = vunpack.c.l.s8.bf16 %v3148_v24  ;;  %v3211_v54 = vunpack.c.h.s8.bf16 %v3148_v24 }
 0x6c1   : > { %2767 = vmatpush1.bf16.msra.mxu0 %v4278_v49  ;;  %2810 = vmatpush1.bf16.msra.mxu1 %v4280_v32  ;;  %v3152_v49 = vld [vmem:[%s4794_s27 + $0xd0] sm:$0xff] }
 0x6c2   : > { %2768 = vmatprep.subr.bf16.mxu0 %v2494_v28  ;;  %2811 = vmatprep.subr.bf16.mxu1 %v2500_v50  ;;  %v4347_v21 = vcombine.high %v3202_v25, %v3210_v59  ;;  %v4346_v30 = vcombine.low %v3202_v25, %v3210_v59  ;;  %v3156_v32 = vld [vmem:[%s4794_s27 + $0xf0] sm:$0xff]  ;;  %v3218_v37 = vunpack.c.l.s8.bf16 %v3152_v49  ;;  %v5326_v5 = vcombine.high %v3203_v45, %v3211_v54 }
 0x6c3   : > { %v3226_v39 = vunpack.c.l.s8.bf16 %v3156_v32  ;;  %v3227_v56 = vunpack.c.h.s8.bf16 %v3156_v32 }
 0x6c5   : > { %2769 = vmatpush1.bf16.msra.mxu0 %v2491_v47  ;;  %2812 = vmatpush1.bf16.msra.mxu1 %v2497_v8  ;;  %v4363_v28 = vcombine.high %v3218_v37, %v3226_v39  ;;  %v4362_v50 = vcombine.low %v3218_v37, %v3226_v39  ;;  %v3234_v47 = vunpack.c.l.s8.bf16 %v3160_v12  ;;  %v3242_v8 = vunpack.c.l.s8.bf16 %v3164_v34 }
 0x6c6   : > { %3646 = vmatprep.subr.bf16.mxu1 %v4307_v26  ;;  %3810 = vmatprep.subr.bf16.mxu0 %v4315_v19  ;;  %v3231_v26 = vunpack.c.h.s8.bf16 %v3158_v31  ;;  %v5336_v19 = vcombine.low %v3235_v63, %v3243_v1 }
 0x6c7   : > { %v4379_v42 = vcombine.high %v3234_v47, %v3242_v8 }
 0x6c8   : > { %4304 = vmatmul.mubr.msk.bf16.vlgmr.msra.gmra.mrb[36].mxu0 %vm558_vm1, %v5208_v27  ;;  %4305 = vmatmul.mubr.msk.bf16.vlgmr.msra.gmra.mrb[32].mxu1 %vm558_vm1, %v5208_v27  ;;  %v3214_v27 = vunpack.c.l.s8.bf16 %v5293_v40  ;;  %v5318_v36 = vcombine.low %v3231_v26, %v3239_v38 }
 0x6ca   : > { %v4355_v51 = vcombine.high %v3214_v27, %v3222_v58  ;;  %v4354_v55 = vcombine.low %v3214_v27, %v3222_v58  ;;  %v3187_v58 = vunpack.c.h.s8.bf16 %v3136_v14 }
 0x6ce   : > { %3647 = vmatpush1.bf16.xpose.msra.mxu1 %v4306_v33  ;;  %3811 = vmatpush1.bf16.xpose.msra.mxu0 %v4314_v13  ;;  %v5316_v33 = vcombine.high %v3231_v26, %v3239_v38  ;;  %v5342_v13 = vsub.s32 3, %v4890_v0 }
 0x6cf   : > { %3648 = vmatprep.subr.bf16.mxu1 %v4323_v43  ;;  %3812 = vmatprep.subr.bf16.mxu0 %v4331_v23  ;;  %v4378_v43 = vcombine.low %v3234_v47, %v3242_v8 }
 0x6d6   : > { %3649 = vmatpush1.bf16.xpose.msra.mxu1 %v4322_v4  ;;  %3813 = vmatpush1.bf16.xpose.msra.mxu0 %v4330_v15  ;;  %v3179_v4 = vunpack.c.h.s8.bf16 %v3132_v57 }
 0x6d7   : > { %3650 = vmatprep.subr.bf16.mxu1 %v4339_v44  ;;  %3814 = vmatprep.subr.bf16.mxu0 %v4347_v21 }
 0x6d8   : > { %v4317_v44 = vcombine.high %v3171_v52, %v3179_v4  ;;  %v5320_v27 = vcombine.low %v3171_v52, %v3179_v4 }
 0x6de   : > { %3651 = vmatpush1.bf16.xpose.msra.mxu1 %v4338_v48  ;;  %3815 = vmatpush1.bf16.xpose.msra.mxu0 %v4346_v30  ;;  %v3195_v48 = vunpack.c.h.s8.bf16 %v3140_v17 }
 0x6df   : > { %3652 = vmatprep.subr.bf16.mxu1 %v4355_v51  ;;  %3816 = vmatprep.subr.bf16.mxu0 %v4363_v28 }
 0x6e0   : > { %v5322_v51 = vcombine.high %v3187_v58, %v3195_v48  ;;  %v5324_v31 = vcombine.low %v3187_v58, %v3195_v48 }
 0x6e6   : > { %3653 = vmatpush1.bf16.xpose.msra.mxu1 %v4354_v55  ;;  %3817 = vmatpush1.bf16.xpose.msra.mxu0 %v4362_v50  ;;  %v5328_v55 = vcombine.low %v3203_v45, %v3211_v54  ;;  %v3183_v54 = vunpack.c.h.s8.bf16 %v5273_v29  ;;  %v5368_v29 = vsub.s32 4, %v4890_v0 }
 0x6e7   : > { %3654 = vmatprep.subr.bf16.mxu1 %v4371_v16  ;;  %3818 = vmatprep.subr.bf16.mxu0 %v4379_v42  ;;  %v3219_v16 = vunpack.c.h.s8.bf16 %v3152_v49 }
 0x6e9   : > { %v5330_v57 = vcombine.high %v3219_v16, %v3227_v56  ;;  %v5332_v62 = vcombine.low %v3219_v16, %v3227_v56  ;;  %v3191_v16 = vunpack.c.h.s8.bf16 %v5276_v20  ;;  %v5371_v20 = vsub.s32 6, %v4890_v0 }
 0x6ee   : > { %3655 = vmatpush1.bf16.xpose.msra.mxu1 %v4370_v11  ;;  %3819 = vmatpush1.bf16.xpose.msra.mxu0 %v4378_v43  ;;  %v5339_v11 = vld [vmem:[%s4764_s30] sm:$0xff] }
 0x6ef   : > { %3687 = vmatprep.subr.bf16.mxu1 %v4309_v22  ;;  %3851 = vmatprep.subr.bf16.mxu0 %v4317_v44  ;;  %v5345_v22 = vld [vmem:[%s4784_s6] sm:$0xff]  ;;  %v2853_v14 = vrot.slane %v5339_v11, %v4893_v3  ;;  %v2861_v17 = vrot.slane %v5339_v11, %v5108_v41  ;;  %v2857_v35 = vrot.slane %v5339_v11, %v4901_v7 }
 0x6f0   : > { %v2865_v2 = vrot.slane %v5339_v11, %v5342_v13  ;;  %v2969_v23 = vrot.slane %v5345_v22, %v4893_v3  ;;  %v2977_v15 = vrot.slane %v5345_v22, %v5108_v41  ;;  %v2973_v25 = vrot.slane %v5345_v22, %v4901_v7 }
 0x6f1   : > { %v2981_v59 = vrot.slane %v5345_v22, %v5342_v13 }
 0x75f   : > { %v2536_v18 = vpop.f32.mrb[24].mxu0  ;;  %v2579_v24 = vpop.f32.mrb[20].mxu1 }
 0x760   : > { %v2930_v21 = vmul.f32 %v2853_v14, %v2536_v18  ;;  %v2932_v30 = vmul.f32 %v2861_v17, %v2579_v24  ;;  %v2538_v49 = vpop.f32.mrb[25].mxu0  ;;  %v2581_v32 = vpop.f32.mrb[21].mxu1 }
 0x761   : > { %v2931_v37 = vmul.f32 %v2857_v35, %v2538_v49  ;;  %v2933_v39 = vmul.f32 %v2865_v2, %v2581_v32  ;;  %v2540_v28 = vpop.f32.mrb[26].mxu0  ;;  %v2583_v50 = vpop.f32.mrb[22].mxu1  ;;  %v3207_v32 = vunpack.c.h.s8.bf16 %v5288_v53 }
 0x762   : > { %v3046_v12 = vadd.f32 %v2969_v23, %v2930_v21  ;;  %v3048_v34 = vadd.f32 %v2977_v15, %v2932_v30  ;;  %v2946_v47 = vmul.f32 %v2853_v14, %v2540_v28  ;;  %v2948_v8 = vmul.f32 %v2861_v17, %v2583_v50  ;;  %v2542_v26 = vpop.f32.mrb[27].mxu0  ;;  %v2585_v38 = vpop.f32.mrb[23].mxu1 }
 0x763   : > { %v3047_v42 = vadd.f32 %v2973_v25, %v2931_v37  ;;  %v3049_v43 = vadd.f32 %v2981_v59, %v2933_v39  ;;  %v2947_v52 = vmul.f32 %v2857_v35, %v2542_v26  ;;  %v2949_v4 = vmul.f32 %v2865_v2, %v2585_v38 }
 0x764   : > { %v3062_v44 = vadd.f32 %v2969_v23, %v2946_v47  ;;  %v3064_v58 = vadd.f32 %v2977_v15, %v2948_v8  ;;  %v3078_v56 = vmax.f32 %v3046_v12, 0.0  ;;  %v3080_v63 = vmax.f32 %v3048_v34, 0.0 }
 0x765   : > { %v3063_v48 = vadd.f32 %v2973_v25, %v2947_v52  ;;  %v3065_v45 = vadd.f32 %v2981_v59, %v2949_v4  ;;  %v3079_v14 = vmax.f32 %v3047_v42, 0.0  ;;  %v3081_v17 = vmax.f32 %v3049_v43, 0.0 }
 0x766   : > { %v3094_v1 = vmax.f32 %v3062_v44, 0.0  ;;  %v3096_v18 = vmax.f32 %v3064_v58, 0.0  ;;  %v4325_v23 = vcombine.high %v3183_v54, %v3191_v16  ;;  %v5375_v15 = vsub.s32 5, %v4890_v0 }
 0x767   : > { %v3095_v24 = vmax.f32 %v3063_v48, 0.0  ;;  %v3097_v21 = vmax.f32 %v3065_v45, 0.0  ;;  %v5378_v25 = vsub.s32 7, %v4890_v0  ;;  %v3199_v59 = vunpack.c.h.s8.bf16 %v5285_v61 }
 0x768   : > { %v3110_v30 = vpack.c.bf16 %v3094_v1, %v3078_v56  ;;  %v5365_v49 = vpack.c.bf16 %v3096_v18, %v3080_v63  ;;  %v2869_v37 = vrot.slane %v5339_v11, %v5368_v29  ;;  %v2877_v39 = vrot.slane %v5339_v11, %v5371_v20 }
 0x769   : > { %v3111_v35 = vpack.c.bf16 %v3095_v24, %v3079_v14  ;;  %v3113_v2 = vpack.c.bf16 %v3097_v21, %v3081_v17  ;;  %v2881_v28 = vrot.slane %v5339_v11, %v5378_v25  ;;  %v4324_v50 = vcombine.low %v3183_v54, %v3191_v16 }
 0x76a   : > { %v2985_v0 = vrot.slane %v5345_v22, %v5368_v29  ;;  %v2993_v61 = vrot.slane %v5345_v22, %v5371_v20  ;;  %v4341_v53 = vcombine.high %v3199_v59, %v3207_v32  ;;  %v2989_v47 = vrot.slane %v5345_v22, %v5375_v15 }
 0x76b   : > { %3678 = vmatprep.mubr.bf16.mxu1 %v3111_v35  ;;  %v2997_v8 = vrot.slane %v5345_v22, %v5378_v25  ;;  %v3215_v58 = vunpack.c.h.s8.bf16 %v5293_v40  ;;  %v3223_v48 = vunpack.c.h.s8.bf16 %v5296_v10 }
 0x76c   : > { %3679 = vmatmul.mubr.bf16.vlgmr.msra.gmra.mrb[36].mxu1 %v3110_v30 }
 0x76d   : > { %3688 = vmatpush1.bf16.xpose.msra.mxu1 %v5306_v46  ;;  %3719 = vmatprep.mubr.bf16.mxu1 %v3113_v2  ;;  %v2873_v46 = vrot.slane %v5339_v11, %v5375_v15  ;;  %v4340_v2 = vcombine.low %v3199_v59, %v3207_v32  ;;  %v4356_v32 = vcombine.low %v3215_v58, %v3223_v48 }
 0x76e   : > { %3689 = vmatprep.subr.bf16.mxu1 %v4325_v23  ;;  %v4357_v23 = vcombine.high %v3215_v58, %v3223_v48 }
 0x773   : > { %v2622_v12 = vpop.f32.mrb[28].mxu0  ;;  %v2665_v34 = vpop.f32.mrb[24].mxu1 }
 0x774   : > { %v2934_v26 = vmul.f32 %v2869_v37, %v2622_v12  ;;  %v2936_v38 = vmul.f32 %v2877_v39, %v2665_v34  ;;  %v2624_v42 = vpop.f32.mrb[29].mxu0  ;;  %v2667_v11 = vpop.f32.mrb[25].mxu1 }
 0x775   : > { %v2935_v43 = vmul.f32 %v2873_v46, %v2624_v42  ;;  %v2937_v52 = vmul.f32 %v2881_v28, %v2667_v11  ;;  %v2626_v4 = vpop.f32.mrb[30].mxu0  ;;  %v2669_v44 = vpop.f32.mrb[26].mxu1  ;;  %3690 = vmatpush1.bf16.xpose.msra.mxu1 %v4324_v50 }
 0x776   : > { %v3050_v45 = vadd.f32 %v2985_v0, %v2934_v26  ;;  %v3052_v54 = vadd.f32 %v2993_v61, %v2936_v38  ;;  %v2950_v16 = vmul.f32 %v2869_v37, %v2626_v4  ;;  %v2952_v56 = vmul.f32 %v2877_v39, %v2669_v44  ;;  %v2628_v63 = vpop.f32.mrb[31].mxu0  ;;  %v2671_v1 = vpop.f32.mrb[27].mxu1  ;;  %3691 = vmatprep.subr.bf16.mxu1 %v4341_v53  ;;  %v5418_v26 = vld [vmem:[%s4784_s6 + $0x8] sm:$0xff] }
 0x777   : > { %v3051_v22 = vadd.f32 %v2989_v47, %v2935_v43  ;;  %v3053_v18 = vadd.f32 %v2997_v8, %v2937_v52  ;;  %v2951_v14 = vmul.f32 %v2873_v46, %v2628_v63  ;;  %v2953_v17 = vmul.f32 %v2881_v28, %v2671_v1 }
 0x778   : > { %v3066_v24 = vadd.f32 %v2985_v0, %v2950_v16  ;;  %v3068_v21 = vadd.f32 %v2993_v61, %v2952_v56  ;;  %v3082_v40 = vmax.f32 %v3050_v45, 0.0  ;;  %v3084_v10 = vmax.f32 %v3052_v54, 0.0  ;;  %v5409_v61 = vld [vmem:[%s4764_s30 + $0x8] sm:$0xff] }
 0x779   : > { %v3067_v30 = vadd.f32 %v2989_v47, %v2951_v14  ;;  %v3069_v35 = vadd.f32 %v2997_v8, %v2953_v17  ;;  %v3083_v50 = vmax.f32 %v3051_v22, 0.0  ;;  %v3085_v53 = vmax.f32 %v3053_v18, 0.0  ;;  %v5412_v47 = vld [vmem:[%s4794_s27 + $0x8] sm:$0xff] }
 0x77a   : > { %v3098_v37 = vmax.f32 %v3066_v24, 0.0  ;;  %v3100_v39 = vmax.f32 %v3068_v21, 0.0  ;;  %v5415_v8 = vld [vmem:[%s4794_s27 + $0x28] sm:$0xff]  ;;  %v2885_v38 = vrot.slane %v5409_v61, %v4893_v3  ;;  %v2893_v42 = vrot.slane %v5409_v61, %v5108_v41 }
 0x77b   : > { %v3099_v12 = vmax.f32 %v3067_v30, 0.0  ;;  %v3101_v34 = vmax.f32 %v3069_v35, 0.0  ;;  %v2889_v11 = vrot.slane %v5409_v61, %v4901_v7  ;;  %v2897_v43 = vrot.slane %v5409_v61, %v5342_v13 }
 0x77c   : > { %v5400_v46 = vpack.c.bf16 %v3098_v37, %v3082_v40  ;;  %v5402_v28 = vpack.c.bf16 %v3100_v39, %v3084_v10  ;;  %v3168_v52 = vunpack.c.l.s8.bf16 %v5412_v47  ;;  %v3176_v4 = vunpack.c.l.s8.bf16 %v5415_v8 }
 0x77d   : > { %3692 = vmatpush1.bf16.xpose.msra.mxu1 %v4340_v2  ;;  %v5404_v0 = vpack.c.bf16 %v3099_v12, %v3083_v50  ;;  %v5406_v59 = vpack.c.bf16 %v3101_v34, %v3085_v53  ;;  %v3001_v44 = vrot.slane %v5418_v26, %v4893_v3  ;;  %v3009_v58 = vrot.slane %v5418_v26, %v5108_v41  ;;  %v5440_v2 = vld [vmem:[%s4794_s27 + $0x48] sm:$0xff] }
 0x77e   : > { %3693 = vmatprep.subr.bf16.mxu1 %v4357_v23  ;;  %v3005_v54 = vrot.slane %v5418_v26, %v4901_v7  ;;  %v3013_v16 = vrot.slane %v5418_v26, %v5342_v13  ;;  %v4311_v17 = vcombine.high %v3168_v52, %v3176_v4  ;;  %v5443_v13 = vld [vmem:[%s4794_s27 + $0x68] sm:$0xff]  ;;  %v3184_v34 = vunpack.c.l.s8.bf16 %v5440_v2 }
 0x785   : > { %3694 = vmatpush1.bf16.xpose.msra.mxu1 %v4356_v32  ;;  %v3192_v32 = vunpack.c.l.s8.bf16 %v5443_v13 }
 0x786   : > { %3695 = vmatprep.subr.bf16.mxu1 %v5316_v33 }
 0x787   : > { %v2708_v48 = vpop.f32.mrb[32].mxu0  ;;  %v2751_v45 = vpop.f32.mrb[28].mxu1 }
 0x788   : > { %v2938_v56 = vmul.f32 %v2885_v38, %v2708_v48  ;;  %v2940_v63 = vmul.f32 %v2893_v42, %v2751_v45  ;;  %v2710_v1 = vpop.f32.mrb[33].mxu0  ;;  %v2753_v22 = vpop.f32.mrb[29].mxu1 }
 0x789   : > { %v2939_v3 = vmul.f32 %v2889_v11, %v2710_v1  ;;  %v2941_v18 = vmul.f32 %v2897_v43, %v2753_v22  ;;  %v2712_v14 = vpop.f32.mrb[34].mxu0  ;;  %v2755_v41 = vpop.f32.mrb[30].mxu1  ;;  %v4327_v1 = vcombine.high %v3184_v34, %v3192_v32  ;;  %v5452_v22 = vld [vmem:[%s4794_s27 + $0x88] sm:$0xff] }
 0x78a   : > { %v3054_v33 = vadd.f32 %v3001_v44, %v2938_v56  ;;  %v3056_v24 = vadd.f32 %v3009_v58, %v2940_v63  ;;  %v2954_v21 = vmul.f32 %v2885_v38, %v2712_v14  ;;  %v2956_v30 = vmul.f32 %v2893_v42, %v2755_v41  ;;  %v2714_v35 = vpop.f32.mrb[35].mxu0  ;;  %v2757_v7 = vpop.f32.mrb[31].mxu1 }
 0x78b   : > { %v3055_v23 = vadd.f32 %v3005_v54, %v2939_v3  ;;  %v3057_v40 = vadd.f32 %v3013_v16, %v2941_v18  ;;  %v2955_v10 = vmul.f32 %v2889_v11, %v2714_v35  ;;  %v2957_v37 = vmul.f32 %v2897_v43, %v2757_v7  ;;  %v5455_v3 = vld [vmem:[%s4794_s27 + $0xa8] sm:$0xff] }
 0x78c   : > { %v3070_v39 = vadd.f32 %v3001_v44, %v2954_v21  ;;  %v3072_v50 = vadd.f32 %v3009_v58, %v2956_v30  ;;  %v3086_v38 = vmax.f32 %v3054_v33, 0.0  ;;  %v3088_v42 = vmax.f32 %v3056_v24, 0.0  ;;  %v5478_v33 = vld [vmem:[%s4794_s27 + $0xe8] sm:$0xff] }
 0x78d   : > { %v3071_v53 = vadd.f32 %v3005_v54, %v2955_v10  ;;  %v3073_v12 = vadd.f32 %v3013_v16, %v2957_v37  ;;  %3696 = vmatpush1.bf16.xpose.msra.mxu1 %v5318_v36  ;;  %v3087_v56 = vmax.f32 %v3055_v23, 0.0  ;;  %v3089_v11 = vmax.f32 %v3057_v40, 0.0 }
 0x78e   : > { %v3102_v48 = vmax.f32 %v3070_v39, 0.0  ;;  %v3104_v45 = vmax.f32 %v3072_v50, 0.0  ;;  %3728 = vmatprep.subr.bf16.mxu1 %v4311_v17  ;;  %v4310_v36 = vcombine.low %v3168_v52, %v3176_v4  ;;  %v3200_v52 = vunpack.c.l.s8.bf16 %v5452_v22  ;;  %v5475_v17 = vld [vmem:[%s4794_s27 + $0xc8] sm:$0xff] }
 0x78f   : > { %v3103_v43 = vmax.f32 %v3071_v53, 0.0  ;;  %v3105_v44 = vmax.f32 %v3073_v12, 0.0  ;;  %v2901_v4 = vrot.slane %v5409_v61, %v5368_v29  ;;  %v2909_v18 = vrot.slane %v5409_v61, %v5371_v20 }
 0x790   : > { %v3118_v58 = vpack.c.bf16 %v3102_v48, %v3086_v38  ;;  %v5448_v54 = vpack.c.bf16 %v3104_v45, %v3088_v42  ;;  %v4326_v14 = vcombine.low %v3184_v34, %v3192_v32  ;;  %v3025_v41 = vrot.slane %v5418_v26, %v5371_v20 }
 0x791   : > { %v3119_v16 = vpack.c.bf16 %v3103_v43, %v3087_v56  ;;  %v3121_v63 = vpack.c.bf16 %v3105_v44, %v3089_v11  ;;  %v3021_v30 = vrot.slane %v5418_v26, %v5375_v15  ;;  %v3029_v35 = vrot.slane %v5418_v26, %v5378_v25 }
 0x792   : > { %v3216_v50 = vunpack.c.l.s8.bf16 %v5475_v17  ;;  %v3224_v53 = vunpack.c.l.s8.bf16 %v5478_v33 }
 0x793   : > { %3842 = vmatprep.mubr.bf16.mxu0 %v3119_v16 }
 0x794   : > { %3720 = vmatmul.mubr.bf16.vlgmr.msra.gmra.mrb[36].mxu1 %v5365_v49  ;;  %3843 = vmatmul.mubr.bf16.vlgmr.msra.gmra.mrb[40].mxu0 %v3118_v58  ;;  %v3208_v49 = vunpack.c.l.s8.bf16 %v5455_v3  ;;  %v4359_v58 = vcombine.high %v3216_v50, %v3224_v53 }
 0x795   : > { %3852 = vmatpush1.bf16.xpose.msra.mxu0 %v5320_v27  ;;  %3729 = vmatpush1.bf16.xpose.msra.mxu1 %v4310_v36  ;;  %v2905_v27 = vrot.slane %v5409_v61, %v5375_v15 }
 0x796   : > { %3760 = vmatprep.mubr.bf16.mxu1 %v5404_v0  ;;  %3883 = vmatprep.mubr.bf16.mxu0 %v3121_v63  ;;  %v2913_v0 = vrot.slane %v5409_v61, %v5378_v25  ;;  %v4343_v61 = vcombine.high %v3200_v52, %v3208_v49  ;;  %v4342_v44 = vcombine.low %v3200_v52, %v3208_v49 }
 0x797   : > { %3853 = vmatprep.subr.bf16.mxu0 %v5322_v51  ;;  %3730 = vmatprep.subr.bf16.mxu1 %v4327_v1  ;;  %v3017_v51 = vrot.slane %v5418_v26, %v5368_v29 }
 0x79b   : > { %v2794_v24 = vpop.f32.mrb[36].mxu0  ;;  %v2837_v21 = vpop.f32.mrb[32].mxu1 }
 0x79c   : > { %v2942_v7 = vmul.f32 %v2901_v4, %v2794_v24  ;;  %v2944_v23 = vmul.f32 %v2909_v18, %v2837_v21  ;;  %v2796_v40 = vpop.f32.mrb[37].mxu0  ;;  %v2839_v29 = vpop.f32.mrb[33].mxu1 }
 0x79d   : > { %v2943_v10 = vmul.f32 %v2905_v27, %v2796_v40  ;;  %v2945_v37 = vmul.f32 %v2913_v0, %v2839_v29  ;;  %3854 = vmatpush1.bf16.xpose.msra.mxu0 %v5324_v31  ;;  %v2798_v20 = vpop.f32.mrb[38].mxu0  ;;  %v2841_v39 = vpop.f32.mrb[34].mxu1  ;;  %3731 = vmatpush1.bf16.xpose.msra.mxu1 %v4326_v14  ;;  %v3177_v40 = vunpack.c.h.s8.bf16 %v5415_v8  ;;  %v3185_v8 = vunpack.c.h.s8.bf16 %v5440_v2 }
 0x79e   : > { %v3058_v15 = vadd.f32 %v3017_v51, %v2942_v7  ;;  %v3060_v12 = vadd.f32 %v3025_v41, %v2944_v23  ;;  %v2958_v34 = vmul.f32 %v2901_v4, %v2798_v20  ;;  %v2960_v25 = vmul.f32 %v2909_v18, %v2841_v39  ;;  %v2800_v26 = vpop.f32.mrb[39].mxu0  ;;  %v2843_v32 = vpop.f32.mrb[35].mxu1  ;;  %3855 = vmatprep.subr.bf16.mxu0 %v5326_v5  ;;  %v5489_v4 = vld [vmem:[%s4794_s27 + $0x108] sm:$0xff]  ;;  %v5508_v7 = vld [vmem:[%s4794_s27 + $0x38] sm:$0xff] }
 0x79f   : > { %v3059_v38 = vadd.f32 %v3021_v30, %v2943_v10  ;;  %v3061_v42 = vadd.f32 %v3029_v35, %v2945_v37  ;;  %v2959_v48 = vmul.f32 %v2905_v27, %v2800_v26  ;;  %v2961_v31 = vmul.f32 %v2913_v0, %v2843_v32  ;;  %3732 = vmatprep.subr.bf16.mxu1 %v4343_v61  ;;  %v5492_v0 = vld [vmem:[%s4794_s27 + $0x128] sm:$0x55]  ;;  %v5505_v61 = vld [vmem:[%s4794_s27 + $0x18] sm:$0xff] }
 0x7a0   : > { %v3074_v45 = vadd.f32 %v3017_v51, %v2958_v34  ;;  %v3076_v56 = vadd.f32 %v3025_v41, %v2960_v25  ;;  %v3090_v16 = vmax.f32 %v3058_v15, 0.0  ;;  %v3092_v36 = vmax.f32 %v3060_v12, 0.0  ;;  %v5517_v20 = vld [vmem:[%s4794_s27 + $0x58] sm:$0xff] }
 0x7a1   : > { %v3075_v11 = vadd.f32 %v3021_v30, %v2959_v48  ;;  %v3077_v43 = vadd.f32 %v3029_v35, %v2961_v31  ;;  %v3091_v5 = vmax.f32 %v3059_v38, 0.0  ;;  %v3093_v18 = vmax.f32 %v3061_v42, 0.0  ;;  %v5528_v34 = vld [vmem:[%s4794_s27 + $0x98] sm:$0xff] }
 0x7a2   : > { %v3106_v63 = vmax.f32 %v3074_v45, 0.0  ;;  %v3108_v1 = vmax.f32 %v3076_v56, 0.0  ;;  %v3232_v24 = vunpack.c.l.s8.bf16 %v5489_v4  ;;  %v3240_v21 = vunpack.c.l.s8.bf16 %v5492_v0  ;;  %v5531_v25 = vld [vmem:[%s4794_s27 + $0xb8] sm:$0xff] }
 0x7a3   : > { %v3107_v14 = vmax.f32 %v3075_v11, 0.0  ;;  %v3109_v27 = vmax.f32 %v3077_v43, 0.0  ;;  %v4358_v30 = vcombine.low %v3216_v50, %v3224_v53  ;;  %v3169_v23 = vunpack.c.h.s8.bf16 %v5412_v47  ;;  %v5541_v42 = vld [vmem:[%s4794_s27 + $0xd8] sm:$0xff] }
 0x7a4   : > { %v5494_v51 = vpack.c.bf16 %v3106_v63, %v3090_v16  ;;  %v5496_v41 = vpack.c.bf16 %v3108_v1, %v3092_v36  ;;  %v4375_v35 = vcombine.high %v3232_v24, %v3240_v21  ;;  %v4374_v29 = vcombine.low %v3232_v24, %v3240_v21  ;;  %v5544_v48 = vld [vmem:[%s4794_s27 + $0xf8] sm:$0xff] }
 0x7a5   : > { %3856 = vmatpush1.bf16.xpose.msra.mxu0 %v5328_v55  ;;  %3733 = vmatpush1.bf16.xpose.msra.mxu1 %v4342_v44  ;;  %v3123_v52 = vpack.c.bf16 %v3107_v14, %v3091_v5  ;;  %v5499_v49 = vpack.c.bf16 %v3109_v27, %v3093_v18  ;;  %v3172_v55 = vunpack.c.l.s8.bf16 %v5505_v61  ;;  %v4313_v37 = vcombine.high %v3169_v23, %v3177_v40  ;;  %v3161_v44 = vld [vmem:[%s4794_s27 + $0x118] sm:$0xff] }
 0x7a6   : > { %3857 = vmatprep.subr.bf16.mxu0 %v5330_v57  ;;  %3734 = vmatprep.subr.bf16.mxu1 %v4359_v58  ;;  %v3180_v57 = vunpack.c.l.s8.bf16 %v5508_v7  ;;  %v3193_v39 = vunpack.c.h.s8.bf16 %v5443_v13  ;;  %v4312_v53 = vcombine.low %v3169_v23, %v3177_v40  ;;  %v3212_v2 = vunpack.c.l.s8.bf16 %v5531_v25  ;;  %v3165_v58 = vld [vmem:[%s4794_s27 + $0x138] sm:$0x55] }
 0x7a7   : > { %v3201_v13 = vunpack.c.h.s8.bf16 %v5452_v22  ;;  %v3209_v26 = vunpack.c.h.s8.bf16 %v5455_v3  ;;  %v3228_v31 = vunpack.c.l.s8.bf16 %v5544_v48  ;;  %v3217_v22 = vunpack.c.h.s8.bf16 %v5475_v17 }
 0x7a8   : > { %v4319_v10 = vcombine.high %v3172_v55, %v3180_v57  ;;  %v4318_v50 = vcombine.low %v3172_v55, %v3180_v57  ;;  %v4329_v12 = vcombine.high %v3185_v8, %v3193_v39  ;;  %v4328_v32 = vcombine.low %v3185_v8, %v3193_v39  ;;  %v4386_v39 = vld [vmem:[%s4799_s16 + $0x6] ss:$0 sm:$0xff] }
 0x7a9   : > { %v3225_v3 = vunpack.c.h.s8.bf16 %v5478_v33  ;;  %v4344_v56 = vcombine.low %v3201_v13, %v3209_v26  ;;  %v3236_v16 = vunpack.c.l.s8.bf16 %v3161_v44  ;;  %v3244_v36 = vunpack.c.l.s8.bf16 %v3165_v58 }
 0x7aa   : > { %v3233_v63 = vunpack.c.h.s8.bf16 %v5489_v4  ;;  %v3241_v1 = vunpack.c.h.s8.bf16 %v5492_v0  ;;  %v3173_v14 = vunpack.c.h.s8.bf16 %v5505_v61  ;;  %v3181_v27 = vunpack.c.h.s8.bf16 %v5508_v7 }
 0x7ab   : > { %v4361_v43 = vcombine.high %v3217_v22, %v3225_v3  ;;  %v4360_v17 = vcombine.low %v3217_v22, %v3225_v3  ;;  %v4383_v18 = vcombine.high %v3236_v16, %v3244_v36  ;;  %v3189_v4 = vunpack.c.h.s8.bf16 %v5517_v20 }
 0x7ac   : > { %v4377_v33 = vcombine.high %v3233_v63, %v3241_v1  ;;  %v4376_v24 = vcombine.low %v3233_v63, %v3241_v1  ;;  %v4321_v21 = vcombine.high %v3173_v14, %v3181_v27  ;;  %v3205_v61 = vunpack.c.h.s8.bf16 %v5528_v34 }
 0x7ad   : > { %3858 = vmatpush1.bf16.xpose.msra.mxu0 %v5332_v62  ;;  %3735 = vmatpush1.bf16.xpose.msra.mxu1 %v4358_v30  ;;  %v5520_v62 = vld [vmem:[%s4794_s27 + $0x78] sm:$0xff]  ;;  %v4320_v30 = vcombine.low %v3173_v14, %v3181_v27  ;;  %v3213_v7 = vunpack.c.h.s8.bf16 %v5531_v25  ;;  %v3221_v23 = vunpack.c.h.s8.bf16 %v5541_v42  ;;  %v3229_v40 = vunpack.c.h.s8.bf16 %v5544_v48 }
 0x7ae   : > { %3859 = vmatprep.subr.bf16.mxu0 %v5334_v6  ;;  %3736 = vmatprep.subr.bf16.mxu1 %v4375_v35  ;;  %v3188_v6 = vunpack.c.l.s8.bf16 %v5517_v20  ;;  %v3196_v47 = vunpack.c.l.s8.bf16 %v5520_v62  ;;  %v3197_v0 = vunpack.c.h.s8.bf16 %v5520_v62 }
 0x7af   : > { %v4353_v57 = vcombine.high %v3205_v61, %v3213_v7 }
 0x7b0   : > { %v4335_v15 = vcombine.high %v3188_v6, %v3196_v47  ;;  %v4337_v35 = vcombine.high %v3189_v4, %v3197_v0  ;;  %v4336_v55 = vcombine.low %v3189_v4, %v3197_v0 }
 0x7b5   : > { %3860 = vmatpush1.bf16.xpose.msra.mxu0 %v5336_v19  ;;  %3737 = vmatpush1.bf16.xpose.msra.mxu1 %v4374_v29  ;;  %v3204_v19 = vunpack.c.l.s8.bf16 %v5528_v34  ;;  %v4352_v29 = vcombine.low %v3205_v61, %v3213_v7 }
 0x7b6   : > { %3892 = vmatprep.subr.bf16.mxu0 %v4319_v10  ;;  %3769 = vmatprep.subr.bf16.mxu1 %v4313_v37  ;;  %v4368_v10 = vcombine.low %v3221_v23, %v3229_v40 }
 0x7b7   : > { %v4351_v38 = vcombine.high %v3204_v19, %v3212_v2  ;;  %v4350_v45 = vcombine.low %v3204_v19, %v3212_v2 }
 0x7bc   : > { %3884 = vmatmul.mubr.bf16.vlgmr.msra.gmra.mrb[40].mxu0 %v5448_v54  ;;  %3761 = vmatmul.mubr.bf16.vlgmr.msra.gmra.mrb[36].mxu1 %v5400_v46  ;;  %v4334_v54 = vcombine.low %v3188_v6, %v3196_v47  ;;  %v4345_v46 = vcombine.high %v3201_v13, %v3209_v26 }
 0x7bd   : > { %3893 = vmatpush1.bf16.xpose.msra.mxu0 %v4318_v50  ;;  %3924 = vmatprep.mubr.bf16.mxu0 %v3123_v52  ;;  %v4382_v52 = vcombine.low %v3236_v16, %v3244_v36 }
 0x7be   : > { %3770 = vmatpush1.bf16.xpose.msra.mxu1 %v4312_v53  ;;  %3801 = vmatprep.mubr.bf16.mxu1 %v5406_v59  ;;  %v3220_v59 = vunpack.c.l.s8.bf16 %v5541_v42 }
 0x7bf   : > { %3894 = vmatprep.subr.bf16.mxu0 %v4335_v15  ;;  %3771 = vmatprep.subr.bf16.mxu1 %v4329_v12  ;;  %v4387_v12 = vld [vmem:[%s4799_s16 + $0x5] ss:$0 sm:$0xff] }
 0x7c0   : > { %v4367_v11 = vcombine.high %v3220_v59, %v3228_v31  ;;  %v4366_v5 = vcombine.low %v3220_v59, %v3228_v31 }
 0x7c5   : > { %3895 = vmatpush1.bf16.xpose.msra.mxu0 %v4334_v54 }
 0x7c6   : > { %3772 = vmatpush1.bf16.xpose.msra.mxu1 %v4328_v32  ;;  %3896 = vmatprep.subr.bf16.mxu0 %v4351_v38 }
 0x7c7   : > { %3773 = vmatprep.subr.bf16.mxu1 %v4345_v46 }
 0x7cd   : > { %3897 = vmatpush1.bf16.xpose.msra.mxu0 %v4350_v45 }
 0x7ce   : > { %3774 = vmatpush1.bf16.xpose.msra.mxu1 %v4344_v56  ;;  %3898 = vmatprep.subr.bf16.mxu0 %v4367_v11 }
 0x7cf   : > { %3775 = vmatprep.subr.bf16.mxu1 %v4361_v43 }
 0x7d5   : > { %3899 = vmatpush1.bf16.xpose.msra.mxu0 %v4366_v5 }
 0x7d6   : > { %3776 = vmatpush1.bf16.xpose.msra.mxu1 %v4360_v17  ;;  %3900 = vmatprep.subr.bf16.mxu0 %v4383_v18  ;;  %v4390_v18 = vld [vmem:[#allocation3] ss:$0 sm:$0xff] (!%p4388_p5) }
 0x7d7   : > { %3777 = vmatprep.subr.bf16.mxu1 %v4377_v33 }
 0x7dd   : > { %3901 = vmatpush1.bf16.xpose.msra.mxu0 %v4382_v52 }
 0x7de   : > { %3778 = vmatpush1.bf16.xpose.msra.mxu1 %v4376_v24  ;;  %3933 = vmatprep.subr.bf16.mxu0 %v4321_v21 }
 0x7e4   : > { %3925 = vmatmul.mubr.bf16.vlgmr.msra.gmra.mrb[40].mxu0 %v5494_v51  ;;  %v4369_v51 = vcombine.high %v3221_v23, %v3229_v40 }
 0x7e5   : > { %3802 = vmatmul.mubr.bf16.vlgmr.msra.gmra.mrb[36].mxu1 %v5402_v28  ;;  %3934 = vmatpush1.bf16.xpose.msra.mxu0 %v4320_v30  ;;  %v3237_v28 = vunpack.c.h.s8.bf16 %v3161_v44  ;;  %v4389_v44 = vld [vmem:[%s5595_s10] ss:$0 sm:$0xff] (!%p4388_p5) }
 0x7e6   : > { %3965 = vmatprep.mubr.bf16.mxu0 %v5499_v49  ;;  %3935 = vmatprep.subr.bf16.mxu0 %v4337_v35  ;;  %v3245_v49 = vunpack.c.h.s8.bf16 %v3165_v58 }
 0x7e8   : > { %v4385_v37 = vcombine.high %v3237_v28, %v3245_v49  ;;  %v4384_v20 = vcombine.low %v3237_v28, %v3245_v49 }
 0x7ed   : > { %3936 = vmatpush1.bf16.xpose.msra.mxu0 %v4336_v55 }
 0x7ee   : > { %3937 = vmatprep.subr.bf16.mxu0 %v4353_v57 }
 0x7f5   : > { %3938 = vmatpush1.bf16.xpose.msra.mxu0 %v4352_v29 }
 0x7f6   : > { %3939 = vmatprep.subr.bf16.mxu0 %v4369_v51 }
 0x7fd   : > { %3940 = vmatpush1.bf16.xpose.msra.mxu0 %v4368_v10 }
 0x7fe   : > { %3941 = vmatprep.subr.bf16.mxu0 %v4385_v37 }
 0x805   : > { %3942 = vmatpush1.bf16.xpose.msra.mxu0 %v4384_v20 }
 0x80c   : > { %3966 = vmatmul.mubr.bf16.vlgmr.msra.gmra.mrb[40].mxu0 %v5496_v41 }
 0x8b8   : > { %v3803_v62 = vpop.f32.mrb[36].mxu1 }
 0x8b9   : > { %v3805_v6 = vpop.f32.mrb[37].mxu1 }
 0x8ba   : > { %v3806_v47 = vpop.f32.mrb[38].mxu1 }
 0x8bb   : > { %v3808_v8 = vpop.f32.mrb[39].mxu1 }
 0x8df   : > { %v3967_v50 = vpop.f32.mrb[40].mxu0 }
 0x8e0   : > { %v4512_v53 = vadd.f32 %v3967_v50, %v3803_v62  ;;  %v3969_v15 = vpop.f32.mrb[41].mxu0 }
 0x8e1   : > { %v3970_v34 = vpop.f32.mrb[42].mxu0 }
 0x8e2   : > { %v3978_v25 = vmul.f32 %v4512_v53, %v4386_v39  ;;  %v4513_v19 = vadd.f32 %v3970_v34, %v3806_v47  ;;  %v3972_v2 = vpop.f32.mrb[43].mxu0 }
 0x8e4   : > { %v3984_v13 = vadd.f32 %v4387_v12, %v3978_v25  ;;  %v3979_v26 = vmul.f32 %v4513_v19, %v4386_v39  ;;  %3993 = sbr.rel (%p4388_p5) target bundleno = 2474 (0x9aa), region = 76 }
 0x8e6   : > { %v3986_v54 = vadd.f32 %v3984_v13, %v5164_v60  ;;  %v3985_v32 = vadd.f32 %v4387_v12, %v3979_v26 }
 0x8e8   : > { %3988 = vst.msk [vmem:[#allocation2] sm:$0xff] %vm558_vm1, %v3986_v54  ;;  %v3987_v41 = vadd.f32 %v3985_v32, %v5166_v9  ;;  %v3994_v38 = vsel (!%p4388_p5), %vm558_vm1, %v3986_v54, 0.0 }
 0x8e9   : > { %v3995_v42 = vrot.slane (!%p4388_p5), %v3994_v38, 4 }
 0x8ea   : > { %3989 = vst.msk [vmem:[#allocation2 + $0x8] sm:$0xff] %vm558_vm1, %v3987_v41  ;;  %v4001_v46 = vsel (!%p4388_p5), %vm558_vm1, %v3987_v41, 0.0 }
 0x8eb   : > { %v4002_v48 = vrot.slane %v4001_v46, 4  ;;  %v3996_v59 = vadd.f32 %v3995_v42, %v3994_v38 }
 0x8ed   : > { %v4003_v31 = vadd.f32 %v4002_v48, %v4001_v46  ;;  %v3997_v22 = vrot.slane %v3996_v59, 2 }
 0x8ef   : > { %v4004_v60 = vrot.slane %v4003_v31, 2  ;;  %v3998_v3 = vadd.f32 %v3997_v22, %v3996_v59 }
 0x8f1   : > { %v4005_v45 = vadd.f32 %v4004_v60, %v4003_v31  ;;  %v3999_v56 = vrot.slane %v3998_v3, 1 }
 0x8f3   : > { %v4006_v11 = vrot.slane %v4005_v45, 1  ;;  %v4000_v9 = vadd.f32 %v3999_v56, %v3998_v3 }
 0x8f5   : > { %v4007_v43 = vadd.f32 %v4006_v11, %v4005_v45  ;;  %v4009_v58 = vmul.f32 0.125, %v4000_v9 }
 0x8f7   : > { %v4010_v16 = vmul.f32 0.125, %v4007_v43  ;;  %v4018_v36 = vmul.f32 %v4389_v44, %v4009_v58 }
 0x8f9   : > { %v4019_v63 = vmul.f32 %v4389_v44, %v4010_v16 }
 0x8fb   : > { %v4022_v1 = vrot.slane %v4019_v63, 7 }
 0x8fd   : > { %v4023_v5 = vsel %vm1808_vm6, %v4022_v1, %v4018_v36 }
 0x8fe   : > { %v4026_v17 = vsel %vm4025_vm13, %v4023_v5, 0.0 }
 0x8ff   : > { %4027 = vadd.xlane.f32.xlu0 %v4026_v17 }
 0x98c   : > { %v4028_v33 = vpop.xlane.xlu0 %4027 }
 0x98d   : > { %v4036_v14 = vadd.f32 %v4390_v18, %v4028_v33 }
 0x98f   : > { %v4391_v27 = vmul.f32 -1.442695, %v4036_v14 }
 0x991   : > { %4664 = vpow2.f32 %v4391_v27 }
 0x99b   : > { %v4665_v52 = vpop.eup %4664 }
 0x99c   : > { %v4040_v24 = vadd.f32 1.0, %v4665_v52 }
 0x99e   : > { %4666 = vrcp.f32 %v4040_v24 }
 0x9a8   : > { %v4667_v21 = vpop.eup %4666 }
 0x9a9   : > { %4044 = vst.msk [vmem:[%s5597_s12] sm:$0x3] %vm4043_vm14, %v4667_v21 }
 0x9aa PF: > { %s5606_s19 = sld [smem:[#allocation4_spill]] }
 0x9b0   : > { %s24_s23 = sadd.s32 1, %s5606_s19  }
 0x9b1   : > { %p21_p6 = scmp.ge.s32.totalorder %s24_s23, 10  }
 0x9b3   :  { %23 = sbr.rel (!%p21_p6) target bundleno = 4 (0x4), region = 123 }

</bundles_post_ra>
